<compile_context>
chip_gen: v5e
topology: v5e:2x2
jax: 0.10.0
libtpu: 0.0.40
codegen_flags: <defaults>
</compile_context>

<pallas_src>
import jax
import jax.numpy as jnp
from jax import lax
from jax.experimental import pallas as pl
from jax.experimental.pallas import tpu as pltpu

EMB_DIM = 32          # emb_dim == nhid == num_features
NUM_VOCAB = 8
MAX_SEQ_LEN = 4
NUM_LAYERS = 3
POOL_RATIO = 0.5
NUM_NODETYPES = 12    # node_encoder (ASTNodeEncoder) vocab sizes
NUM_NODEATTRS = 20
MAX_DEPTH = 8
OUT_PAD = 128         # lane-dense padded width of the packed head output
TOPK_ITERS = 32       # bisection steps for the per-graph top-k threshold

F32 = jnp.float32
BF16 = jnp.bfloat16


# ----------------------------- fused Pallas kernel --------------------------

def fused_forward_kernel(
    x0_ref, edge_col_ref, edge_row_ref, batch_col_ref, batch_row_ref, edge_attr_ref,
    conv_wx_ref, conv_bias_ref, pool_w_ref, lin_w_ref, head_w_ref, mlp_b_ref,
    o_ref, readout_ref,
):
    N, D = x0_ref.shape
    E = edge_col_ref.shape[0]
    B = readout_ref.shape[0]
    L = conv_wx_ref.shape[0]

    x = x0_ref[...]
    edge_attr = edge_attr_ref[...]
    src_col = edge_col_ref[:, 0:1]          # [E,1] int32
    dst_col = edge_col_ref[:, 1:2]          # [E,1]
    src_row = edge_row_ref[0:1, :]          # [1,E]
    dst_row = edge_row_ref[1:2, :]          # [1,E]
    batch_col = batch_col_ref[...]          # [N,1]
    batch_row = batch_row_ref[...]          # [1,N]

    # 0/1 gather/scatter operators built in-kernel from tiny int arrays (hoisted out
    # of the layer loop). bf16 0/1 values are exact; accumulation is always f32.
    iota_en = lax.broadcasted_iota(jnp.int32, (E, N), 1)
    iota_ne = lax.broadcasted_iota(jnp.int32, (N, E), 0)
    src_oh = (src_col == iota_en).astype(BF16)        # [E,N] gather at src
    dst_oh = (dst_col == iota_en).astype(BF16)        # [E,N] gather at dst
    src_oh_t = (iota_ne == src_row).astype(BF16)      # [N,E] scatter-add over src
    dst_oh_t = (iota_ne == dst_row).astype(BF16)      # [N,E] scatter-add over dst
    iota_nb = lax.broadcasted_iota(jnp.int32, (N, B), 1)
    iota_bn = lax.broadcasted_iota(jnp.int32, (B, N), 0)
    batch_oh_nb = (batch_col == iota_nb).astype(F32)  # [N,B] per-graph scalar -> nodes
    batch_oh_bn = (iota_bn == batch_row).astype(F32)  # [B,N] per-graph sums

    node_mask = jnp.ones((N, 1), F32)
    edge_mask = jnp.ones((E, 1), F32)

    # readout scratch: [:, :D] = running sum of gmp, [:, D:] = running sum of gap
    readout_ref[...] = jnp.zeros_like(readout_ref)

    for l in range(L):                      # static unroll: weights are [L, ...] stacks
        wx = conv_wx_ref[l]                 # [D+2, D]  (node linear | edge encoder)
        w = wx[:D, :].astype(BF16)
        we = wx[D:, :]
        cb = conv_bias_ref[l]               # [4, D]: b | be | root | [b_rel, 0...]
        b, be, root = cb[0:1, :], cb[1:2, :], cb[2:3, :]
        pb = cb[3:4, 0:1]                   # [1,1]
        pw = pool_w_ref[l].astype(BF16)     # [D, 2] packed w_rel | w_root

        # ---------- GCNConvOGB (with edge features) + outer relu ----------
        deg = 1.0 + jnp.dot(src_oh_t, edge_mask.astype(BF16),
                            preferred_element_type=F32)                      # [N,1] exact
        dinv = lax.rsqrt(deg)                                                # [N,1]
        h = jnp.dot(x.astype(BF16), w, preferred_element_type=F32) + b       # [N,D]
        e = jnp.dot(edge_attr, we, preferred_element_type=F32) + be          # [E,D]
        # fused gather of [h | dinv] at src in a single [E,N]x[N,D+1] matmul
        hg = jnp.concatenate([h, dinv], axis=1).astype(BF16)                 # [N,D+1]
        sg = jnp.dot(src_oh, hg, preferred_element_type=F32)                 # [E,D+1]
        xj, dinv_src = sg[:, :D], sg[:, D:D + 1]
        dinv_dst = jnp.dot(dst_oh, dinv.astype(BF16), preferred_element_type=F32)
        norm = edge_mask * dinv_src * dinv_dst                               # [E,1]
        msg = norm * jnp.maximum(xj + e, 0.0)                                # [E,D]
        agg = jnp.dot(dst_oh_t, msg.astype(BF16), preferred_element_type=F32)  # [N,D]
        x = jnp.maximum(agg + jnp.maximum(h + root, 0.0) * (dinv * dinv), 0.0)

        # ---------- SAGPooling score: GraphConv(D -> 1, aggr='add') ----------
        pr = jnp.dot(x.astype(BF16), pw, preferred_element_type=F32)         # [N,2]
        p_rel, p_root = pr[:, 0:1], pr[:, 1:2]
        rel_msg = edge_mask * jnp.dot(src_oh, p_rel.astype(BF16),
                                      preferred_element_type=F32)            # [E,1]
        score = (jnp.dot(dst_oh_t, rel_msg.astype(BF16), preferred_element_type=F32)
                 + pb + p_root)                                              # [N,1]

        # ---------- per-graph top-k (k = ceil(ratio*n_g)) via threshold bisection ----
        active = node_mask > 0.5
        counts = jnp.dot(batch_oh_bn, node_mask, preferred_element_type=F32)  # [B,1]
        k = jnp.ceil(POOL_RATIO * counts)                                     # [B,1]
        smin = jnp.min(jnp.where(active, score, jnp.inf), axis=0, keepdims=True)
        smax = jnp.max(jnp.where(active, score, -jnp.inf), axis=0, keepdims=True)
        lo0 = jnp.zeros((B, 1), F32) + (smin - 1.0)
        hi0 = jnp.zeros((B, 1), F32) + (smax + 1.0)

        def bis_body(_, carry):
            lo, hi = carry
            mid = 0.5 * (lo + hi)
            t_node = jnp.dot(batch_oh_nb, mid, preferred_element_type=F32)   # [N,1]
            ind = jnp.where((score >= t_node) & active, 1.0, 0.0)
            cnt = jnp.dot(batch_oh_bn, ind, preferred_element_type=F32)      # [B,1]
            ok = cnt >= k
            return jnp.where(ok, mid, lo), jnp.where(ok, hi, mid)

        lo, _ = lax.fori_loop(0, TOPK_ITERS, bis_body, (lo0, hi0))
        thr_node = jnp.dot(batch_oh_nb, lo, preferred_element_type=F32)      # [N,1]
        new_mask = node_mask * jnp.where(score >= thr_node, 1.0, 0.0)

        # x[perm] * tanh(score[perm]) (multiplier = 1), expressed as masked scaling
        x = x * jnp.tanh(score) * new_mask
        node_mask = new_mask
        # filter_adj: drop edges with a pruned endpoint
        m_bf = new_mask.astype(BF16)
        edge_mask = (edge_mask
                     * jnp.dot(src_oh, m_bf, preferred_element_type=F32)
                     * jnp.dot(dst_oh, m_bf, preferred_element_type=F32))

        # ---------- readout: running sum over layers of [gmp | gap] ----------
        r_counts = jnp.dot(batch_oh_bn, node_mask, preferred_element_type=F32)  # [B,1]
        inv_cnt = pl.reciprocal(jnp.maximum(r_counts, 1.0), approx=True)
        readout_ref[:, D:] += jnp.dot(batch_oh_bn, x, preferred_element_type=F32) * inv_cnt

        sel = node_mask > 0.5
        xv = x

        @pl.loop(0, B)   # per-graph masked max, dynamic row store into the scratch
        def _(g):
            m_g = (batch_col == g) & sel                                      # [N,1]
            mx = jnp.max(jnp.where(m_g, xv, -jnp.inf), axis=0, keepdims=True) # [1,D]
            cnt = jnp.sum(jnp.where(m_g, 1.0, 0.0), axis=0, keepdims=True)    # [1,1]
            mx = jnp.where(cnt > 0.5, mx, 0.0)                                # empty -> 0
            readout_ref[pl.ds(g, 1), 0:D] += mx

    # ---- sum of readouts -> lin1+relu -> dropout(eval) -> lin2+relu -> packed heads ----
    ro = readout_ref[...]                                                     # [B, 2D]
    w1 = lin_w_ref[:2 * D, :]
    w2 = lin_w_ref[2 * D:, :]
    b1 = mlp_b_ref[0:1, :D]
    b2 = mlp_b_ref[1:2, :D]
    head_b = mlp_b_ref[2:3, :]
    h1 = jnp.maximum(jnp.dot(ro, w1, preferred_element_type=F32) + b1, 0.0)
    # TODO(synk): F.dropout in training mode not ported; module run eval-mode (identity).
    h2 = jnp.maximum(jnp.dot(h1, w2, preferred_element_type=F32) + b2, 0.0)
    # single lane-dense store: max_seq_len heads packed and zero-padded to OUT_PAD lanes
    o_ref[...] = jnp.dot(h2, head_w_ref[...], preferred_element_type=F32) + head_b


# ------------------------------ parameters ---------------------------------

def init_params(key):
    ks = iter(jax.random.split(key, 40))

    def nrm(shape, scale=0.1):
        return scale * jax.random.normal(next(ks), shape, dtype=F32)

    params = dict(
        type_emb=nrm((NUM_NODETYPES, EMB_DIM)),
        attr_emb=nrm((NUM_NODEATTRS, EMB_DIM)),
        depth_emb=nrm((MAX_DEPTH + 1, EMB_DIM)),
        convs=[], pools=[],
    )
    for _ in range(NUM_LAYERS):               # conv1 + convs[0..1], pool1 + pools[0..1]
        params['convs'].append(dict(
            w=nrm((EMB_DIM, EMB_DIM)), b=nrm((1, EMB_DIM)),
            we=nrm((2, EMB_DIM)), be=nrm((1, EMB_DIM)),
            root=nrm((1, EMB_DIM)),
        ))
        params['pools'].append(dict(
            w_rel=nrm((1, EMB_DIM)), b_rel=nrm((1, 1)), w_root=nrm((1, EMB_DIM)),
        ))
    params['w1'] = nrm((2 * EMB_DIM, EMB_DIM)); params['b1'] = nrm((1, EMB_DIM))
    params['w2'] = nrm((EMB_DIM, EMB_DIM));     params['b2'] = nrm((1, EMB_DIM))
    # max_seq_len Linear(D, V) heads packed into one [D, L*V] matmul
    params['head_w'] = nrm((EMB_DIM, MAX_SEQ_LEN * NUM_VOCAB))
    params['head_b'] = nrm((1, MAX_SEQ_LEN * NUM_VOCAB))
    return params


# -------------------------------- forward ----------------------------------

def forward(params, x_feat, edge_index, edge_attr, node_depth, batch, num_graphs):
    N = x_feat.shape[0]
    B = int(num_graphs)
    D = EMB_DIM
    OUT = MAX_SEQ_LEN * NUM_VOCAB

    # node_encoder (ASTNodeEncoder): type + attribute + clipped-depth embeddings (JAX glue)
    depth = jnp.minimum(node_depth.reshape(-1), MAX_DEPTH)
    x0 = (params['type_emb'][x_feat[:, 0]]
          + params['attr_emb'][x_feat[:, 1]]
          + params['depth_emb'][depth]).astype(F32)

    # tiny int index arrays in both layouts (no dense one-hots, no big transposes)
    edge_col = edge_index.T.astype(jnp.int32)        # [E, 2]  (src | dst columns)
    edge_row = edge_index.astype(jnp.int32)          # [2, E]  (src ; dst rows)
    batch_col = batch.reshape(N, 1).astype(jnp.int32)
    batch_row = batch.reshape(1, N).astype(jnp.int32)

    # packed per-layer weights / biases (12 kernel inputs instead of 21)
    conv_wx = jnp.stack([jnp.concatenate([c['w'], c['we']], axis=0)
                         for c in params['convs']])                           # [L, D+2, D]
    conv_bias = jnp.stack([
        jnp.concatenate([c['b'], c['be'], c['root'],
                         jnp.zeros((1, D), F32).at[0, 0].set(p['b_rel'][0, 0])], axis=0)
        for c, p in zip(params['convs'], params['pools'])])                   # [L, 4, D]
    pool_w = jnp.stack([jnp.concatenate([p['w_rel'].T, p['w_root'].T], axis=1)
                        for p in params['pools']])                            # [L, D, 2]
    lin_w = jnp.concatenate([params['w1'], params['w2']], axis=0)             # [3D, D]
    head_w = jnp.zeros((D, OUT_PAD), F32).at[:, :OUT].set(params['head_w'])
    mlp_b = (jnp.zeros((3, OUT_PAD), F32)
             .at[0, :D].set(params['b1'][0])
             .at[1, :D].set(params['b2'][0])
             .at[2, :OUT].set(params['head_b'][0]))

    args = (x0, edge_col, edge_row, batch_col, batch_row, edge_attr.astype(F32),
            conv_wx, conv_bias, pool_w, lin_w, head_w, mlp_b)

    out_pad = pl.pallas_call(
        fused_forward_kernel,
        out_shape=jax.ShapeDtypeStruct((B, OUT_PAD), F32),
        in_specs=[pl.BlockSpec(memory_space=pltpu.MemorySpace.VMEM)] * len(args),
        out_specs=pl.BlockSpec(memory_space=pltpu.MemorySpace.VMEM),
        scratch_shapes=[pltpu.VMEM((B, 2 * D), F32)],   # packed [gmp | gap] accumulator
        compiler_params=pltpu.CompilerParams(vmem_limit_bytes=32 * 1024 * 1024),
    )(*args)

    out = out_pad[:, :OUT]
    return [out[:, i * NUM_VOCAB:(i + 1) * NUM_VOCAB] for i in range(MAX_SEQ_LEN)]


# --------------------------------- main -------------------------------------

if __name__ == "__main__":
    key = jax.random.PRNGKey(0)
    kp, k1, k2, k3, k4, k5 = jax.random.split(key, 6)
    params = init_params(kp)

    N, E, B = 16, 32, 2        # 2 graphs x 8 nodes, 16 edges per graph
    x_feat = jnp.concatenate([
        jax.random.randint(k1, (N, 1), 0, NUM_NODETYPES),
        jax.random.randint(k2, (N, 1), 0, NUM_NODEATTRS)], axis=1).astype(jnp.int32)
    node_depth = jax.random.randint(k3, (N, 1), 0, 12).astype(jnp.int32)
    batch = jnp.repeat(jnp.arange(B, dtype=jnp.int32), N // B)

    edge_graph = jnp.repeat(jnp.arange(B, dtype=jnp.int32), E // B)
    ksrc, kdst = jax.random.split(k4)
    src = jax.random.randint(ksrc, (E,), 0, N // B) + edge_graph * (N // B)
    dst = jax.random.randint(kdst, (E,), 0, N // B) + edge_graph * (N // B)
    edge_index = jnp.stack([src, dst], axis=0).astype(jnp.int32)
    edge_attr = jax.random.normal(k5, (E, 2), dtype=F32)

    preds = forward(params, x_feat, edge_index, edge_attr, node_depth, batch, B)
    preds = jax.block_until_ready(preds)
    assert len(preds) == MAX_SEQ_LEN
    assert all(p.shape == (B, NUM_VOCAB) for p in preds)
    print("KERNEL_OK")
</pallas_src>

<mosaic_0001>
module attributes {stable_mosaic.version = 11 : i64} {
  func.func @fused_forward_kernel(%arg0: memref<16x32xf32, #tpu.memory_space<vmem>>, %arg1: memref<32x2xi32, #tpu.memory_space<vmem>>, %arg2: memref<2x32xi32, #tpu.memory_space<vmem>>, %arg3: memref<16x1xi32, #tpu.memory_space<vmem>>, %arg4: memref<1x16xi32, #tpu.memory_space<vmem>>, %arg5: memref<32x2xf32, #tpu.memory_space<vmem>>, %arg6: memref<3x34x32xf32, #tpu.memory_space<vmem>>, %arg7: memref<3x4x32xf32, #tpu.memory_space<vmem>>, %arg8: memref<3x32x2xf32, #tpu.memory_space<vmem>>, %arg9: memref<96x32xf32, #tpu.memory_space<vmem>>, %arg10: memref<32x128xf32, #tpu.memory_space<vmem>>, %arg11: memref<3x128xf32, #tpu.memory_space<vmem>>, %arg12: memref<2x128xf32, #tpu.memory_space<vmem>>, %arg13: memref<2x64xf32, #tpu.memory_space<vmem>>) attributes {dimension_semantics = [], scalar_prefetch = 0 : i64, scratch_operands = 1 : i64, tpu.core_type = #tpu.core_type<tc>} {
    %c0 = arith.constant 0 : index
    %c0_0 = arith.constant 0 : index
    %0 = vector.load %arg0[%c0, %c0_0] : memref<16x32xf32, #tpu.memory_space<vmem>>, vector<16x32xf32>
    %c0_1 = arith.constant 0 : index
    %c0_2 = arith.constant 0 : index
    %1 = vector.load %arg5[%c0_1, %c0_2] : memref<32x2xf32, #tpu.memory_space<vmem>>, vector<32x2xf32>
    %c0_3 = arith.constant 0 : index
    %c0_4 = arith.constant 0 : index
    %2 = vector.load %arg1[%c0_3, %c0_4] : memref<32x2xi32, #tpu.memory_space<vmem>>, vector<32x1xi32>
    %c0_5 = arith.constant 0 : index
    %c1 = arith.constant 1 : index
    %3 = vector.load %arg1[%c0_5, %c1] : memref<32x2xi32, #tpu.memory_space<vmem>>, vector<32x1xi32>
    %c0_6 = arith.constant 0 : index
    %c0_7 = arith.constant 0 : index
    %4 = vector.load %arg2[%c0_6, %c0_7] : memref<2x32xi32, #tpu.memory_space<vmem>>, vector<1x32xi32>
    %c1_8 = arith.constant 1 : index
    %c0_9 = arith.constant 0 : index
    %5 = vector.load %arg2[%c1_8, %c0_9] : memref<2x32xi32, #tpu.memory_space<vmem>>, vector<1x32xi32>
    %c0_10 = arith.constant 0 : index
    %c0_11 = arith.constant 0 : index
    %6 = vector.load %arg3[%c0_10, %c0_11] : memref<16x1xi32, #tpu.memory_space<vmem>>, vector<16x1xi32>
    %c0_12 = arith.constant 0 : index
    %c0_13 = arith.constant 0 : index
    %7 = vector.load %arg4[%c0_12, %c0_13] : memref<1x16xi32, #tpu.memory_space<vmem>>, vector<1x16xi32>
    %8 = tpu.iota {dimensions = array<i32: 1>} : vector<32x16xi32>
    %9 = tpu.iota {dimensions = array<i32: 0>} : vector<16x32xi32>
    %10 = vector.broadcast %2 : vector<32x1xi32> to vector<32x16xi32>
    %11 = arith.cmpi eq, %10, %8 : vector<32x16xi32>
    %12 = arith.extui %11 : vector<32x16xi1> to vector<32x16xi32>
    %13 = arith.sitofp %12 : vector<32x16xi32> to vector<32x16xf32>
    %14 = arith.truncf %13 : vector<32x16xf32> to vector<32x16xbf16>
    %15 = vector.broadcast %3 : vector<32x1xi32> to vector<32x16xi32>
    %16 = arith.cmpi eq, %15, %8 : vector<32x16xi32>
    %17 = arith.extui %16 : vector<32x16xi1> to vector<32x16xi32>
    %18 = arith.sitofp %17 : vector<32x16xi32> to vector<32x16xf32>
    %19 = arith.truncf %18 : vector<32x16xf32> to vector<32x16xbf16>
    %20 = vector.broadcast %4 : vector<1x32xi32> to vector<16x32xi32>
    %21 = arith.cmpi eq, %9, %20 : vector<16x32xi32>
    %22 = arith.extui %21 : vector<16x32xi1> to vector<16x32xi32>
    %23 = arith.sitofp %22 : vector<16x32xi32> to vector<16x32xf32>
    %24 = arith.truncf %23 : vector<16x32xf32> to vector<16x32xbf16>
    %25 = vector.broadcast %5 : vector<1x32xi32> to vector<16x32xi32>
    %26 = arith.cmpi eq, %9, %25 : vector<16x32xi32>
    %27 = arith.extui %26 : vector<16x32xi1> to vector<16x32xi32>
    %28 = arith.sitofp %27 : vector<16x32xi32> to vector<16x32xf32>
    %29 = arith.truncf %28 : vector<16x32xf32> to vector<16x32xbf16>
    %30 = tpu.iota {dimensions = array<i32: 1>} : vector<16x2xi32>
    %31 = tpu.iota {dimensions = array<i32: 0>} : vector<2x16xi32>
    %32 = vector.broadcast %6 : vector<16x1xi32> to vector<16x2xi32>
    %33 = arith.cmpi eq, %32, %30 : vector<16x2xi32>
    %34 = arith.extui %33 : vector<16x2xi1> to vector<16x2xi32>
    %35 = arith.sitofp %34 : vector<16x2xi32> to vector<16x2xf32>
    %36 = vector.broadcast %7 : vector<1x16xi32> to vector<2x16xi32>
    %37 = arith.cmpi eq, %31, %36 : vector<2x16xi32>
    %38 = arith.extui %37 : vector<2x16xi1> to vector<2x16xi32>
    %39 = arith.sitofp %38 : vector<2x16xi32> to vector<2x16xf32>
    %cst = arith.constant 1.000000e+00 : f32
    %40 = vector.broadcast %cst : f32 to vector<16x1xf32>
    %cst_14 = arith.constant 1.000000e+00 : f32
    %41 = vector.broadcast %cst_14 : f32 to vector<32x1xf32>
    %cst_15 = arith.constant 0.000000e+00 : f32
    %42 = vector.broadcast %cst_15 : f32 to vector<2x64xf32>
    %c0_16 = arith.constant 0 : index
    %c0_17 = arith.constant 0 : index
    %43 = vector.load %arg13[%c0_16, %c0_17] : memref<2x64xf32, #tpu.memory_space<vmem>>, vector<2x64xf32>
    tpu.vector_store %arg13[%c0_16, %c0_17], %42 {strides = array<i32>} : memref<2x64xf32, #tpu.memory_space<vmem>>, vector<2x64xf32>,
    %c0_18 = arith.constant 0 : index
    %c0_19 = arith.constant 0 : index
    %c0_20 = arith.constant 0 : index
    %44 = vector.load %arg6[%c0_18, %c0_19, %c0_20] : memref<3x34x32xf32, #tpu.memory_space<vmem>>, vector<1x34x32xf32>
    %45 = vector.shape_cast %44 : vector<1x34x32xf32> to vector<34x32xf32>
    %46 = vector.extract_strided_slice %45 {offsets = [0, 0], sizes = [32, 32], strides = [1, 1]} : vector<34x32xf32> to vector<32x32xf32>
    %47 = arith.truncf %46 : vector<32x32xf32> to vector<32x32xbf16>
    %48 = vector.extract_strided_slice %45 {offsets = [32, 0], sizes = [2, 32], strides = [1, 1]} : vector<34x32xf32> to vector<2x32xf32>
    %c0_21 = arith.constant 0 : index
    %c0_22 = arith.constant 0 : index
    %c0_23 = arith.constant 0 : index
    %49 = vector.load %arg7[%c0_21, %c0_22, %c0_23] : memref<3x4x32xf32, #tpu.memory_space<vmem>>, vector<1x4x32xf32>
    %50 = vector.shape_cast %49 : vector<1x4x32xf32> to vector<4x32xf32>
    %51 = vector.extract_strided_slice %50 {offsets = [0, 0], sizes = [1, 32], strides = [1, 1]} : vector<4x32xf32> to vector<1x32xf32>
    %52 = vector.extract_strided_slice %50 {offsets = [1, 0], sizes = [1, 32], strides = [1, 1]} : vector<4x32xf32> to vector<1x32xf32>
    %53 = vector.extract_strided_slice %50 {offsets = [2, 0], sizes = [1, 32], strides = [1, 1]} : vector<4x32xf32> to vector<1x32xf32>
    %54 = vector.extract_strided_slice %50 {offsets = [3, 0], sizes = [1, 1], strides = [1, 1]} : vector<4x32xf32> to vector<1x1xf32>
    %c0_24 = arith.constant 0 : index
    %c0_25 = arith.constant 0 : index
    %c0_26 = arith.constant 0 : index
    %55 = vector.load %arg8[%c0_24, %c0_25, %c0_26] : memref<3x32x2xf32, #tpu.memory_space<vmem>>, vector<1x32x2xf32>
    %56 = vector.shape_cast %55 : vector<1x32x2xf32> to vector<32x2xf32>
    %57 = arith.truncf %56 : vector<32x2xf32> to vector<32x2xbf16>
    %58 = arith.truncf %41 : vector<32x1xf32> to vector<32x1xbf16>
    %cst_27 = arith.constant dense<0.000000e+00> : vector<16x1xf32>
    %59 = tpu.matmul %24, %58, %cst_27 {dimension_numbers = #tpu.dot_dimension_numbers<[1], [0], [0], [1], [0, 0, 1, 1], [], []>} : vector<16x32xbf16>, vector<32x1xbf16>, vector<16x1xf32> -> vector<16x1xf32>
    %cst_28 = arith.constant 1.000000e+00 : f32
    %60 = vector.broadcast %cst_28 : f32 to vector<16x1xf32>
    %61 = arith.addf %60, %59 : vector<16x1xf32>
    %62 = math.rsqrt %61 : vector<16x1xf32>
    %63 = arith.truncf %0 : vector<16x32xf32> to vector<16x32xbf16>
    %cst_29 = arith.constant dense<0.000000e+00> : vector<16x32xf32>
    %64 = tpu.matmul %63, %47, %cst_29 {dimension_numbers = #tpu.dot_dimension_numbers<[1], [0], [0], [1], [0, 0, 1, 1], [], []>} : vector<16x32xbf16>, vector<32x32xbf16>, vector<16x32xf32> -> vector<16x32xf32>
    %65 = vector.broadcast %51 : vector<1x32xf32> to vector<16x32xf32>
    %66 = arith.addf %64, %65 : vector<16x32xf32>
    %cst_30 = arith.constant dense<0.000000e+00> : vector<32x32xf32>
    %67 = tpu.matmul %1, %48, %cst_30 {dimension_numbers = #tpu.dot_dimension_numbers<[1], [0], [0], [1], [0, 0, 1, 1], [], []>} : vector<32x2xf32>, vector<2x32xf32>, vector<32x32xf32> -> vector<32x32xf32>
    %68 = vector.broadcast %52 : vector<1x32xf32> to vector<32x32xf32>
    %69 = arith.addf %67, %68 : vector<32x32xf32>
    %70 = tpu.concatenate %66, %62 in 1 : vector<16x32xf32>, vector<16x1xf32> -> vector<16x33xf32>
    %71 = arith.truncf %70 : vector<16x33xf32> to vector<16x33xbf16>
    %cst_31 = arith.constant dense<0.000000e+00> : vector<32x33xf32>
    %72 = tpu.matmul %14, %71, %cst_31 {dimension_numbers = #tpu.dot_dimension_numbers<[1], [0], [0], [1], [0, 0, 1, 1], [], []>} : vector<32x16xbf16>, vector<16x33xbf16>, vector<32x33xf32> -> vector<32x33xf32>
    %73 = vector.extract_strided_slice %72 {offsets = [0, 0], sizes = [32, 32], strides = [1, 1]} : vector<32x33xf32> to vector<32x32xf32>
    %74 = vector.extract_strided_slice %72 {offsets = [0, 32], sizes = [32, 1], strides = [1, 1]} : vector<32x33xf32> to vector<32x1xf32>
    %75 = arith.truncf %62 : vector<16x1xf32> to vector<16x1xbf16>
    %cst_32 = arith.constant dense<0.000000e+00> : vector<32x1xf32>
    %76 = tpu.matmul %19, %75, %cst_32 {dimension_numbers = #tpu.dot_dimension_numbers<[1], [0], [0], [1], [0, 0, 1, 1], [], []>} : vector<32x16xbf16>, vector<16x1xbf16>, vector<32x1xf32> -> vector<32x1xf32>
    %77 = arith.mulf %41, %74 : vector<32x1xf32>
    %78 = arith.mulf %77, %76 : vector<32x1xf32>
    %79 = arith.addf %73, %69 : vector<32x32xf32>
    %cst_33 = arith.constant 0.000000e+00 : f32
    %80 = vector.broadcast %cst_33 : f32 to vector<32x32xf32>
    %81 = arith.maximumf %79, %80 : vector<32x32xf32>
    %82 = vector.broadcast %78 : vector<32x1xf32> to vector<32x32xf32>
    %83 = arith.mulf %82, %81 : vector<32x32xf32>
    %84 = arith.truncf %83 : vector<32x32xf32> to vector<32x32xbf16>
    %cst_34 = arith.constant dense<0.000000e+00> : vector<16x32xf32>
    %85 = tpu.matmul %29, %84, %cst_34 {dimension_numbers = #tpu.dot_dimension_numbers<[1], [0], [0], [1], [0, 0, 1, 1], [], []>} : vector<16x32xbf16>, vector<32x32xbf16>, vector<16x32xf32> -> vector<16x32xf32>
    %86 = vector.broadcast %53 : vector<1x32xf32> to vector<16x32xf32>
    %87 = arith.addf %66, %86 : vector<16x32xf32>
    %cst_35 = arith.constant 0.000000e+00 : f32
    %88 = vector.broadcast %cst_35 : f32 to vector<16x32xf32>
    %89 = arith.maximumf %87, %88 : vector<16x32xf32>
    %90 = arith.mulf %62, %62 : vector<16x1xf32>
    %91 = vector.broadcast %90 : vector<16x1xf32> to vector<16x32xf32>
    %92 = arith.mulf %89, %91 : vector<16x32xf32>
    %93 = arith.addf %85, %92 : vector<16x32xf32>
    %cst_36 = arith.constant 0.000000e+00 : f32
    %94 = vector.broadcast %cst_36 : f32 to vector<16x32xf32>
    %95 = arith.maximumf %93, %94 : vector<16x32xf32>
    %96 = arith.truncf %95 : vector<16x32xf32> to vector<16x32xbf16>
    %cst_37 = arith.constant dense<0.000000e+00> : vector<16x2xf32>
    %97 = tpu.matmul %96, %57, %cst_37 {dimension_numbers = #tpu.dot_dimension_numbers<[1], [0], [0], [1], [0, 0, 1, 1], [], []>} : vector<16x32xbf16>, vector<32x2xbf16>, vector<16x2xf32> -> vector<16x2xf32>
    %98 = vector.extract_strided_slice %97 {offsets = [0, 0], sizes = [16, 1], strides = [1, 1]} : vector<16x2xf32> to vector<16x1xf32>
    %99 = vector.extract_strided_slice %97 {offsets = [0, 1], sizes = [16, 1], strides = [1, 1]} : vector<16x2xf32> to vector<16x1xf32>
    %100 = arith.truncf %98 : vector<16x1xf32> to vector<16x1xbf16>
    %cst_38 = arith.constant dense<0.000000e+00> : vector<32x1xf32>
    %101 = tpu.matmul %14, %100, %cst_38 {dimension_numbers = #tpu.dot_dimension_numbers<[1], [0], [0], [1], [0, 0, 1, 1], [], []>} : vector<32x16xbf16>, vector<16x1xbf16>, vector<32x1xf32> -> vector<32x1xf32>
    %102 = arith.mulf %41, %101 : vector<32x1xf32>
    %103 = arith.truncf %102 : vector<32x1xf32> to vector<32x1xbf16>
    %cst_39 = arith.constant dense<0.000000e+00> : vector<16x1xf32>
    %104 = tpu.matmul %29, %103, %cst_39 {dimension_numbers = #tpu.dot_dimension_numbers<[1], [0], [0], [1], [0, 0, 1, 1], [], []>} : vector<16x32xbf16>, vector<32x1xbf16>, vector<16x1xf32> -> vector<16x1xf32>
    %105 = vector.broadcast %54 : vector<1x1xf32> to vector<16x1xf32>
    %106 = arith.addf %104, %105 : vector<16x1xf32>
    %107 = arith.addf %106, %99 : vector<16x1xf32>
    %cst_40 = arith.constant 5.000000e-01 : f32
    %108 = vector.broadcast %cst_40 : f32 to vector<16x1xf32>
    %109 = arith.cmpf ogt, %40, %108 : vector<16x1xf32>
    %cst_41 = arith.constant dense<0.000000e+00> : vector<2x1xf32>
    %110 = tpu.matmul %39, %40, %cst_41 {dimension_numbers = #tpu.dot_dimension_numbers<[1], [0], [0], [1], [0, 0, 1, 1], [], []>} : vector<2x16xf32>, vector<16x1xf32>, vector<2x1xf32> -> vector<2x1xf32>
    %cst_42 = arith.constant 5.000000e-01 : f32
    %111 = vector.broadcast %cst_42 : f32 to vector<2x1xf32>
    %112 = arith.mulf %111, %110 : vector<2x1xf32>
    %113 = math.ceil %112 : vector<2x1xf32>
    %cst_43 = arith.constant 0x7F800000 : f32
    %114 = vector.broadcast %cst_43 : f32 to vector<16x1xf32>
    %115 = arith.select %109, %107, %114 : vector<16x1xi1>, vector<16x1xf32>
    %cst_44 = arith.constant dense<0x7F800000> : vector<1xf32>
    %116 = vector.multi_reduction <minimumf>, %115, %cst_44 [0] : vector<16x1xf32> to vector<1xf32>
    %117 = vector.shape_cast %116 : vector<1xf32> to vector<1x1xf32>
    %cst_45 = arith.constant 0xFF800000 : f32
    %118 = vector.broadcast %cst_45 : f32 to vector<16x1xf32>
    %119 = arith.select %109, %107, %118 : vector<16x1xi1>, vector<16x1xf32>
    %cst_46 = arith.constant dense<0xFF800000> : vector<1xf32>
    %120 = vector.multi_reduction <maximumf>, %119, %cst_46 [0] : vector<16x1xf32> to vector<1xf32>
    %121 = vector.shape_cast %120 : vector<1xf32> to vector<1x1xf32>
    %cst_47 = arith.constant 0.000000e+00 : f32
    %122 = vector.broadcast %cst_47 : f32 to vector<2x1xf32>
    %cst_48 = arith.constant 1.000000e+00 : f32
    %123 = vector.broadcast %cst_48 : f32 to vector<1x1xf32>
    %124 = arith.subf %117, %123 : vector<1x1xf32>
    %125 = vector.broadcast %124 : vector<1x1xf32> to vector<2x1xf32>
    %126 = arith.addf %122, %125 : vector<2x1xf32>
    %cst_49 = arith.constant 0.000000e+00 : f32
    %127 = vector.broadcast %cst_49 : f32 to vector<2x1xf32>
    %cst_50 = arith.constant 1.000000e+00 : f32
    %128 = vector.broadcast %cst_50 : f32 to vector<1x1xf32>
    %129 = arith.addf %121, %128 : vector<1x1xf32>
    %130 = vector.broadcast %129 : vector<1x1xf32> to vector<2x1xf32>
    %131 = arith.addf %127, %130 : vector<2x1xf32>
    %c0_i32 = arith.constant 0 : i32
    %c32_i32 = arith.constant 32 : i32
    %132 = arith.addi %c0_i32, %c32_i32 : i32
    %c1_i32 = arith.constant 1 : i32
    %133:2 = scf.for %arg14 = %c0_i32 to %132 step %c1_i32 iter_args(%arg15 = %126, %arg16 = %131) -> (vector<2x1xf32>, vector<2x1xf32>)  : i32 {
      %417 = arith.addf %arg15, %arg16 : vector<2x1xf32>
      %cst_189 = arith.constant 5.000000e-01 : f32
      %418 = vector.broadcast %cst_189 : f32 to vector<2x1xf32>
      %419 = arith.mulf %418, %417 : vector<2x1xf32>
      %cst_190 = arith.constant dense<0.000000e+00> : vector<16x1xf32>
      %420 = tpu.matmul %35, %419, %cst_190 {dimension_numbers = #tpu.dot_dimension_numbers<[1], [0], [0], [1], [0, 0, 1, 1], [], []>} : vector<16x2xf32>, vector<2x1xf32>, vector<16x1xf32> -> vector<16x1xf32>
      %421 = arith.cmpf oge, %107, %420 : vector<16x1xf32>
      %422 = arith.andi %421, %109 : vector<16x1xi1>
      %cst_191 = arith.constant 1.000000e+00 : f32
      %cst_192 = arith.constant 0.000000e+00 : f32
      %423 = vector.broadcast %cst_191 : f32 to vector<16x1xf32>
      %424 = vector.broadcast %cst_192 : f32 to vector<16x1xf32>
      %425 = arith.select %422, %423, %424 : vector<16x1xi1>, vector<16x1xf32>
      %cst_193 = arith.constant dense<0.000000e+00> : vector<2x1xf32>
      %426 = tpu.matmul %39, %425, %cst_193 {dimension_numbers = #tpu.dot_dimension_numbers<[1], [0], [0], [1], [0, 0, 1, 1], [], []>} : vector<2x16xf32>, vector<16x1xf32>, vector<2x1xf32> -> vector<2x1xf32>
      %427 = arith.cmpf oge, %426, %113 : vector<2x1xf32>
      %428 = arith.select %427, %419, %arg15 : vector<2x1xi1>, vector<2x1xf32>
      %429 = arith.select %427, %arg16, %419 : vector<2x1xi1>, vector<2x1xf32>
      scf.yield %428, %429 : vector<2x1xf32>, vector<2x1xf32>
    }
    %cst_51 = arith.constant dense<0.000000e+00> : vector<16x1xf32>
    %134 = tpu.matmul %35, %133#0, %cst_51 {dimension_numbers = #tpu.dot_dimension_numbers<[1], [0], [0], [1], [0, 0, 1, 1], [], []>} : vector<16x2xf32>, vector<2x1xf32>, vector<16x1xf32> -> vector<16x1xf32>
    %135 = arith.cmpf oge, %107, %134 : vector<16x1xf32>
    %cst_52 = arith.constant 1.000000e+00 : f32
    %cst_53 = arith.constant 0.000000e+00 : f32
    %136 = vector.broadcast %cst_52 : f32 to vector<16x1xf32>
    %137 = vector.broadcast %cst_53 : f32 to vector<16x1xf32>
    %138 = arith.select %135, %136, %137 : vector<16x1xi1>, vector<16x1xf32>
    %139 = arith.mulf %40, %138 : vector<16x1xf32>
    %140 = math.tanh %107 : vector<16x1xf32>
    %141 = vector.broadcast %140 : vector<16x1xf32> to vector<16x32xf32>
    %142 = arith.mulf %95, %141 : vector<16x32xf32>
    %143 = vector.broadcast %139 : vector<16x1xf32> to vector<16x32xf32>
    %144 = arith.mulf %142, %143 : vector<16x32xf32>
    %145 = arith.truncf %139 : vector<16x1xf32> to vector<16x1xbf16>
    %cst_54 = arith.constant dense<0.000000e+00> : vector<32x1xf32>
    %146 = tpu.matmul %14, %145, %cst_54 {dimension_numbers = #tpu.dot_dimension_numbers<[1], [0], [0], [1], [0, 0, 1, 1], [], []>} : vector<32x16xbf16>, vector<16x1xbf16>, vector<32x1xf32> -> vector<32x1xf32>
    %147 = arith.mulf %41, %146 : vector<32x1xf32>
    %cst_55 = arith.constant dense<0.000000e+00> : vector<32x1xf32>
    %148 = tpu.matmul %19, %145, %cst_55 {dimension_numbers = #tpu.dot_dimension_numbers<[1], [0], [0], [1], [0, 0, 1, 1], [], []>} : vector<32x16xbf16>, vector<16x1xbf16>, vector<32x1xf32> -> vector<32x1xf32>
    %149 = arith.mulf %147, %148 : vector<32x1xf32>
    %cst_56 = arith.constant dense<0.000000e+00> : vector<2x1xf32>
    %150 = tpu.matmul %39, %139, %cst_56 {dimension_numbers = #tpu.dot_dimension_numbers<[1], [0], [0], [1], [0, 0, 1, 1], [], []>} : vector<2x16xf32>, vector<16x1xf32>, vector<2x1xf32> -> vector<2x1xf32>
    %cst_57 = arith.constant 1.000000e+00 : f32
    %151 = vector.broadcast %cst_57 : f32 to vector<2x1xf32>
    %152 = arith.maximumf %150, %151 : vector<2x1xf32>
    %153 = tpu.reciprocal %152 {approx = true} : vector<2x1xf32> -> vector<2x1xf32>
    %c0_58 = arith.constant 0 : index
    %c32 = arith.constant 32 : index
    %154 = vector.load %arg13[%c0_58, %c32] : memref<2x64xf32, #tpu.memory_space<vmem>>, vector<2x32xf32>
    %cst_59 = arith.constant dense<0.000000e+00> : vector<2x32xf32>
    %155 = tpu.matmul %39, %144, %cst_59 {dimension_numbers = #tpu.dot_dimension_numbers<[1], [0], [0], [1], [0, 0, 1, 1], [], []>} : vector<2x16xf32>, vector<16x32xf32>, vector<2x32xf32> -> vector<2x32xf32>
    %156 = vector.broadcast %153 : vector<2x1xf32> to vector<2x32xf32>
    %157 = arith.mulf %155, %156 : vector<2x32xf32>
    %158 = arith.addf %154, %157 : vector<2x32xf32>
    %c0_60 = arith.constant 0 : index
    %c32_61 = arith.constant 32 : index
    %159 = vector.load %arg13[%c0_60, %c32_61] : memref<2x64xf32, #tpu.memory_space<vmem>>, vector<2x32xf32>
    tpu.vector_store %arg13[%c0_60, %c32_61], %158 {strides = array<i32>} : memref<2x64xf32, #tpu.memory_space<vmem>>, vector<2x32xf32>,
    %cst_62 = arith.constant 5.000000e-01 : f32
    %160 = vector.broadcast %cst_62 : f32 to vector<16x1xf32>
    %161 = arith.cmpf ogt, %139, %160 : vector<16x1xf32>
    %c0_i32_63 = arith.constant 0 : i32
    %c2_i32 = arith.constant 2 : i32
    %162 = arith.addi %c0_i32_63, %c2_i32 : i32
    %c1_i32_64 = arith.constant 1 : i32
    scf.for %arg14 = %c0_i32_63 to %162 step %c1_i32_64  : i32 {
      %c1_i32_189 = arith.constant 1 : i32
      %417 = arith.muli %arg14, %c1_i32_189 : i32
      %c0_i32_190 = arith.constant 0 : i32
      %418 = arith.addi %c0_i32_190, %417 : i32
      %419 = vector.broadcast %418 : i32 to vector<16x1xi32>
      %420 = arith.cmpi eq, %6, %419 : vector<16x1xi32>
      %421 = arith.andi %420, %161 : vector<16x1xi1>
      %cst_191 = arith.constant 0xFF800000 : f32
      %422 = vector.shape_cast %421 : vector<16x1xi1> to vector<16x1xi1>
      %423 = vector.broadcast %422 : vector<16x1xi1> to vector<16x32xi1>
      %424 = vector.broadcast %cst_191 : f32 to vector<16x32xf32>
      %425 = arith.select %423, %144, %424 : vector<16x32xi1>, vector<16x32xf32>
      %cst_192 = arith.constant dense<0xFF800000> : vector<32xf32>
      %426 = vector.multi_reduction <maximumf>, %425, %cst_192 [0] : vector<16x32xf32> to vector<32xf32>
      %427 = vector.shape_cast %426 : vector<32xf32> to vector<1x32xf32>
      %cst_193 = arith.constant 1.000000e+00 : f32
      %cst_194 = arith.constant 0.000000e+00 : f32
      %428 = vector.broadcast %cst_193 : f32 to vector<16x1xf32>
      %429 = vector.broadcast %cst_194 : f32 to vector<16x1xf32>
      %430 = arith.select %421, %428, %429 : vector<16x1xi1>, vector<16x1xf32>
      %cst_195 = arith.constant dense<0.000000e+00> : vector<1xf32>
      %431 = vector.multi_reduction <add>, %430, %cst_195 [0] : vector<16x1xf32> to vector<1xf32>
      %432 = vector.shape_cast %431 : vector<1xf32> to vector<1x1xf32>
      %cst_196 = arith.constant 5.000000e-01 : f32
      %433 = vector.broadcast %cst_196 : f32 to vector<1x1xf32>
      %434 = arith.cmpf ogt, %432, %433 : vector<1x1xf32>
      %cst_197 = arith.constant 0.000000e+00 : f32
      %435 = vector.shape_cast %434 : vector<1x1xi1> to vector<1x1xi1>
      %436 = vector.broadcast %435 : vector<1x1xi1> to vector<1x32xi1>
      %437 = vector.broadcast %cst_197 : f32 to vector<1x32xf32>
      %438 = arith.select %436, %427, %437 : vector<1x32xi1>, vector<1x32xf32>
      %439 = arith.index_cast %418 : i32 to index
      %c0_198 = arith.constant 0 : index
      %440 = vector.load %arg13[%439, %c0_198] : memref<2x64xf32, #tpu.memory_space<vmem>>, vector<1x32xf32>
      %441 = arith.addf %440, %438 : vector<1x32xf32>
      %442 = arith.index_cast %418 : i32 to index
      %c0_199 = arith.constant 0 : index
      %443 = vector.load %arg13[%442, %c0_199] : memref<2x64xf32, #tpu.memory_space<vmem>>, vector<1x32xf32>
      tpu.vector_store %arg13[%442, %c0_199], %441 {strides = array<i32>} : memref<2x64xf32, #tpu.memory_space<vmem>>, vector<1x32xf32>,
    }
    %c2_i32_65 = arith.constant 2 : i32
    %c1_66 = arith.constant 1 : index
    %c0_67 = arith.constant 0 : index
    %c0_68 = arith.constant 0 : index
    %163 = vector.load %arg6[%c1_66, %c0_67, %c0_68] : memref<3x34x32xf32, #tpu.memory_space<vmem>>, vector<1x34x32xf32>
    %164 = vector.shape_cast %163 : vector<1x34x32xf32> to vector<34x32xf32>
    %165 = vector.extract_strided_slice %164 {offsets = [0, 0], sizes = [32, 32], strides = [1, 1]} : vector<34x32xf32> to vector<32x32xf32>
    %166 = arith.truncf %165 : vector<32x32xf32> to vector<32x32xbf16>
    %167 = vector.extract_strided_slice %164 {offsets = [32, 0], sizes = [2, 32], strides = [1, 1]} : vector<34x32xf32> to vector<2x32xf32>
    %c1_69 = arith.constant 1 : index
    %c0_70 = arith.constant 0 : index
    %c0_71 = arith.constant 0 : index
    %168 = vector.load %arg7[%c1_69, %c0_70, %c0_71] : memref<3x4x32xf32, #tpu.memory_space<vmem>>, vector<1x4x32xf32>
    %169 = vector.shape_cast %168 : vector<1x4x32xf32> to vector<4x32xf32>
    %170 = vector.extract_strided_slice %169 {offsets = [0, 0], sizes = [1, 32], strides = [1, 1]} : vector<4x32xf32> to vector<1x32xf32>
    %171 = vector.extract_strided_slice %169 {offsets = [1, 0], sizes = [1, 32], strides = [1, 1]} : vector<4x32xf32> to vector<1x32xf32>
    %172 = vector.extract_strided_slice %169 {offsets = [2, 0], sizes = [1, 32], strides = [1, 1]} : vector<4x32xf32> to vector<1x32xf32>
    %173 = vector.extract_strided_slice %169 {offsets = [3, 0], sizes = [1, 1], strides = [1, 1]} : vector<4x32xf32> to vector<1x1xf32>
    %c1_72 = arith.constant 1 : index
    %c0_73 = arith.constant 0 : index
    %c0_74 = arith.constant 0 : index
    %174 = vector.load %arg8[%c1_72, %c0_73, %c0_74] : memref<3x32x2xf32, #tpu.memory_space<vmem>>, vector<1x32x2xf32>
    %175 = vector.shape_cast %174 : vector<1x32x2xf32> to vector<32x2xf32>
    %176 = arith.truncf %175 : vector<32x2xf32> to vector<32x2xbf16>
    %177 = arith.truncf %149 : vector<32x1xf32> to vector<32x1xbf16>
    %cst_75 = arith.constant dense<0.000000e+00> : vector<16x1xf32>
    %178 = tpu.matmul %24, %177, %cst_75 {dimension_numbers = #tpu.dot_dimension_numbers<[1], [0], [0], [1], [0, 0, 1, 1], [], []>} : vector<16x32xbf16>, vector<32x1xbf16>, vector<16x1xf32> -> vector<16x1xf32>
    %cst_76 = arith.constant 1.000000e+00 : f32
    %179 = vector.broadcast %cst_76 : f32 to vector<16x1xf32>
    %180 = arith.addf %179, %178 : vector<16x1xf32>
    %181 = math.rsqrt %180 : vector<16x1xf32>
    %182 = arith.truncf %144 : vector<16x32xf32> to vector<16x32xbf16>
    %cst_77 = arith.constant dense<0.000000e+00> : vector<16x32xf32>
    %183 = tpu.matmul %182, %166, %cst_77 {dimension_numbers = #tpu.dot_dimension_numbers<[1], [0], [0], [1], [0, 0, 1, 1], [], []>} : vector<16x32xbf16>, vector<32x32xbf16>, vector<16x32xf32> -> vector<16x32xf32>
    %184 = vector.broadcast %170 : vector<1x32xf32> to vector<16x32xf32>
    %185 = arith.addf %183, %184 : vector<16x32xf32>
    %cst_78 = arith.constant dense<0.000000e+00> : vector<32x32xf32>
    %186 = tpu.matmul %1, %167, %cst_78 {dimension_numbers = #tpu.dot_dimension_numbers<[1], [0], [0], [1], [0, 0, 1, 1], [], []>} : vector<32x2xf32>, vector<2x32xf32>, vector<32x32xf32> -> vector<32x32xf32>
    %187 = vector.broadcast %171 : vector<1x32xf32> to vector<32x32xf32>
    %188 = arith.addf %186, %187 : vector<32x32xf32>
    %189 = tpu.concatenate %185, %181 in 1 : vector<16x32xf32>, vector<16x1xf32> -> vector<16x33xf32>
    %190 = arith.truncf %189 : vector<16x33xf32> to vector<16x33xbf16>
    %cst_79 = arith.constant dense<0.000000e+00> : vector<32x33xf32>
    %191 = tpu.matmul %14, %190, %cst_79 {dimension_numbers = #tpu.dot_dimension_numbers<[1], [0], [0], [1], [0, 0, 1, 1], [], []>} : vector<32x16xbf16>, vector<16x33xbf16>, vector<32x33xf32> -> vector<32x33xf32>
    %192 = vector.extract_strided_slice %191 {offsets = [0, 0], sizes = [32, 32], strides = [1, 1]} : vector<32x33xf32> to vector<32x32xf32>
    %193 = vector.extract_strided_slice %191 {offsets = [0, 32], sizes = [32, 1], strides = [1, 1]} : vector<32x33xf32> to vector<32x1xf32>
    %194 = arith.truncf %181 : vector<16x1xf32> to vector<16x1xbf16>
    %cst_80 = arith.constant dense<0.000000e+00> : vector<32x1xf32>
    %195 = tpu.matmul %19, %194, %cst_80 {dimension_numbers = #tpu.dot_dimension_numbers<[1], [0], [0], [1], [0, 0, 1, 1], [], []>} : vector<32x16xbf16>, vector<16x1xbf16>, vector<32x1xf32> -> vector<32x1xf32>
    %196 = arith.mulf %149, %193 : vector<32x1xf32>
    %197 = arith.mulf %196, %195 : vector<32x1xf32>
    %198 = arith.addf %192, %188 : vector<32x32xf32>
    %cst_81 = arith.constant 0.000000e+00 : f32
    %199 = vector.broadcast %cst_81 : f32 to vector<32x32xf32>
    %200 = arith.maximumf %198, %199 : vector<32x32xf32>
    %201 = vector.broadcast %197 : vector<32x1xf32> to vector<32x32xf32>
    %202 = arith.mulf %201, %200 : vector<32x32xf32>
    %203 = arith.truncf %202 : vector<32x32xf32> to vector<32x32xbf16>
    %cst_82 = arith.constant dense<0.000000e+00> : vector<16x32xf32>
    %204 = tpu.matmul %29, %203, %cst_82 {dimension_numbers = #tpu.dot_dimension_numbers<[1], [0], [0], [1], [0, 0, 1, 1], [], []>} : vector<16x32xbf16>, vector<32x32xbf16>, vector<16x32xf32> -> vector<16x32xf32>
    %205 = vector.broadcast %172 : vector<1x32xf32> to vector<16x32xf32>
    %206 = arith.addf %185, %205 : vector<16x32xf32>
    %cst_83 = arith.constant 0.000000e+00 : f32
    %207 = vector.broadcast %cst_83 : f32 to vector<16x32xf32>
    %208 = arith.maximumf %206, %207 : vector<16x32xf32>
    %209 = arith.mulf %181, %181 : vector<16x1xf32>
    %210 = vector.broadcast %209 : vector<16x1xf32> to vector<16x32xf32>
    %211 = arith.mulf %208, %210 : vector<16x32xf32>
    %212 = arith.addf %204, %211 : vector<16x32xf32>
    %cst_84 = arith.constant 0.000000e+00 : f32
    %213 = vector.broadcast %cst_84 : f32 to vector<16x32xf32>
    %214 = arith.maximumf %212, %213 : vector<16x32xf32>
    %215 = arith.truncf %214 : vector<16x32xf32> to vector<16x32xbf16>
    %cst_85 = arith.constant dense<0.000000e+00> : vector<16x2xf32>
    %216 = tpu.matmul %215, %176, %cst_85 {dimension_numbers = #tpu.dot_dimension_numbers<[1], [0], [0], [1], [0, 0, 1, 1], [], []>} : vector<16x32xbf16>, vector<32x2xbf16>, vector<16x2xf32> -> vector<16x2xf32>
    %217 = vector.extract_strided_slice %216 {offsets = [0, 0], sizes = [16, 1], strides = [1, 1]} : vector<16x2xf32> to vector<16x1xf32>
    %218 = vector.extract_strided_slice %216 {offsets = [0, 1], sizes = [16, 1], strides = [1, 1]} : vector<16x2xf32> to vector<16x1xf32>
    %219 = arith.truncf %217 : vector<16x1xf32> to vector<16x1xbf16>
    %cst_86 = arith.constant dense<0.000000e+00> : vector<32x1xf32>
    %220 = tpu.matmul %14, %219, %cst_86 {dimension_numbers = #tpu.dot_dimension_numbers<[1], [0], [0], [1], [0, 0, 1, 1], [], []>} : vector<32x16xbf16>, vector<16x1xbf16>, vector<32x1xf32> -> vector<32x1xf32>
    %221 = arith.mulf %149, %220 : vector<32x1xf32>
    %222 = arith.truncf %221 : vector<32x1xf32> to vector<32x1xbf16>
    %cst_87 = arith.constant dense<0.000000e+00> : vector<16x1xf32>
    %223 = tpu.matmul %29, %222, %cst_87 {dimension_numbers = #tpu.dot_dimension_numbers<[1], [0], [0], [1], [0, 0, 1, 1], [], []>} : vector<16x32xbf16>, vector<32x1xbf16>, vector<16x1xf32> -> vector<16x1xf32>
    %224 = vector.broadcast %173 : vector<1x1xf32> to vector<16x1xf32>
    %225 = arith.addf %223, %224 : vector<16x1xf32>
    %226 = arith.addf %225, %218 : vector<16x1xf32>
    %cst_88 = arith.constant 5.000000e-01 : f32
    %227 = vector.broadcast %cst_88 : f32 to vector<16x1xf32>
    %228 = arith.cmpf ogt, %139, %227 : vector<16x1xf32>
    %cst_89 = arith.constant dense<0.000000e+00> : vector<2x1xf32>
    %229 = tpu.matmul %39, %139, %cst_89 {dimension_numbers = #tpu.dot_dimension_numbers<[1], [0], [0], [1], [0, 0, 1, 1], [], []>} : vector<2x16xf32>, vector<16x1xf32>, vector<2x1xf32> -> vector<2x1xf32>
    %cst_90 = arith.constant 5.000000e-01 : f32
    %230 = vector.broadcast %cst_90 : f32 to vector<2x1xf32>
    %231 = arith.mulf %230, %229 : vector<2x1xf32>
    %232 = math.ceil %231 : vector<2x1xf32>
    %cst_91 = arith.constant 0x7F800000 : f32
    %233 = vector.broadcast %cst_91 : f32 to vector<16x1xf32>
    %234 = arith.select %228, %226, %233 : vector<16x1xi1>, vector<16x1xf32>
    %cst_92 = arith.constant dense<0x7F800000> : vector<1xf32>
    %235 = vector.multi_reduction <minimumf>, %234, %cst_92 [0] : vector<16x1xf32> to vector<1xf32>
    %236 = vector.shape_cast %235 : vector<1xf32> to vector<1x1xf32>
    %cst_93 = arith.constant 0xFF800000 : f32
    %237 = vector.broadcast %cst_93 : f32 to vector<16x1xf32>
    %238 = arith.select %228, %226, %237 : vector<16x1xi1>, vector<16x1xf32>
    %cst_94 = arith.constant dense<0xFF800000> : vector<1xf32>
    %239 = vector.multi_reduction <maximumf>, %238, %cst_94 [0] : vector<16x1xf32> to vector<1xf32>
    %240 = vector.shape_cast %239 : vector<1xf32> to vector<1x1xf32>
    %cst_95 = arith.constant 0.000000e+00 : f32
    %241 = vector.broadcast %cst_95 : f32 to vector<2x1xf32>
    %cst_96 = arith.constant 1.000000e+00 : f32
    %242 = vector.broadcast %cst_96 : f32 to vector<1x1xf32>
    %243 = arith.subf %236, %242 : vector<1x1xf32>
    %244 = vector.broadcast %243 : vector<1x1xf32> to vector<2x1xf32>
    %245 = arith.addf %241, %244 : vector<2x1xf32>
    %cst_97 = arith.constant 0.000000e+00 : f32
    %246 = vector.broadcast %cst_97 : f32 to vector<2x1xf32>
    %cst_98 = arith.constant 1.000000e+00 : f32
    %247 = vector.broadcast %cst_98 : f32 to vector<1x1xf32>
    %248 = arith.addf %240, %247 : vector<1x1xf32>
    %249 = vector.broadcast %248 : vector<1x1xf32> to vector<2x1xf32>
    %250 = arith.addf %246, %249 : vector<2x1xf32>
    %c0_i32_99 = arith.constant 0 : i32
    %c32_i32_100 = arith.constant 32 : i32
    %251 = arith.addi %c0_i32_99, %c32_i32_100 : i32
    %c1_i32_101 = arith.constant 1 : i32
    %252:2 = scf.for %arg14 = %c0_i32_99 to %251 step %c1_i32_101 iter_args(%arg15 = %245, %arg16 = %250) -> (vector<2x1xf32>, vector<2x1xf32>)  : i32 {
      %417 = arith.addf %arg15, %arg16 : vector<2x1xf32>
      %cst_189 = arith.constant 5.000000e-01 : f32
      %418 = vector.broadcast %cst_189 : f32 to vector<2x1xf32>
      %419 = arith.mulf %418, %417 : vector<2x1xf32>
      %cst_190 = arith.constant dense<0.000000e+00> : vector<16x1xf32>
      %420 = tpu.matmul %35, %419, %cst_190 {dimension_numbers = #tpu.dot_dimension_numbers<[1], [0], [0], [1], [0, 0, 1, 1], [], []>} : vector<16x2xf32>, vector<2x1xf32>, vector<16x1xf32> -> vector<16x1xf32>
      %421 = arith.cmpf oge, %226, %420 : vector<16x1xf32>
      %422 = arith.andi %421, %228 : vector<16x1xi1>
      %cst_191 = arith.constant 1.000000e+00 : f32
      %cst_192 = arith.constant 0.000000e+00 : f32
      %423 = vector.broadcast %cst_191 : f32 to vector<16x1xf32>
      %424 = vector.broadcast %cst_192 : f32 to vector<16x1xf32>
      %425 = arith.select %422, %423, %424 : vector<16x1xi1>, vector<16x1xf32>
      %cst_193 = arith.constant dense<0.000000e+00> : vector<2x1xf32>
      %426 = tpu.matmul %39, %425, %cst_193 {dimension_numbers = #tpu.dot_dimension_numbers<[1], [0], [0], [1], [0, 0, 1, 1], [], []>} : vector<2x16xf32>, vector<16x1xf32>, vector<2x1xf32> -> vector<2x1xf32>
      %427 = arith.cmpf oge, %426, %232 : vector<2x1xf32>
      %428 = arith.select %427, %419, %arg15 : vector<2x1xi1>, vector<2x1xf32>
      %429 = arith.select %427, %arg16, %419 : vector<2x1xi1>, vector<2x1xf32>
      scf.yield %428, %429 : vector<2x1xf32>, vector<2x1xf32>
    }
    %cst_102 = arith.constant dense<0.000000e+00> : vector<16x1xf32>
    %253 = tpu.matmul %35, %252#0, %cst_102 {dimension_numbers = #tpu.dot_dimension_numbers<[1], [0], [0], [1], [0, 0, 1, 1], [], []>} : vector<16x2xf32>, vector<2x1xf32>, vector<16x1xf32> -> vector<16x1xf32>
    %254 = arith.cmpf oge, %226, %253 : vector<16x1xf32>
    %cst_103 = arith.constant 1.000000e+00 : f32
    %cst_104 = arith.constant 0.000000e+00 : f32
    %255 = vector.broadcast %cst_103 : f32 to vector<16x1xf32>
    %256 = vector.broadcast %cst_104 : f32 to vector<16x1xf32>
    %257 = arith.select %254, %255, %256 : vector<16x1xi1>, vector<16x1xf32>
    %258 = arith.mulf %139, %257 : vector<16x1xf32>
    %259 = math.tanh %226 : vector<16x1xf32>
    %260 = vector.broadcast %259 : vector<16x1xf32> to vector<16x32xf32>
    %261 = arith.mulf %214, %260 : vector<16x32xf32>
    %262 = vector.broadcast %258 : vector<16x1xf32> to vector<16x32xf32>
    %263 = arith.mulf %261, %262 : vector<16x32xf32>
    %264 = arith.truncf %258 : vector<16x1xf32> to vector<16x1xbf16>
    %cst_105 = arith.constant dense<0.000000e+00> : vector<32x1xf32>
    %265 = tpu.matmul %14, %264, %cst_105 {dimension_numbers = #tpu.dot_dimension_numbers<[1], [0], [0], [1], [0, 0, 1, 1], [], []>} : vector<32x16xbf16>, vector<16x1xbf16>, vector<32x1xf32> -> vector<32x1xf32>
    %266 = arith.mulf %149, %265 : vector<32x1xf32>
    %cst_106 = arith.constant dense<0.000000e+00> : vector<32x1xf32>
    %267 = tpu.matmul %19, %264, %cst_106 {dimension_numbers = #tpu.dot_dimension_numbers<[1], [0], [0], [1], [0, 0, 1, 1], [], []>} : vector<32x16xbf16>, vector<16x1xbf16>, vector<32x1xf32> -> vector<32x1xf32>
    %268 = arith.mulf %266, %267 : vector<32x1xf32>
    %cst_107 = arith.constant dense<0.000000e+00> : vector<2x1xf32>
    %269 = tpu.matmul %39, %258, %cst_107 {dimension_numbers = #tpu.dot_dimension_numbers<[1], [0], [0], [1], [0, 0, 1, 1], [], []>} : vector<2x16xf32>, vector<16x1xf32>, vector<2x1xf32> -> vector<2x1xf32>
    %cst_108 = arith.constant 1.000000e+00 : f32
    %270 = vector.broadcast %cst_108 : f32 to vector<2x1xf32>
    %271 = arith.maximumf %269, %270 : vector<2x1xf32>
    %272 = tpu.reciprocal %271 {approx = true} : vector<2x1xf32> -> vector<2x1xf32>
    %c0_109 = arith.constant 0 : index
    %c32_110 = arith.constant 32 : index
    %273 = vector.load %arg13[%c0_109, %c32_110] : memref<2x64xf32, #tpu.memory_space<vmem>>, vector<2x32xf32>
    %cst_111 = arith.constant dense<0.000000e+00> : vector<2x32xf32>
    %274 = tpu.matmul %39, %263, %cst_111 {dimension_numbers = #tpu.dot_dimension_numbers<[1], [0], [0], [1], [0, 0, 1, 1], [], []>} : vector<2x16xf32>, vector<16x32xf32>, vector<2x32xf32> -> vector<2x32xf32>
    %275 = vector.broadcast %272 : vector<2x1xf32> to vector<2x32xf32>
    %276 = arith.mulf %274, %275 : vector<2x32xf32>
    %277 = arith.addf %273, %276 : vector<2x32xf32>
    %c0_112 = arith.constant 0 : index
    %c32_113 = arith.constant 32 : index
    %278 = vector.load %arg13[%c0_112, %c32_113] : memref<2x64xf32, #tpu.memory_space<vmem>>, vector<2x32xf32>
    tpu.vector_store %arg13[%c0_112, %c32_113], %277 {strides = array<i32>} : memref<2x64xf32, #tpu.memory_space<vmem>>, vector<2x32xf32>,
    %cst_114 = arith.constant 5.000000e-01 : f32
    %279 = vector.broadcast %cst_114 : f32 to vector<16x1xf32>
    %280 = arith.cmpf ogt, %258, %279 : vector<16x1xf32>
    %c0_i32_115 = arith.constant 0 : i32
    %c2_i32_116 = arith.constant 2 : i32
    %281 = arith.addi %c0_i32_115, %c2_i32_116 : i32
    %c1_i32_117 = arith.constant 1 : i32
    scf.for %arg14 = %c0_i32_115 to %281 step %c1_i32_117  : i32 {
      %c1_i32_189 = arith.constant 1 : i32
      %417 = arith.muli %arg14, %c1_i32_189 : i32
      %c0_i32_190 = arith.constant 0 : i32
      %418 = arith.addi %c0_i32_190, %417 : i32
      %419 = vector.broadcast %418 : i32 to vector<16x1xi32>
      %420 = arith.cmpi eq, %6, %419 : vector<16x1xi32>
      %421 = arith.andi %420, %280 : vector<16x1xi1>
      %cst_191 = arith.constant 0xFF800000 : f32
      %422 = vector.shape_cast %421 : vector<16x1xi1> to vector<16x1xi1>
      %423 = vector.broadcast %422 : vector<16x1xi1> to vector<16x32xi1>
      %424 = vector.broadcast %cst_191 : f32 to vector<16x32xf32>
      %425 = arith.select %423, %263, %424 : vector<16x32xi1>, vector<16x32xf32>
      %cst_192 = arith.constant dense<0xFF800000> : vector<32xf32>
      %426 = vector.multi_reduction <maximumf>, %425, %cst_192 [0] : vector<16x32xf32> to vector<32xf32>
      %427 = vector.shape_cast %426 : vector<32xf32> to vector<1x32xf32>
      %cst_193 = arith.constant 1.000000e+00 : f32
      %cst_194 = arith.constant 0.000000e+00 : f32
      %428 = vector.broadcast %cst_193 : f32 to vector<16x1xf32>
      %429 = vector.broadcast %cst_194 : f32 to vector<16x1xf32>
      %430 = arith.select %421, %428, %429 : vector<16x1xi1>, vector<16x1xf32>
      %cst_195 = arith.constant dense<0.000000e+00> : vector<1xf32>
      %431 = vector.multi_reduction <add>, %430, %cst_195 [0] : vector<16x1xf32> to vector<1xf32>
      %432 = vector.shape_cast %431 : vector<1xf32> to vector<1x1xf32>
      %cst_196 = arith.constant 5.000000e-01 : f32
      %433 = vector.broadcast %cst_196 : f32 to vector<1x1xf32>
      %434 = arith.cmpf ogt, %432, %433 : vector<1x1xf32>
      %cst_197 = arith.constant 0.000000e+00 : f32
      %435 = vector.shape_cast %434 : vector<1x1xi1> to vector<1x1xi1>
      %436 = vector.broadcast %435 : vector<1x1xi1> to vector<1x32xi1>
      %437 = vector.broadcast %cst_197 : f32 to vector<1x32xf32>
      %438 = arith.select %436, %427, %437 : vector<1x32xi1>, vector<1x32xf32>
      %439 = arith.index_cast %418 : i32 to index
      %c0_198 = arith.constant 0 : index
      %440 = vector.load %arg13[%439, %c0_198] : memref<2x64xf32, #tpu.memory_space<vmem>>, vector<1x32xf32>
      %441 = arith.addf %440, %438 : vector<1x32xf32>
      %442 = arith.index_cast %418 : i32 to index
      %c0_199 = arith.constant 0 : index
      %443 = vector.load %arg13[%442, %c0_199] : memref<2x64xf32, #tpu.memory_space<vmem>>, vector<1x32xf32>
      tpu.vector_store %arg13[%442, %c0_199], %441 {strides = array<i32>} : memref<2x64xf32, #tpu.memory_space<vmem>>, vector<1x32xf32>,
    }
    %c2_i32_118 = arith.constant 2 : i32
    %c2 = arith.constant 2 : index
    %c0_119 = arith.constant 0 : index
    %c0_120 = arith.constant 0 : index
    %282 = vector.load %arg6[%c2, %c0_119, %c0_120] : memref<3x34x32xf32, #tpu.memory_space<vmem>>, vector<1x34x32xf32>
    %283 = vector.shape_cast %282 : vector<1x34x32xf32> to vector<34x32xf32>
    %284 = vector.extract_strided_slice %283 {offsets = [0, 0], sizes = [32, 32], strides = [1, 1]} : vector<34x32xf32> to vector<32x32xf32>
    %285 = arith.truncf %284 : vector<32x32xf32> to vector<32x32xbf16>
    %286 = vector.extract_strided_slice %283 {offsets = [32, 0], sizes = [2, 32], strides = [1, 1]} : vector<34x32xf32> to vector<2x32xf32>
    %c2_121 = arith.constant 2 : index
    %c0_122 = arith.constant 0 : index
    %c0_123 = arith.constant 0 : index
    %287 = vector.load %arg7[%c2_121, %c0_122, %c0_123] : memref<3x4x32xf32, #tpu.memory_space<vmem>>, vector<1x4x32xf32>
    %288 = vector.shape_cast %287 : vector<1x4x32xf32> to vector<4x32xf32>
    %289 = vector.extract_strided_slice %288 {offsets = [0, 0], sizes = [1, 32], strides = [1, 1]} : vector<4x32xf32> to vector<1x32xf32>
    %290 = vector.extract_strided_slice %288 {offsets = [1, 0], sizes = [1, 32], strides = [1, 1]} : vector<4x32xf32> to vector<1x32xf32>
    %291 = vector.extract_strided_slice %288 {offsets = [2, 0], sizes = [1, 32], strides = [1, 1]} : vector<4x32xf32> to vector<1x32xf32>
    %292 = vector.extract_strided_slice %288 {offsets = [3, 0], sizes = [1, 1], strides = [1, 1]} : vector<4x32xf32> to vector<1x1xf32>
    %c2_124 = arith.constant 2 : index
    %c0_125 = arith.constant 0 : index
    %c0_126 = arith.constant 0 : index
    %293 = vector.load %arg8[%c2_124, %c0_125, %c0_126] : memref<3x32x2xf32, #tpu.memory_space<vmem>>, vector<1x32x2xf32>
    %294 = vector.shape_cast %293 : vector<1x32x2xf32> to vector<32x2xf32>
    %295 = arith.truncf %294 : vector<32x2xf32> to vector<32x2xbf16>
    %296 = arith.truncf %268 : vector<32x1xf32> to vector<32x1xbf16>
    %cst_127 = arith.constant dense<0.000000e+00> : vector<16x1xf32>
    %297 = tpu.matmul %24, %296, %cst_127 {dimension_numbers = #tpu.dot_dimension_numbers<[1], [0], [0], [1], [0, 0, 1, 1], [], []>} : vector<16x32xbf16>, vector<32x1xbf16>, vector<16x1xf32> -> vector<16x1xf32>
    %cst_128 = arith.constant 1.000000e+00 : f32
    %298 = vector.broadcast %cst_128 : f32 to vector<16x1xf32>
    %299 = arith.addf %298, %297 : vector<16x1xf32>
    %300 = math.rsqrt %299 : vector<16x1xf32>
    %301 = arith.truncf %263 : vector<16x32xf32> to vector<16x32xbf16>
    %cst_129 = arith.constant dense<0.000000e+00> : vector<16x32xf32>
    %302 = tpu.matmul %301, %285, %cst_129 {dimension_numbers = #tpu.dot_dimension_numbers<[1], [0], [0], [1], [0, 0, 1, 1], [], []>} : vector<16x32xbf16>, vector<32x32xbf16>, vector<16x32xf32> -> vector<16x32xf32>
    %303 = vector.broadcast %289 : vector<1x32xf32> to vector<16x32xf32>
    %304 = arith.addf %302, %303 : vector<16x32xf32>
    %cst_130 = arith.constant dense<0.000000e+00> : vector<32x32xf32>
    %305 = tpu.matmul %1, %286, %cst_130 {dimension_numbers = #tpu.dot_dimension_numbers<[1], [0], [0], [1], [0, 0, 1, 1], [], []>} : vector<32x2xf32>, vector<2x32xf32>, vector<32x32xf32> -> vector<32x32xf32>
    %306 = vector.broadcast %290 : vector<1x32xf32> to vector<32x32xf32>
    %307 = arith.addf %305, %306 : vector<32x32xf32>
    %308 = tpu.concatenate %304, %300 in 1 : vector<16x32xf32>, vector<16x1xf32> -> vector<16x33xf32>
    %309 = arith.truncf %308 : vector<16x33xf32> to vector<16x33xbf16>
    %cst_131 = arith.constant dense<0.000000e+00> : vector<32x33xf32>
    %310 = tpu.matmul %14, %309, %cst_131 {dimension_numbers = #tpu.dot_dimension_numbers<[1], [0], [0], [1], [0, 0, 1, 1], [], []>} : vector<32x16xbf16>, vector<16x33xbf16>, vector<32x33xf32> -> vector<32x33xf32>
    %311 = vector.extract_strided_slice %310 {offsets = [0, 0], sizes = [32, 32], strides = [1, 1]} : vector<32x33xf32> to vector<32x32xf32>
    %312 = vector.extract_strided_slice %310 {offsets = [0, 32], sizes = [32, 1], strides = [1, 1]} : vector<32x33xf32> to vector<32x1xf32>
    %313 = arith.truncf %300 : vector<16x1xf32> to vector<16x1xbf16>
    %cst_132 = arith.constant dense<0.000000e+00> : vector<32x1xf32>
    %314 = tpu.matmul %19, %313, %cst_132 {dimension_numbers = #tpu.dot_dimension_numbers<[1], [0], [0], [1], [0, 0, 1, 1], [], []>} : vector<32x16xbf16>, vector<16x1xbf16>, vector<32x1xf32> -> vector<32x1xf32>
    %315 = arith.mulf %268, %312 : vector<32x1xf32>
    %316 = arith.mulf %315, %314 : vector<32x1xf32>
    %317 = arith.addf %311, %307 : vector<32x32xf32>
    %cst_133 = arith.constant 0.000000e+00 : f32
    %318 = vector.broadcast %cst_133 : f32 to vector<32x32xf32>
    %319 = arith.maximumf %317, %318 : vector<32x32xf32>
    %320 = vector.broadcast %316 : vector<32x1xf32> to vector<32x32xf32>
    %321 = arith.mulf %320, %319 : vector<32x32xf32>
    %322 = arith.truncf %321 : vector<32x32xf32> to vector<32x32xbf16>
    %cst_134 = arith.constant dense<0.000000e+00> : vector<16x32xf32>
    %323 = tpu.matmul %29, %322, %cst_134 {dimension_numbers = #tpu.dot_dimension_numbers<[1], [0], [0], [1], [0, 0, 1, 1], [], []>} : vector<16x32xbf16>, vector<32x32xbf16>, vector<16x32xf32> -> vector<16x32xf32>
    %324 = vector.broadcast %291 : vector<1x32xf32> to vector<16x32xf32>
    %325 = arith.addf %304, %324 : vector<16x32xf32>
    %cst_135 = arith.constant 0.000000e+00 : f32
    %326 = vector.broadcast %cst_135 : f32 to vector<16x32xf32>
    %327 = arith.maximumf %325, %326 : vector<16x32xf32>
    %328 = arith.mulf %300, %300 : vector<16x1xf32>
    %329 = vector.broadcast %328 : vector<16x1xf32> to vector<16x32xf32>
    %330 = arith.mulf %327, %329 : vector<16x32xf32>
    %331 = arith.addf %323, %330 : vector<16x32xf32>
    %cst_136 = arith.constant 0.000000e+00 : f32
    %332 = vector.broadcast %cst_136 : f32 to vector<16x32xf32>
    %333 = arith.maximumf %331, %332 : vector<16x32xf32>
    %334 = arith.truncf %333 : vector<16x32xf32> to vector<16x32xbf16>
    %cst_137 = arith.constant dense<0.000000e+00> : vector<16x2xf32>
    %335 = tpu.matmul %334, %295, %cst_137 {dimension_numbers = #tpu.dot_dimension_numbers<[1], [0], [0], [1], [0, 0, 1, 1], [], []>} : vector<16x32xbf16>, vector<32x2xbf16>, vector<16x2xf32> -> vector<16x2xf32>
    %336 = vector.extract_strided_slice %335 {offsets = [0, 0], sizes = [16, 1], strides = [1, 1]} : vector<16x2xf32> to vector<16x1xf32>
    %337 = vector.extract_strided_slice %335 {offsets = [0, 1], sizes = [16, 1], strides = [1, 1]} : vector<16x2xf32> to vector<16x1xf32>
    %338 = arith.truncf %336 : vector<16x1xf32> to vector<16x1xbf16>
    %cst_138 = arith.constant dense<0.000000e+00> : vector<32x1xf32>
    %339 = tpu.matmul %14, %338, %cst_138 {dimension_numbers = #tpu.dot_dimension_numbers<[1], [0], [0], [1], [0, 0, 1, 1], [], []>} : vector<32x16xbf16>, vector<16x1xbf16>, vector<32x1xf32> -> vector<32x1xf32>
    %340 = arith.mulf %268, %339 : vector<32x1xf32>
    %341 = arith.truncf %340 : vector<32x1xf32> to vector<32x1xbf16>
    %cst_139 = arith.constant dense<0.000000e+00> : vector<16x1xf32>
    %342 = tpu.matmul %29, %341, %cst_139 {dimension_numbers = #tpu.dot_dimension_numbers<[1], [0], [0], [1], [0, 0, 1, 1], [], []>} : vector<16x32xbf16>, vector<32x1xbf16>, vector<16x1xf32> -> vector<16x1xf32>
    %343 = vector.broadcast %292 : vector<1x1xf32> to vector<16x1xf32>
    %344 = arith.addf %342, %343 : vector<16x1xf32>
    %345 = arith.addf %344, %337 : vector<16x1xf32>
    %cst_140 = arith.constant 5.000000e-01 : f32
    %346 = vector.broadcast %cst_140 : f32 to vector<16x1xf32>
    %347 = arith.cmpf ogt, %258, %346 : vector<16x1xf32>
    %cst_141 = arith.constant dense<0.000000e+00> : vector<2x1xf32>
    %348 = tpu.matmul %39, %258, %cst_141 {dimension_numbers = #tpu.dot_dimension_numbers<[1], [0], [0], [1], [0, 0, 1, 1], [], []>} : vector<2x16xf32>, vector<16x1xf32>, vector<2x1xf32> -> vector<2x1xf32>
    %cst_142 = arith.constant 5.000000e-01 : f32
    %349 = vector.broadcast %cst_142 : f32 to vector<2x1xf32>
    %350 = arith.mulf %349, %348 : vector<2x1xf32>
    %351 = math.ceil %350 : vector<2x1xf32>
    %cst_143 = arith.constant 0x7F800000 : f32
    %352 = vector.broadcast %cst_143 : f32 to vector<16x1xf32>
    %353 = arith.select %347, %345, %352 : vector<16x1xi1>, vector<16x1xf32>
    %cst_144 = arith.constant dense<0x7F800000> : vector<1xf32>
    %354 = vector.multi_reduction <minimumf>, %353, %cst_144 [0] : vector<16x1xf32> to vector<1xf32>
    %355 = vector.shape_cast %354 : vector<1xf32> to vector<1x1xf32>
    %cst_145 = arith.constant 0xFF800000 : f32
    %356 = vector.broadcast %cst_145 : f32 to vector<16x1xf32>
    %357 = arith.select %347, %345, %356 : vector<16x1xi1>, vector<16x1xf32>
    %cst_146 = arith.constant dense<0xFF800000> : vector<1xf32>
    %358 = vector.multi_reduction <maximumf>, %357, %cst_146 [0] : vector<16x1xf32> to vector<1xf32>
    %359 = vector.shape_cast %358 : vector<1xf32> to vector<1x1xf32>
    %cst_147 = arith.constant 0.000000e+00 : f32
    %360 = vector.broadcast %cst_147 : f32 to vector<2x1xf32>
    %cst_148 = arith.constant 1.000000e+00 : f32
    %361 = vector.broadcast %cst_148 : f32 to vector<1x1xf32>
    %362 = arith.subf %355, %361 : vector<1x1xf32>
    %363 = vector.broadcast %362 : vector<1x1xf32> to vector<2x1xf32>
    %364 = arith.addf %360, %363 : vector<2x1xf32>
    %cst_149 = arith.constant 0.000000e+00 : f32
    %365 = vector.broadcast %cst_149 : f32 to vector<2x1xf32>
    %cst_150 = arith.constant 1.000000e+00 : f32
    %366 = vector.broadcast %cst_150 : f32 to vector<1x1xf32>
    %367 = arith.addf %359, %366 : vector<1x1xf32>
    %368 = vector.broadcast %367 : vector<1x1xf32> to vector<2x1xf32>
    %369 = arith.addf %365, %368 : vector<2x1xf32>
    %c0_i32_151 = arith.constant 0 : i32
    %c32_i32_152 = arith.constant 32 : i32
    %370 = arith.addi %c0_i32_151, %c32_i32_152 : i32
    %c1_i32_153 = arith.constant 1 : i32
    %371:2 = scf.for %arg14 = %c0_i32_151 to %370 step %c1_i32_153 iter_args(%arg15 = %364, %arg16 = %369) -> (vector<2x1xf32>, vector<2x1xf32>)  : i32 {
      %417 = arith.addf %arg15, %arg16 : vector<2x1xf32>
      %cst_189 = arith.constant 5.000000e-01 : f32
      %418 = vector.broadcast %cst_189 : f32 to vector<2x1xf32>
      %419 = arith.mulf %418, %417 : vector<2x1xf32>
      %cst_190 = arith.constant dense<0.000000e+00> : vector<16x1xf32>
      %420 = tpu.matmul %35, %419, %cst_190 {dimension_numbers = #tpu.dot_dimension_numbers<[1], [0], [0], [1], [0, 0, 1, 1], [], []>} : vector<16x2xf32>, vector<2x1xf32>, vector<16x1xf32> -> vector<16x1xf32>
      %421 = arith.cmpf oge, %345, %420 : vector<16x1xf32>
      %422 = arith.andi %421, %347 : vector<16x1xi1>
      %cst_191 = arith.constant 1.000000e+00 : f32
      %cst_192 = arith.constant 0.000000e+00 : f32
      %423 = vector.broadcast %cst_191 : f32 to vector<16x1xf32>
      %424 = vector.broadcast %cst_192 : f32 to vector<16x1xf32>
      %425 = arith.select %422, %423, %424 : vector<16x1xi1>, vector<16x1xf32>
      %cst_193 = arith.constant dense<0.000000e+00> : vector<2x1xf32>
      %426 = tpu.matmul %39, %425, %cst_193 {dimension_numbers = #tpu.dot_dimension_numbers<[1], [0], [0], [1], [0, 0, 1, 1], [], []>} : vector<2x16xf32>, vector<16x1xf32>, vector<2x1xf32> -> vector<2x1xf32>
      %427 = arith.cmpf oge, %426, %351 : vector<2x1xf32>
      %428 = arith.select %427, %419, %arg15 : vector<2x1xi1>, vector<2x1xf32>
      %429 = arith.select %427, %arg16, %419 : vector<2x1xi1>, vector<2x1xf32>
      scf.yield %428, %429 : vector<2x1xf32>, vector<2x1xf32>
    }
    %cst_154 = arith.constant dense<0.000000e+00> : vector<16x1xf32>
    %372 = tpu.matmul %35, %371#0, %cst_154 {dimension_numbers = #tpu.dot_dimension_numbers<[1], [0], [0], [1], [0, 0, 1, 1], [], []>} : vector<16x2xf32>, vector<2x1xf32>, vector<16x1xf32> -> vector<16x1xf32>
    %373 = arith.cmpf oge, %345, %372 : vector<16x1xf32>
    %cst_155 = arith.constant 1.000000e+00 : f32
    %cst_156 = arith.constant 0.000000e+00 : f32
    %374 = vector.broadcast %cst_155 : f32 to vector<16x1xf32>
    %375 = vector.broadcast %cst_156 : f32 to vector<16x1xf32>
    %376 = arith.select %373, %374, %375 : vector<16x1xi1>, vector<16x1xf32>
    %377 = arith.mulf %258, %376 : vector<16x1xf32>
    %378 = math.tanh %345 : vector<16x1xf32>
    %379 = vector.broadcast %378 : vector<16x1xf32> to vector<16x32xf32>
    %380 = arith.mulf %333, %379 : vector<16x32xf32>
    %381 = vector.broadcast %377 : vector<16x1xf32> to vector<16x32xf32>
    %382 = arith.mulf %380, %381 : vector<16x32xf32>
    %cst_157 = arith.constant dense<0.000000e+00> : vector<2x1xf32>
    %383 = tpu.matmul %39, %377, %cst_157 {dimension_numbers = #tpu.dot_dimension_numbers<[1], [0], [0], [1], [0, 0, 1, 1], [], []>} : vector<2x16xf32>, vector<16x1xf32>, vector<2x1xf32> -> vector<2x1xf32>
    %cst_158 = arith.constant 1.000000e+00 : f32
    %384 = vector.broadcast %cst_158 : f32 to vector<2x1xf32>
    %385 = arith.maximumf %383, %384 : vector<2x1xf32>
    %386 = tpu.reciprocal %385 {approx = true} : vector<2x1xf32> -> vector<2x1xf32>
    %c0_159 = arith.constant 0 : index
    %c32_160 = arith.constant 32 : index
    %387 = vector.load %arg13[%c0_159, %c32_160] : memref<2x64xf32, #tpu.memory_space<vmem>>, vector<2x32xf32>
    %cst_161 = arith.constant dense<0.000000e+00> : vector<2x32xf32>
    %388 = tpu.matmul %39, %382, %cst_161 {dimension_numbers = #tpu.dot_dimension_numbers<[1], [0], [0], [1], [0, 0, 1, 1], [], []>} : vector<2x16xf32>, vector<16x32xf32>, vector<2x32xf32> -> vector<2x32xf32>
    %389 = vector.broadcast %386 : vector<2x1xf32> to vector<2x32xf32>
    %390 = arith.mulf %388, %389 : vector<2x32xf32>
    %391 = arith.addf %387, %390 : vector<2x32xf32>
    %c0_162 = arith.constant 0 : index
    %c32_163 = arith.constant 32 : index
    %392 = vector.load %arg13[%c0_162, %c32_163] : memref<2x64xf32, #tpu.memory_space<vmem>>, vector<2x32xf32>
    tpu.vector_store %arg13[%c0_162, %c32_163], %391 {strides = array<i32>} : memref<2x64xf32, #tpu.memory_space<vmem>>, vector<2x32xf32>,
    %cst_164 = arith.constant 5.000000e-01 : f32
    %393 = vector.broadcast %cst_164 : f32 to vector<16x1xf32>
    %394 = arith.cmpf ogt, %377, %393 : vector<16x1xf32>
    %c0_i32_165 = arith.constant 0 : i32
    %c2_i32_166 = arith.constant 2 : i32
    %395 = arith.addi %c0_i32_165, %c2_i32_166 : i32
    %c1_i32_167 = arith.constant 1 : i32
    scf.for %arg14 = %c0_i32_165 to %395 step %c1_i32_167  : i32 {
      %c1_i32_189 = arith.constant 1 : i32
      %417 = arith.muli %arg14, %c1_i32_189 : i32
      %c0_i32_190 = arith.constant 0 : i32
      %418 = arith.addi %c0_i32_190, %417 : i32
      %419 = vector.broadcast %418 : i32 to vector<16x1xi32>
      %420 = arith.cmpi eq, %6, %419 : vector<16x1xi32>
      %421 = arith.andi %420, %394 : vector<16x1xi1>
      %cst_191 = arith.constant 0xFF800000 : f32
      %422 = vector.shape_cast %421 : vector<16x1xi1> to vector<16x1xi1>
      %423 = vector.broadcast %422 : vector<16x1xi1> to vector<16x32xi1>
      %424 = vector.broadcast %cst_191 : f32 to vector<16x32xf32>
      %425 = arith.select %423, %382, %424 : vector<16x32xi1>, vector<16x32xf32>
      %cst_192 = arith.constant dense<0xFF800000> : vector<32xf32>
      %426 = vector.multi_reduction <maximumf>, %425, %cst_192 [0] : vector<16x32xf32> to vector<32xf32>
      %427 = vector.shape_cast %426 : vector<32xf32> to vector<1x32xf32>
      %cst_193 = arith.constant 1.000000e+00 : f32
      %cst_194 = arith.constant 0.000000e+00 : f32
      %428 = vector.broadcast %cst_193 : f32 to vector<16x1xf32>
      %429 = vector.broadcast %cst_194 : f32 to vector<16x1xf32>
      %430 = arith.select %421, %428, %429 : vector<16x1xi1>, vector<16x1xf32>
      %cst_195 = arith.constant dense<0.000000e+00> : vector<1xf32>
      %431 = vector.multi_reduction <add>, %430, %cst_195 [0] : vector<16x1xf32> to vector<1xf32>
      %432 = vector.shape_cast %431 : vector<1xf32> to vector<1x1xf32>
      %cst_196 = arith.constant 5.000000e-01 : f32
      %433 = vector.broadcast %cst_196 : f32 to vector<1x1xf32>
      %434 = arith.cmpf ogt, %432, %433 : vector<1x1xf32>
      %cst_197 = arith.constant 0.000000e+00 : f32
      %435 = vector.shape_cast %434 : vector<1x1xi1> to vector<1x1xi1>
      %436 = vector.broadcast %435 : vector<1x1xi1> to vector<1x32xi1>
      %437 = vector.broadcast %cst_197 : f32 to vector<1x32xf32>
      %438 = arith.select %436, %427, %437 : vector<1x32xi1>, vector<1x32xf32>
      %439 = arith.index_cast %418 : i32 to index
      %c0_198 = arith.constant 0 : index
      %440 = vector.load %arg13[%439, %c0_198] : memref<2x64xf32, #tpu.memory_space<vmem>>, vector<1x32xf32>
      %441 = arith.addf %440, %438 : vector<1x32xf32>
      %442 = arith.index_cast %418 : i32 to index
      %c0_199 = arith.constant 0 : index
      %443 = vector.load %arg13[%442, %c0_199] : memref<2x64xf32, #tpu.memory_space<vmem>>, vector<1x32xf32>
      tpu.vector_store %arg13[%442, %c0_199], %441 {strides = array<i32>} : memref<2x64xf32, #tpu.memory_space<vmem>>, vector<1x32xf32>,
    }
    %c2_i32_168 = arith.constant 2 : i32
    %c0_169 = arith.constant 0 : index
    %c0_170 = arith.constant 0 : index
    %396 = vector.load %arg13[%c0_169, %c0_170] : memref<2x64xf32, #tpu.memory_space<vmem>>, vector<2x64xf32>
    %c0_171 = arith.constant 0 : index
    %c0_172 = arith.constant 0 : index
    %397 = vector.load %arg9[%c0_171, %c0_172] : memref<96x32xf32, #tpu.memory_space<vmem>>, vector<64x32xf32>
    %c64 = arith.constant 64 : index
    %c0_173 = arith.constant 0 : index
    %398 = vector.load %arg9[%c64, %c0_173] : memref<96x32xf32, #tpu.memory_space<vmem>>, vector<32x32xf32>
    %c0_174 = arith.constant 0 : index
    %c0_175 = arith.constant 0 : index
    %399 = vector.load %arg11[%c0_174, %c0_175] : memref<3x128xf32, #tpu.memory_space<vmem>>, vector<1x32xf32>
    %c1_176 = arith.constant 1 : index
    %c0_177 = arith.constant 0 : index
    %400 = vector.load %arg11[%c1_176, %c0_177] : memref<3x128xf32, #tpu.memory_space<vmem>>, vector<1x32xf32>
    %c2_178 = arith.constant 2 : index
    %c0_179 = arith.constant 0 : index
    %401 = vector.load %arg11[%c2_178, %c0_179] : memref<3x128xf32, #tpu.memory_space<vmem>>, vector<1x128xf32>
    %cst_180 = arith.constant dense<0.000000e+00> : vector<2x32xf32>
    %402 = tpu.matmul %396, %397, %cst_180 {dimension_numbers = #tpu.dot_dimension_numbers<[1], [0], [0], [1], [0, 0, 1, 1], [], []>} : vector<2x64xf32>, vector<64x32xf32>, vector<2x32xf32> -> vector<2x32xf32>
    %403 = vector.broadcast %399 : vector<1x32xf32> to vector<2x32xf32>
    %404 = arith.addf %402, %403 : vector<2x32xf32>
    %cst_181 = arith.constant 0.000000e+00 : f32
    %405 = vector.broadcast %cst_181 : f32 to vector<2x32xf32>
    %406 = arith.maximumf %404, %405 : vector<2x32xf32>
    %cst_182 = arith.constant dense<0.000000e+00> : vector<2x32xf32>
    %407 = tpu.matmul %406, %398, %cst_182 {dimension_numbers = #tpu.dot_dimension_numbers<[1], [0], [0], [1], [0, 0, 1, 1], [], []>} : vector<2x32xf32>, vector<32x32xf32>, vector<2x32xf32> -> vector<2x32xf32>
    %408 = vector.broadcast %400 : vector<1x32xf32> to vector<2x32xf32>
    %409 = arith.addf %407, %408 : vector<2x32xf32>
    %cst_183 = arith.constant 0.000000e+00 : f32
    %410 = vector.broadcast %cst_183 : f32 to vector<2x32xf32>
    %411 = arith.maximumf %409, %410 : vector<2x32xf32>
    %c0_184 = arith.constant 0 : index
    %c0_185 = arith.constant 0 : index
    %412 = vector.load %arg10[%c0_184, %c0_185] : memref<32x128xf32, #tpu.memory_space<vmem>>, vector<32x128xf32>
    %cst_186 = arith.constant dense<0.000000e+00> : vector<2x128xf32>
    %413 = tpu.matmul %411, %412, %cst_186 {dimension_numbers = #tpu.dot_dimension_numbers<[1], [0], [0], [1], [0, 0, 1, 1], [], []>} : vector<2x32xf32>, vector<32x128xf32>, vector<2x128xf32> -> vector<2x128xf32>
    %414 = vector.broadcast %401 : vector<1x128xf32> to vector<2x128xf32>
    %415 = arith.addf %413, %414 : vector<2x128xf32>
    %c0_187 = arith.constant 0 : index
    %c0_188 = arith.constant 0 : index
    %416 = vector.load %arg12[%c0_187, %c0_188] : memref<2x128xf32, #tpu.memory_space<vmem>>, vector<2x128xf32>
    tpu.vector_store %arg12[%c0_187, %c0_188], %415 {strides = array<i32>} : memref<2x128xf32, #tpu.memory_space<vmem>>, vector<2x128xf32>,
    return
  }
}

</mosaic_0001>

<bundles_post_ra>
// kernel: tpu_custom_call.1
= control target key start
LH: loop header
LB: loop body
LE: loop exit
PB: predicated region body
PF: predicated region fallthrough
CT: control target
= control target key end

     0   :  { %17 = vsyncpa [#allocation4], 0  ;;  %v59_v0 = vlaneseq  ;;  %v2665_v1 = vmov 1065369472   ;;  %vm148_vm0 = vcmask 517120   ;;  %v2666_v4 = vmov 0.0   ;;  %s3616_s0 = inlined_call_operand.vmem [shape: f32[16,32], index: 0, kind: input, shape index: {}]   ;;  %s3617_s1 = inlined_call_operand.vmem [shape: s32[32,2], index: 1, kind: input, shape index: {}]   ;;  %s3618_s2 = inlined_call_operand.vmem [shape: s32[2,32], index: 2, kind: input, shape index: {}]   ;;  %s3619_s3 = inlined_call_operand.vmem [shape: s32[16,1], index: 3, kind: input, shape index: {}]   ;;  %s3620_s4 = inlined_call_operand.vmem [shape: s32[1,16], index: 4, kind: input, shape index: {}]   ;;  %s3621_s5 = inlined_call_operand.vmem [shape: f32[32,2], index: 5, kind: input, shape index: {}]   ;;  %s3622_s6 = inlined_call_operand.vmem [shape: f32[3,34,32], index: 6, kind: input, shape index: {}]   ;;  %s3623_s7 = inlined_call_operand.vmem [shape: f32[3,4,32], index: 7, kind: input, shape index: {}]   ;;  %s3624_s8 = inlined_call_operand.vmem [shape: f32[3,32,2], index: 8, kind: input, shape index: {}]   ;;  %s3625_s9 = inlined_call_operand.vmem [shape: f32[96,32], index: 9, kind: input, shape index: {}]   ;;  %s3626_s10 = inlined_call_operand.vmem [shape: f32[32,128], index: 10, kind: input, shape index: {}]   ;;  %s3627_s11 = inlined_call_operand.vmem [shape: f32[3,128], index: 11, kind: input, shape index: {}]   ;;  %s3628_s12 = inlined_call_operand.hbm [shape: f32[2,128], index: 12, kind: output, shape index: {}]  }
   0x1   :  { %174 = vmatpush.bf16.msra.mxu0 %v2665_v1  ;;  %v2472_v2 = vld [vmem:[%s3618_s2] ss:$0 sm:$0xff]  ;;  %149 = vst.msk [vmem:[#allocation2] sm:$0x3] %vm148_vm0, %v2666_v4  ;;  %v2667_v5 = vmov 1   ;;  %v52_v7 = vld [vmem:[%s3617_s1 + $0x10] sm:$0xff] }
   0x2   :  { %v2753_v3 = vshrl.u32 %v59_v0, 7  ;;  %2456 = vset.pattern.permute.xlu0 %v2667_v5  ;;  %v2759_v6 = vld [vmem:[%s3617_s1] sm:$0xff]  ;;  %2457 = vset.pattern.permute.xlu1 %v2667_v5  ;;  %v152_v8 = vld [vmem:[%s3622_s6 + $0x10] sm:$0xff]  ;;  %v153_v10 = vld [vmem:[%s3622_s6 + $0x18] sm:$0xff]  ;;  %vm164_vm3 = vcmask 261120   ;;  %v2668_v23 = vmov 0  }
   0x3   :  { %91 = vperm.xlu0 %2456, %v2759_v6   ;;  %97 = vperm.xlu1 %2457, %v52_v7   ;;  %v150_v11 = vld [vmem:[%s3622_s6] sm:$0xff]  ;;  %v151_v12 = vld [vmem:[%s3622_s6 + $0x8] sm:$0xff]  ;;  %v156_v14 = vpack.c.bf16 %v153_v10, %v152_v8  ;;  %v53_v21 = vld [vmem:[%s3617_s1 + $0x18] sm:$0xff]  ;;  %v2804_v35 = vand.u32 127, %v59_v0  ;;  %vm279_vm12 = vcmask 130048   ;;  %vm235_vm15 = vcmask 1041408  }
   0x4   :  { %v2769_v9 = vadd.s32 8, %v2753_v3  ;;  %vm117_vm1 = vcmp.eq.s32.totalorder %v2753_v3, %v2472_v2  ;;  %v155_v16 = vpack.c.bf16 %v151_v12, %v150_v11  ;;  %v44_v17 = vld [vmem:[%s3616_s0] sm:$0xff]  ;;  %v45_v18 = vld [vmem:[%s3616_s0 + $0x8] sm:$0xff]  ;;  %2463 = vset.pattern.permute.xlu2 %v2668_v23  ;;  %s2669_s0 = smov 32   ;;  %vm222_vm0 = vcmask 15360   ;;  %v2853_v59 = vld [vmem:[%s3621_s5 + $0x10] sm:$0xff] }
   0x5   :  { %175 = vmatpush.bf16.msra.mxu0 %v2665_v1  ;;  %v2208_v13 = vsel %vm117_vm1, 1.0, %v2666_v4  ;;  %213 = vmatpush.bf16.msra.mxu1 %v156_v14  ;;  %v51_v20 = vld [vmem:[%s3617_s1 + $0x8] sm:$0xff]  ;;  %v202_v22 = vpack.c.bf16 %v45_v18, %v44_v17  ;;  %v154_v55 = vld [vmem:[%s3622_s6 + $0x20] sm:$0x3]  ;;  %v2866_v0 = vld [vmem:[%s3621_s5 + $0x18] sm:$0xff]  ;;  %s2671_s27 = smov 127  }
   0x6   :  { %vm118_vm2 = vcmp.eq.s32.totalorder %v2769_v9, %v2472_v2  ;;  %2217 = vmatpush.msk.msra.mxu2 %vm235_vm15, %v154_v55  ;;  %v2839_v56 = vld [vmem:[%s3621_s5] sm:$0xff]  ;;  %v2846_v57 = vld [vmem:[%s3621_s5 + $0x8] sm:$0xff] }
   0x7   :  { %v2209_v15 = vsel %vm118_vm2, 1.0, %v2666_v4  ;;  %2218 = vmatmul.msk.f32.vlgmr.msra.gmra.mxu2 %vm222_vm0, %v2839_v56  ;;  %v2858_v60 = vld [vmem:[%s3623_s7] sm:$0xf] }
   0x8   :  { %v2790_v19 = vpack.c.bf16 %v2209_v15, %v2208_v13  ;;  %v203_v61 = vperm.slane %v2858_v60, 0  ;;  %v2909_v55 = vld [vmem:[%s3619_s3] sm:$0xff] }
   0x9   :  { %214 = vmatpush.bf16.msra.mxu1 %v155_v16 }
   0xa   :  { %2215 = vmatmul.msk.bf16.vlgmr.msra.gmra.mxu0 %vm164_vm3, %v2790_v19 }
   0xb   :  { %94 = vperm.xlu0 %2456, %v51_v20   ;;  %100 = vperm.xlu1 %2457, %v53_v21  }
   0xc   :  { %2216 = vmatmul.msk.bf16.vlgmr.msra.gmra.mxu1 %vm164_vm3, %v202_v22 }
   0xf   :  { %2219 = vmatmul.msk.f32.gmra.mxu2 %vm222_vm0, %v2846_v57 }
  0x13   :  { %2464 = vset.pattern.permute.xlu0 %v2668_v23  ;;  %2465 = vset.pattern.permute.xlu1 %v2668_v23 }
  0x14   :  { %68 = vperm.xlu0 %2464, %v51_v20   ;;  %71 = vperm.xlu1 %2465, %v52_v7  }
  0x17   :  { %2220 = vmatmul.msk.f32.gmra.mxu2 %vm222_vm0, %v2853_v59 }
  0x1f   :  { %2221 = vmatmul.msk.f32.gmra.mxu2 %vm222_vm0, %v2866_v0 }
  0x75   :  { %v92_v30 = vpop.permute.xlu0 %91  ;;  %v98_v45 = vpop.permute.xlu1 %97 }
  0x76   :  { %vm102_vm4 = vcmp.eq.s32.totalorder %v92_v30, %v2804_v35  ;;  %vm104_vm13 = vcmp.eq.s32.totalorder %v98_v45, %v2804_v35  ;;  %v221_v45 = vperm.slane %v2858_v60, 1 }
  0x77   :  { %v2204_v43 = vsel %vm102_vm4, 1.0, %v2666_v4  ;;  %v2206_v52 = vsel %vm104_vm13, 1.0, %v2666_v4 }
  0x7d   :  { %v95_v38 = vpop.permute.xlu0 %94  ;;  %v101_v51 = vpop.permute.xlu1 %100 }
  0x7e   :  { %vm103_vm6 = vcmp.eq.s32.totalorder %v95_v38, %v2804_v35  ;;  %vm105_vm14 = vcmp.eq.s32.totalorder %v101_v51, %v2804_v35 }
  0x7f   :  { %v2205_v44 = vsel %vm103_vm6, 1.0, %v2666_v4  ;;  %v2207_v53 = vsel %vm105_vm14, 1.0, %v2666_v4 }
  0x80   :  { %v2818_v50 = vpack.c.bf16 %v2205_v44, %v2204_v43  ;;  %v2828_v54 = vpack.c.bf16 %v2207_v53, %v2206_v52 }
  0x86   :  { %v69_v7 = vpop.permute.xlu0 %68  ;;  %v72_v16 = vpop.permute.xlu1 %71 }
  0x87   :  { %v177_v24 = vpop.f32.mrf.mxu0  ;;  %vm77_vm1 = vcmp.eq.s32.totalorder %v69_v7, %v2804_v35  ;;  %vm78_vm4 = vcmp.eq.s32.totalorder %v72_v16, %v2804_v35 }
  0x88   :  { %v178_v25 = vadd.f32 1.0, %v177_v24  ;;  %v2201_v13 = vsel %vm77_vm1, 1.0, %v2666_v4  ;;  %v2202_v18 = vsel %vm78_vm4, 1.0, %v2666_v4 }
  0x89   :  { %v216_v58 = vpop.f32.mrf.mxu1 }
  0x8a   :  { %2475 = vrsqrt.f32 %v178_v25  ;;  %vm188_vm8 = vweird.f32 %v178_v25  ;;  %v2868_v1 = vadd.f32 %v216_v58, %v203_v61  ;;  %v256_v43 = vpop.f32.mrf.mxu2 }
  0x8f   :  { %v179_v26 = vpop.f32.mrf.mxu0 }
  0x90   :  { %v2476_v27 = vpop.eup %2475  ;;  %v180_v28 = vadd.f32 1.0, %v179_v26 }
  0x91   :  { %v183_v29 = vmul.f32 %v2476_v27, %v178_v25  ;;  %vm189_vm5 = vweird.f32 %v2476_v27  ;;  %v218_v62 = vpop.f32.mrf.mxu1 }
  0x92   :  { %2477 = vrsqrt.f32 %v180_v28  ;;  %vm198_vm9 = vweird.f32 %v180_v28  ;;  %vm190_vm10 = vmor %vm188_vm8, %vm189_vm5  ;;  %v2870_v2 = vadd.f32 %v218_v62, %v203_v61  ;;  %v259_v44 = vpop.f32.mrf.mxu2 }
  0x93   :  { %v184_v31 = vmul.f32 %v2476_v27, %v183_v29 }
  0x95   :  { %v185_v32 = vmul.f32 0.5, %v184_v31 }
  0x97   :  { %v186_v36 = vsub.f32 1.5, %v185_v32 }
  0x98   :  { %v2478_v33 = vpop.eup %2477 }
  0x99   :  { %v193_v34 = vmul.f32 %v2478_v33, %v180_v28  ;;  %v187_v41 = vmul.f32 %v2476_v27, %v186_v36  ;;  %vm199_vm7 = vweird.f32 %v2478_v33 }
  0x9a   :  { %vm200_vm11 = vmor %vm198_vm9, %vm199_vm7  ;;  %v262_v51 = vpop.f32.mrf.mxu2 }
  0x9b   :  { %v194_v37 = vmul.f32 %v2478_v33, %v193_v34  ;;  %v2810_v46 = vsel %vm190_vm10, %v2476_v27, %v187_v41  ;;  %v2670_v27 = vmov 32  }
  0x9c   :  { %2468 = vset.pattern.permute.xlu1 %v2670_v27  ;;  %2467 = vset.pattern.permute.xlu0 %v2670_v27 }
  0x9d   :  { %v195_v39 = vmul.f32 0.5, %v194_v37 }
  0x9f   :  { %v196_v40 = vsub.f32 1.5, %v195_v39 }
  0xa1   :  { %v197_v42 = vmul.f32 %v2478_v33, %v196_v40 }
  0xa3   :  { %v2812_v47 = vsel %vm200_vm11, %v2478_v33, %v197_v42  ;;  %v390_v33 = vmul.f32 %v2810_v46, %v2810_v46  ;;  %vm516_vm11 = vcmask 7168  }
  0xa4   :  { %v2458_v48 = vpack.i.bf16 %v2812_v47, %v2810_v46  ;;  %v305_v49 = vpack.c.bf16 %v2812_v47, %v2810_v46  ;;  %v391_v42 = vmul.f32 %v2812_v47, %v2812_v47  ;;  %v257_v46 = vadd.f32 %v256_v43, %v221_v45 }
  0xa6   :  { %2459 = vrot.lane.b32.xlu2 %v2458_v48, %s2669_s0  ;;  %319 = vmatpush.bf16.msrb.mxu0 %v305_v49  ;;  %v260_v48 = vadd.f32 %v259_v44, %v221_v45 }
  0xa9   :  { %2224 = vmatmul.msk.bf16.vlgmr.msrb.gmra.mxu0 %vm279_vm12, %v2818_v50 }
  0xae   :  { %65 = vperm.xlu2 %2463, %v2759_v6  }
  0xb6   :  { %74 = vperm.xlu2 %2463, %v53_v21  }
  0xb9   :  { %2225 = vmatmul.msk.bf16.gmra.mxu0 %vm279_vm12, %v2828_v54 }
  0xbe   :  { %2466 = vset.pattern.permute.xlu2 %v2670_v27 }
 0x100   :  { %v2460_v63 = vpop.permute.xlu2 %2459 }
 0x101   :  { %v2462_v5 = vunpack.i.h.bf16 %v2460_v63  ;;  %v2461_v6 = vunpack.i.l.bf16 %v2460_v63 }
 0x103   :  { %v276_v8 = vsel %vm164_vm3, %v2868_v1, %v2461_v6  ;;  %v277_v10 = vsel %vm164_vm3, %v2870_v2, %v2462_v5  ;;  %v265_v6 = vpop.f32.mrf.mxu2 }
 0x104   :  { %v278_v11 = vpack.c.bf16 %v277_v10, %v276_v8  ;;  %v263_v8 = vadd.f32 %v262_v51, %v221_v45  ;;  %v266_v10 = vadd.f32 %v265_v6, %v221_v45 }
 0x106   :  { %293 = vmatpush.bf16.msra.mxu3 %v278_v11 }
 0x108   :  { %v66_v12 = vpop.permute.xlu2 %65 }
 0x109   :  { %vm76_vm2 = vcmp.eq.s32.totalorder %v66_v12, %v2804_v35 }
 0x10a   :  { %v2200_v14 = vsel %vm76_vm2, 1.0, %v2666_v4 }
 0x10b   :  { %v2882_v15 = vpack.c.bf16 %v2201_v13, %v2200_v14  ;;  %v2473_v13 = vld [vmem:[%s3618_s2 + $0x1] ss:$0 sm:$0xff] }
 0x10c   :  { %vm125_vm6 = vcmp.eq.s32.totalorder %v2753_v3, %v2473_v13  ;;  %vm126_vm7 = vcmp.eq.s32.totalorder %v2769_v9, %v2473_v13  ;;  %v160_v9 = vld [vmem:[%s3624_s8 + $0x10] sm:$0xff] }
 0x10d   :  { %2222 = vmatmul.msk.bf16.vlgmr.msra.gmra.mxu3 %vm279_vm12, %v2882_v15 }
 0x110   :  { %v75_v17 = vpop.permute.xlu2 %74 }
 0x111   :  { %vm79_vm5 = vcmp.eq.s32.totalorder %v75_v17, %v2804_v35 }
 0x112   :  { %v2203_v20 = vsel %vm79_vm5, 1.0, %v2666_v4 }
 0x113   :  { %v2890_v21 = vpack.c.bf16 %v2203_v20, %v2202_v18 }
 0x11d   :  { %2223 = vmatmul.msk.bf16.gmra.mxu3 %vm279_vm12, %v2890_v21 }
 0x126   :  { %v321_v22 = vpop.f32.mrf.mxu0 }
 0x127   :  { %335 = vrot.lane.b32.xlu0 %v321_v22, %s2669_s0 }
 0x12e   :  { %v323_v24 = vpop.f32.mrf.mxu0 }
 0x136   :  { %v326_v25 = vpop.f32.mrf.mxu0 }
 0x137   :  { %339 = vrot.lane.b32.xlu1 %v326_v25, %s2669_s0  ;;  %v2211_v25 = vsel %vm126_vm7, 1.0, %v2666_v4 }
 0x13e   :  { %v328_v26 = vpop.f32.mrf.mxu0 }
 0x13f   :  { %337 = vrot.lane.b32.xlu1 %v323_v24, %s2669_s0  ;;  %341 = vrot.lane.b32.xlu2 %v328_v26, %s2669_s0  ;;  %v2210_v24 = vsel %vm125_vm6, 1.0, %v2666_v4 }
 0x140   :  { %v2919_v26 = vpack.c.bf16 %v2211_v25, %v2210_v24 }
 0x190   :  { %v295_v28 = vpop.f32.mrf.mxu3 }
 0x191   :  { %v351_v52 = vadd.f32 %v295_v28, %v257_v46 }
 0x193   :  { %v355_v47 = vmax.f32 %v351_v52, 0.0 }
 0x198   :  { %v297_v29 = vpop.f32.mrf.mxu3 }
 0x199   :  { %v336_v30 = vpop.permute.xlu0 %335  ;;  %v342_v34 = vpop.permute.xlu2 %341  ;;  %v352_v53 = vadd.f32 %v297_v29, %v260_v48 }
 0x19a   :  { %v347_v31 = vmul.f32 %v336_v30, %v295_v28  ;;  %v161_v30 = vld [vmem:[%s3624_s8 + $0x18] sm:$0xff] }
 0x19b   :  { %v356_v58 = vmax.f32 %v352_v53, 0.0 }
 0x19c   :  { %361 = vperm.xlu1 %2468, %v347_v31   ;;  %v163_v31 = vpack.c.bf16 %v161_v30, %v160_v9 }
 0x19e   :  { %433 = vmatpush.bf16.msrb.mxu2 %v163_v31 }
 0x1a0   :  { %v300_v32 = vpop.f32.mrf.mxu3 }
 0x1a1   :  { %v353_v11 = vadd.f32 %v300_v32, %v263_v8 }
 0x1a3   :  { %v357_v14 = vmax.f32 %v353_v11, 0.0 }
 0x1a4   :  { %2469 = vset.pattern.permute.xlu1 %v2668_v23 }
 0x1a5   :  { %394 = vperm.xlu1 %2469, %v390_v33   ;;  %v159_v33 = vld [vmem:[%s3624_s8 + $0x8] sm:$0xff] }
 0x1a8   :  { %v302_v36 = vpop.f32.mrf.mxu3 }
 0x1a9   :  { %v350_v37 = vmul.f32 %v342_v34, %v302_v36  ;;  %v340_v38 = vpop.permute.xlu1 %339  ;;  %v354_v12 = vadd.f32 %v302_v36, %v266_v10  ;;  %v385_v36 = vperm.slane %v2858_v60, 2 }
 0x1aa   :  { %v349_v39 = vmul.f32 %v340_v38, %v300_v32  ;;  %v158_v32 = vld [vmem:[%s3624_s8] sm:$0xff] }
 0x1ab   :  { %376 = vperm.xlu0 %2467, %v350_v37   ;;  %v358_v16 = vmax.f32 %v354_v12, 0.0  ;;  %v162_v34 = vpack.c.bf16 %v159_v33, %v158_v32  ;;  %v386_v37 = vadd.f32 %v385_v36, %v2868_v1 }
 0x1ac   :  { %371 = vperm.xlu2 %2466, %v349_v39   ;;  %v387_v39 = vadd.f32 %v385_v36, %v2870_v2 }
 0x1ad   :  { %434 = vmatpush.bf16.msrb.mxu2 %v162_v34 }
 0x1ae   :  { %v389_v43 = vmax.f32 %v387_v39, 0.0 }
 0x1b1   :  { %v338_v40 = vpop.permute.xlu1 %337 }
 0x1b2   :  { %v348_v41 = vmul.f32 %v338_v40, %v297_v29 }
 0x1b3   :  { %2471 = vset.pattern.permute.xlu0 %v2668_v23 }
 0x1b4   :  { %366 = vperm.xlu2 %2466, %v348_v41   ;;  %v388_v41 = vmax.f32 %v386_v37, 0.0 }
 0x1bc   :  { %2470 = vset.pattern.permute.xlu2 %v2668_v23 }
 0x1bd   :  { %399 = vperm.xlu2 %2470, %v391_v42  }
 0x1c5   :  { %133 = vperm.xlu2 %2470, %v2909_v55  }
 0x206   :  { %v372_v49 = vpop.permute.xlu2 %371 }
 0x207   :  { %v381_v18 = vmul.f32 %v372_v49, %v357_v14 }
 0x20e   :  { %v362_v61 = vpop.permute.xlu1 %361  ;;  %v367_v62 = vpop.permute.xlu2 %366 }
 0x20f   :  { %v379_v63 = vmul.f32 %v362_v61, %v355_v47  ;;  %v380_v5 = vmul.f32 %v367_v62, %v356_v58  ;;  %v2474_v58 = vld [vmem:[%s3620_s4] ss:$0 sm:$0xff]  ;;  %v2965_v61 = vld [vmem:[%s3619_s3 + $0x8] sm:$0xff]  ;;  %v2672_v62 = vmov 1.0   ;;  %s2625_s3 = smov 0  }
 0x210   :  { %506 = vmatpush.msra.mxu2 %v2672_v62  ;;  %vm145_vm9 = vcmp.eq.s32.totalorder %v2753_v3, %v2474_v58 }
 0x211   :  { %v383_v7 = vpack.c.bf16 %v380_v5, %v379_v63  ;;  %v2972_v63 = vsel %vm145_vm9, 1.0, %v2666_v4 }
 0x212   :  { %507 = vmatpush.msra.mxu2 %v2672_v62 }
 0x217   :  { %v400_v27 = vpop.permute.xlu2 %399  ;;  %v395_v40 = vpop.permute.xlu1 %394 }
 0x218   :  { %v402_v42 = vmul.f32 %v395_v40, %v388_v41  ;;  %v403_v44 = vmul.f32 %v400_v27, %v389_v43 }
 0x21d   :  { %v377_v17 = vpop.permute.xlu0 %376 }
 0x21e   :  { %v382_v20 = vmul.f32 %v377_v17, %v358_v16 }
 0x21f   :  { %v134_v28 = vpop.permute.xlu2 %133 }
 0x220   :  { %v384_v22 = vpack.c.bf16 %v382_v20, %v381_v18  ;;  %vm138_vm8 = vcmp.eq.s32.totalorder %v134_v28, %v2804_v35  ;;  %v463_v18 = vperm.slane %v2858_v60, 3 }
 0x221   :  { %v2925_v29 = vsel %vm138_vm8, 1.0, %v2666_v4 }
 0x222   :  { %413 = vmatpush.bf16.msrb.mxu1 %v384_v22 }
 0x226   :  { %414 = vmatpush.bf16.msrb.mxu1 %v383_v7 }
 0x229   :  { %2226 = vmatmul.msk.bf16.vlgmr.msrb.gmra.mxu1 %vm164_vm3, %v2919_v26 }
 0x2a6   :  { %v416_v38 = vpop.f32.mrf.mxu1 }
 0x2a7   :  { %v2942_v45 = vadd.f32 %v416_v38, %v402_v42 }
 0x2a9   :  { %v421_v49 = vmax.f32 %v2942_v45, 0.0 }
 0x2ae   :  { %v418_v46 = vpop.f32.mrf.mxu1 }
 0x2af   :  { %v2944_v48 = vadd.f32 %v418_v46, %v403_v44 }
 0x2b1   :  { %v422_v51 = vmax.f32 %v2944_v48, 0.0 }
 0x2b3   :  { %v423_v1 = vpack.c.bf16 %v422_v51, %v421_v49 }
 0x2b5   :  { %2227 = vmatmul.msk.bf16.vlgmr.msrb.gmra.mxu2 %vm164_vm3, %v423_v1 }
 0x2c5   :  { %2231 = vmatmul.msk.f32.vlgmr.msra.gmra.mxu2 %vm279_vm12, %v2972_v63 }
 0x338   :  { %v436_v2 = vpop.f32.mrf.mxu2 }
 0x339   :  { %480 = vrot.lane.b32.xlu0 %v436_v2, %s2671_s27 }
 0x340   :  { %v438_v52 = vpop.f32.mrf.mxu2 }
 0x341   :  { %482 = vrot.lane.b32.xlu1 %v438_v52, %s2671_s27  ;;  %v441_v53 = vpack.c.bf16 %v438_v52, %v436_v2  ;;  %136 = vperm.xlu0 %2471, %v2965_v61  }
 0x343   :  { %449 = vmatpush.bf16.msrb.mxu3 %v441_v53 }
 0x346   :  { %2228 = vmatmul.msk.bf16.vlgmr.msrb.gmra.mxu3 %vm279_vm12, %v2882_v15 }
 0x348   :  { %v509_v3 = vpop.f32.mrf.mxu2 }
 0x349   :  { %v2978_v12 = vmul.f32 0.5, %v509_v3 }
 0x34b   :  { %v513_v14 = vceil.f32 %v2978_v12 }
 0x356   :  { %2229 = vmatmul.msk.bf16.gmra.mxu3 %vm279_vm12, %v2890_v21 }
 0x3ab   :  { %v481_v11 = vpop.permute.xlu0 %480 }
 0x3b3   :  { %v137_v13 = vpop.permute.xlu0 %136  ;;  %v483_v27 = vpop.permute.xlu1 %482 }
 0x3b4   :  { %vm139_vm10 = vcmp.eq.s32.totalorder %v137_v13, %v2804_v35 }
 0x3b5   :  { %v2983_v16 = vsel %vm139_vm10, 1.0, %v2666_v4 }
 0x3c9   :  { %v451_v47 = vpop.f32.mrf.mxu3 }
 0x3d1   :  { %v453_v5 = vpop.f32.mrf.mxu3 }
 0x3d2   :  { %v461_v10 = vpack.c.bf16 %v453_v5, %v451_v47 }
 0x3d9   :  { %v456_v6 = vpop.f32.mrf.mxu3 }
 0x3e1   :  { %v458_v7 = vpop.f32.mrf.mxu3 }
 0x3e2   :  { %v462_v8 = vpack.c.bf16 %v458_v7, %v456_v6 }
 0x3e4   :  { %470 = vmatpush.bf16.msra.mxu1 %v462_v8 }
 0x3e8   :  { %471 = vmatpush.bf16.msra.mxu1 %v461_v10 }
 0x3eb   :  { %2230 = vmatmul.msk.bf16.vlgmr.msra.gmra.mxu1 %vm164_vm3, %v2919_v26 }
 0x468   :  { %v473_v17 = vpop.f32.mrf.mxu1 }
 0x469   :  { %v474_v20 = vadd.f32 %v473_v17, %v463_v18 }
 0x46b   :  { %v2986_v24 = vadd.f32 %v481_v11, %v474_v20 }
 0x46d   :  { %v517_v35 = vsel %vm516_vm11, %v2986_v24, inf  ;;  %v528_v9 = vsel %vm516_vm11, %v2986_v24, -inf }
 0x470   :  { %v475_v22 = vpop.f32.mrf.mxu1 }
 0x471   :  { %v476_v25 = vadd.f32 %v475_v22, %v463_v18 }
 0x473   :  { %v2988_v28 = vadd.f32 %v483_v27, %v476_v25 }
 0x475   :  { %v518_v30 = vsel %vm516_vm11, %v2988_v28, inf  ;;  %v529_v60 = vsel %vm516_vm11, %v2988_v28, -inf }
 0x476   :  { %v519_v31 = vmin.f32 %v517_v35, %v518_v30  ;;  %v530_v32 = vmax.f32 %v528_v9, %v529_v60 }
 0x478   :  { %v520_v33 = vrot.slane %v519_v31, 4  ;;  %v531_v34 = vrot.slane %v530_v32, 4 }
 0x47a   :  { %v521_v36 = vmin.f32 %v519_v31, %v520_v33  ;;  %v532_v37 = vmax.f32 %v530_v32, %v531_v34 }
 0x47c   :  { %v522_v38 = vrot.slane %v521_v36, 2  ;;  %v533_v39 = vrot.slane %v532_v37, 2 }
 0x47e   :  { %v523_v40 = vmin.f32 %v521_v36, %v522_v38  ;;  %v534_v41 = vmax.f32 %v532_v37, %v533_v39 }
 0x480   :  { %v524_v42 = vrot.slane %v523_v40, 1  ;;  %v535_v43 = vrot.slane %v534_v41, 1 }
 0x482   :  { %v525_v44 = vmin.f32 %v523_v40, %v524_v42  ;;  %v536_v46 = vmax.f32 %v534_v41, %v535_v43 }
 0x484   :  { %v2232_v1 = vadd.f32 -1.0, %v525_v44   ;;  %v539_v2 = vadd.f32 1.0, %v536_v46  }
 0x486   :  { %v2617_v52 = vmov %v539_v2   ;;  %v2621_v53 = vmov %v2232_v1  }
 0x487 LB: > { %v549_v47 = vadd.f32 %v2619_v52, %v2623_v53  ;;  %v2673_v7 = vmov 1.0   ;;  %s546_s3 = sadd.s32 1, %s2627_s3   ;;  %s2627_s3 = sphi %s2625_s3, %s546_s3   ;;  %v2623_v53 = vphi %v2621_v53, %v2622_v53   ;;  %v2619_v52 = vphi %v2617_v52, %v611_v52  }
 0x488   : > { %p543_p0 = scmp.ge.s32.totalorder %s546_s3, 32  }
 0x489   : > { %v550_v58 = vmul.f32 0.5, %v549_v47  ;;  %2479 = vset.pattern.permute.xlu0 (%p543_p0), %v2668_v23  ;;  %2480 = vset.pattern.permute.xlu1 (%p543_p0), %v2668_v23  ;;  %2486 = vtanh.f32 (%p543_p0), %v2988_v28  ;;  %v2674_v18 = vmov (%p543_p0), 1.0|1.0   ;;  %v739_v46 = vld [vmem:[#allocation2] sm:$0x3] (%p543_p0)  ;;  %vm771_vm8 = vcmask (%p543_p0), 517376  }
 0x48a   :  { %2488 = vtanh.f32 (%p543_p0), %v2986_v24  ;;  %s3068_s4 = smov (%p543_p0), 0  }
 0x48b   : > { %2337 = vmatpush.msk.msra.mxu2 %vm235_vm15, %v550_v58  ;;  %2233 = vmatpush.msk.msra.mxu0 %vm235_vm15, %v550_v58 }
 0x48c   : > { %2235 = vmatmul.msk.f32.vlgmr.msra.gmra.mxu2 %vm222_vm0, %v2983_v16  ;;  %2234 = vmatmul.msk.f32.vlgmr.msra.gmra.mxu0 %vm222_vm0, %v2925_v29 }
 0x48f   :  { %v2487_v11 = vpop.eup (%p543_p0), %2486 }
 0x490   :  { %657 = vperm.xlu0 (%p543_p0), %2479, %v2487_v11   ;;  %v2489_v3 = vpop.eup (%p543_p0), %2488 }
 0x498   :  { %652 = vperm.xlu0 (%p543_p0), %2479, %v2489_v3  }
 0x502   :  { %v658_v22 = vpop.permute.xlu0 (%p543_p0), %657 }
 0x509   : > { %v577_v5 = vpop.f32.mrf.mxu0 }
 0x50a   : > { %vm583_vm14 = vcmp.ge.f32.partialorder %v2986_v24, %v577_v5 }
 0x50f   : > { %v580_v6 = vpop.f32.mrf.mxu2 }
 0x510   : > { %vm584_vm13 = vcmp.ge.f32.partialorder %v2988_v28, %v580_v6 }
 0x511   : > { %2236 = vmatpush.msk.msra.mxu1 %vm584_vm13, %v2673_v7 }
 0x513   : > { %2237 = vmatpush.msk.msra.mxu1 %vm583_vm14, %v2673_v7 }
 0x514   : > { %2238 = vmatmul.msk.f32.vlgmr.msra.gmra.mxu1 %vm279_vm12, %v2972_v63 }
 0x590   :  { %545 = sbr.rel (!%p543_p0) target bundleno = 1159 (0x487), region = 119 }
 0x591   : > { %v606_v8 = vpop.f32.mrf.mxu1 }
 0x592   : > { %vm609_vm1 = vcmp.ge.f32.partialorder %v606_v8, %v513_v14 }
 0x593   : > { %v610_v10 = vsel %vm609_vm1, %v550_v58, %v2623_v53   ;;  %v611_v52 = vsel %vm609_vm1, %v2619_v52, %v550_v58  }
 0x594   : > { %v2622_v53 = vmov %v610_v10   ;;  %2239 = vmatpush.msk.msra.mxu0 (%p543_p0), %vm235_vm15, %v610_v10 }
 0x595   :  { %2240 = vmatmul.msk.f32.vlgmr.msra.gmra.mxu0 %vm222_vm0, %v2925_v29 }
 0x59d   :  { %2241 = vmatmul.msk.f32.gmra.mxu0 %vm222_vm0, %v2983_v16 }
 0x612   :  { %v638_v12 = vpop.f32.mrf.mxu0 }
 0x613   :  { %vm644_vm2 = vcmp.ge.f32.partialorder %v2986_v24, %v638_v12  ;;  %v653_v24 = vpop.permute.xlu0 %652 }
 0x614   :  { %v3021_v13 = vsel %vm644_vm2, 1.0, %v2666_v4  ;;  %v660_v35 = vmul.f32 %v653_v24, %v421_v49 }
 0x615   :  { %vm773_vm4 = vcmp.gt.f32.partialorder %v3021_v13, 0.5 }
 0x61a   :  { %v641_v14 = vpop.f32.mrf.mxu0 }
 0x61b   :  { %vm645_vm5 = vcmp.ge.f32.partialorder %v2988_v28, %v641_v14 }
 0x61c   :  { %v3026_v17 = vsel %vm645_vm5, 1.0, %v2666_v4  ;;  %2250 = vmatpush.msk.msra.mxu3 %vm645_vm5, %v2672_v62  ;;  %vm2242_vm6 = vmpackc.low %vm645_vm5, %vm644_vm2 }
 0x61d   :  { %vm774_vm7 = vcmp.gt.f32.partialorder %v3026_v17, 0.5  ;;  %2243 = vmatpush.bf16.msk.msra.mxu1 %vm2242_vm6, %v2674_v18  ;;  %2247 = vmatpush.bf16.msk.msra.mxu2 %vm2242_vm6, %v2674_v18  ;;  %v2481_v20 = vpack.i.bf16 %v3021_v13, %v3026_v17 }
 0x61e   :  { %2251 = vmatpush.msk.msra.mxu3 %vm644_vm2, %v2672_v62  ;;  %v661_v62 = vmul.f32 %v658_v22, %v422_v51 }
 0x61f   :  { %2252 = vmatmul.msk.f32.vlgmr.msra.gmra.mxu3 %vm279_vm12, %v2972_v63  ;;  %2482 = vperm.xlu1 %2480, %v2481_v20  }
 0x620   :  { %2248 = vmatmul.msk.bf16.vlgmr.msra.gmra.mxu2 %vm279_vm12, %v2818_v50  ;;  %2244 = vmatmul.msk.bf16.vlgmr.msra.gmra.mxu1 %vm279_vm12, %v2882_v15 }
 0x630   :  { %2249 = vmatmul.msk.bf16.gmra.mxu2 %vm279_vm12, %v2828_v54  ;;  %2245 = vmatmul.msk.bf16.gmra.mxu1 %vm279_vm12, %v2890_v21 }
 0x691   :  { %v2483_v25 = vpop.permute.xlu1 %2482 }
 0x692   :  { %v2485_v27 = vunpack.i.h.bf16 %v2483_v25  ;;  %v2484_v28 = vunpack.i.l.bf16 %v2483_v25 }
 0x694   :  { %v3047_v9 = vmul.f32 %v2484_v28, %v661_v62  ;;  %v3050_v30 = vmul.f32 %v2485_v27, %v660_v35 }
 0x696   :  { %754 = vmatpush.msrb.mxu3 %v3047_v9 }
 0x698   :  { %755 = vmatpush.msrb.mxu3 %v3050_v30 }
 0x699   :  { %2253 = vmatmul.msk.f32.vlgmr.msrb.gmra.mxu3 %vm279_vm12, %v2972_v63 }
 0x69d   :  { %v684_v45 = vpop.f32.mrf.mxu1 }
 0x6a2   :  { %v3055_v60 = vpop.f32.mrf.mxu3 }
 0x6a3   :  { %v737_v48 = vmax.f32 %v3055_v60, 1.0  ;;  %v703_v49 = vpop.f32.mrf.mxu2 }
 0x6a4   :  { %v3058_v31 = vmul.f32 %v703_v49, %v684_v45 }
 0x6a5   :  { %2490 = vrcp.f32 %v737_v48  ;;  %v686_v32 = vpop.f32.mrf.mxu1 }
 0x6ab   :  { %v2491_v51 = vpop.eup %2490  ;;  %v705_v33 = vpop.f32.mrf.mxu2 }
 0x6ac   :  { %762 = vperm.xlu1 %2480, %v2491_v51   ;;  %v3060_v34 = vmul.f32 %v705_v33, %v686_v32 }
 0x6ad   :  { %v689_v36 = vpop.f32.mrf.mxu1 }
 0x6b3   :  { %v708_v37 = vpop.f32.mrf.mxu2 }
 0x6b4   :  { %v3062_v38 = vmul.f32 %v708_v37, %v689_v36 }
 0x6b5   :  { %v691_v39 = vpop.f32.mrf.mxu1 }
 0x6bb   :  { %v710_v40 = vpop.f32.mrf.mxu2 }
 0x6bc   :  { %v3064_v41 = vmul.f32 %v710_v40, %v691_v39 }
 0x71c   :  { %v757_v42 = vpop.f32.mrf.mxu3 }
 0x71e   :  { %v763_v43 = vpop.permute.xlu1 %762 }
 0x71f   :  { %v765_v44 = vmul.f32 %v763_v43, %v757_v42 }
 0x721   :  { %767 = vrot.lane.b32.xlu2 %v765_v44, %s2669_s0 }
 0x77b   :  { %v768_v1 = vpop.permute.xlu2 %767 }
 0x77c   :  { %v770_v2 = vadd.f32 %v768_v1, %v739_v46 }
 0x77e   :  { %772 = vst.msk [vmem:[#allocation2] sm:$0x3] %vm771_vm8, %v770_v2 }
 0x77f LB: > { %v2675_v52 = vmov 0   ;;  %v781_v53 = vstv %s2631_s4  ;;  %v2676_v58 = vmov 0.0   ;;  %s825_s14 = scalar_lea.vmem [#allocation2], %s2631_s4  ;;  %s780_s4 = sadd.s32 1, %s2631_s4   ;;  %s2631_s4 = sphi %s3068_s4, %s780_s4  }
 0x780   : > { %2492 = vset.pattern.permute.xlu0 %v2675_v52  ;;  %2493 = vset.pattern.permute.xlu1 %v2675_v52  ;;  %vm782_vm9 = vcmp.eq.s32.totalorder %v2909_v55, %v781_v53  ;;  %vm783_vm10 = vcmp.eq.s32.totalorder %v2965_v61, %v781_v53  ;;  %p777_p1 = scmp.ge.s32.totalorder %s780_s4, 2  }
 0x781   : > { %vm784_vm13 = vmand %vm782_vm9, %vm773_vm4  ;;  %vm828_vm9 = vcmask 253952   ;;  %v848_v44 = vpack.c.bf16 (%p777_p1), %v3064_v41, %v3062_v38  ;;  %v2256_v46 = vld [vmem:[%s3622_s6 + $0x38] sm:$0xff] (%p777_p1)  ;;  %v2257_v1 = vld [vmem:[%s3622_s6 + $0x40] sm:$0xff] (%p777_p1)  ;;  %2499 = vset.pattern.permute.xlu2 (%p777_p1), %v2668_v23  ;;  %s2677_s1 = smov (%p777_p1), 96  }
 0x782   : > { %v786_v47 = vsel %vm784_vm13, 1, %v2675_v52  ;;  %v807_v5 = vsel %vm784_vm13, 1.0, %v2676_v58  ;;  %vm785_vm14 = vmand %vm783_vm10, %vm774_vm7  ;;  %v2254_v2 = vld [vmem:[%s3622_s6 + $0x28] sm:$0xff] (%p777_p1)  ;;  %v2255_v53 = vld [vmem:[%s3622_s6 + $0x30] sm:$0xff] (%p777_p1) }
 0x783   : > { %v809_v6 = vsel %vm516_vm11, %v807_v5, 0.0  ;;  %789 = vperm.xlu0 %2492, %v786_v47   ;;  %v808_v7 = vsel %vm785_vm14, 1.0, %v2676_v58  ;;  %v787_v3 = vsel %vm785_vm14, 1, %v2675_v52  ;;  %855 = vmatpush.bf16.msrb.mxu2 (%p777_p1), %v848_v44  ;;  %v847_v47 = vpack.c.bf16 (%p777_p1), %v3060_v34, %v3058_v31 }
 0x784   : > { %v810_v8 = vsel %vm516_vm11, %v808_v7, 0.0  ;;  %v836_v58 = vpack.c.bf16 (%p777_p1), %v2255_v53, %v2254_v2  ;;  %v883_v5 = vpack.c.bf16 (%p777_p1), %v3047_v9, %v3050_v30 }
 0x785   : > { %v811_v10 = vadd.f32 %v810_v8, %v809_v6  ;;  %v826_v39 = vld [vmem:[%s825_s14] sm:$0x1] }
 0x787   : > { %v812_v11 = vrot.slane %v811_v10, 4  ;;  %856 = vmatpush.bf16.msrb.mxu2 (%p777_p1), %v847_v47 }
 0x789   : > { %v813_v12 = vadd.f32 %v812_v11, %v811_v10 }
 0x78a   :  { %2264 = vmatmul.msk.bf16.vlgmr.msrb.gmra.mxu2 (%p777_p1), %vm164_vm3, %v2790_v19 }
 0x78b   : > { %792 = vperm.xlu0 %2492, %v787_v3   ;;  %v814_v14 = vrot.slane %v813_v12, 2 }
 0x78d   : > { %v815_v18 = vadd.f32 %v814_v14, %v813_v12 }
 0x78f   : > { %v816_v20 = vrot.slane %v815_v18, 1 }
 0x791   : > { %v817_v22 = vadd.f32 %v816_v20, %v815_v18 }
 0x793   : > { %vm818_vm1 = vcmp.gt.f32.partialorder %v817_v22, 0.5  ;;  %2500 = vset.pattern.permute.xlu0 (%p777_p1), %v2668_v23 }
 0x794   : > { %v819_v24 = vsel %vm818_vm1, 1, %v2675_v52  ;;  %v837_v52 = vpack.c.bf16 (%p777_p1), %v2257_v1, %v2256_v46 }
 0x795   : > { %821 = vperm.xlu1 %2493, %v819_v24  }
 0x796   :  { %894 = vmatpush.bf16.msra.mxu3 (%p777_p1), %v837_v52 }
 0x79a   :  { %895 = vmatpush.bf16.msra.mxu3 (%p777_p1), %v836_v58 }
 0x79d   :  { %2501 = vset.pattern.permute.xlu1 (%p777_p1), %v2668_v23  ;;  %2265 = vmatmul.msk.bf16.vlgmr.msra.gmra.mxu3 (%p777_p1), %vm164_vm3, %v883_v5 }
 0x7f5   : > { %v790_v25 = vpop.permute.xlu0 %789 }
 0x7f6   : > { %vm794_vm2 = vcmp.eq.s32.totalorder %v790_v25, 1 }
 0x7f7   : > { %v796_v62 = vsel %vm794_vm2, %v3050_v30, -inf }
 0x7f8   : > { %v798_v35 = vsel %vm164_vm3, %v796_v62, -inf }
 0x7fd   : > { %v793_v27 = vpop.permute.xlu0 %792 }
 0x7fe   : > { %vm795_vm5 = vcmp.eq.s32.totalorder %v793_v27, 1 }
 0x7ff   : > { %v797_v28 = vsel %vm795_vm5, %v3047_v9, -inf }
 0x800   : > { %v799_v48 = vsel %vm164_vm3, %v797_v28, -inf }
 0x801   : > { %v800_v51 = vmax.f32 %v798_v35, %v799_v48 }
 0x803   : > { %v801_v45 = vrot.slane %v800_v51, 4 }
 0x805   : > { %v802_v49 = vmax.f32 %v800_v51, %v801_v45  ;;  %v2258_v51 = vld [vmem:[%s3622_s6 + $0x48] sm:$0x3] (%p777_p1) }
 0x806   :  { %2266 = vmatpush.msk.msrb.mxu0 (%p777_p1), %vm235_vm15, %v2258_v51 }
 0x807   : > { %v803_v32 = vrot.slane %v802_v49, 2  ;;  %v822_v33 = vpop.permute.xlu1 %821  ;;  %2267 = vmatmul.msk.f32.vlgmr.msrb.gmra.mxu0 (%p777_p1), %vm222_vm0, %v2839_v56 }
 0x808   : > { %vm823_vm6 = vcmp.eq.s32.totalorder %v822_v33, 1 }
 0x809   : > { %v804_v36 = vmax.f32 %v802_v49, %v803_v32  ;;  %v3133_v49 = vld [vmem:[%s3623_s7 + $0x4] sm:$0xf] (%p777_p1) }
 0x80a   :  { %v884_v32 = vperm.slane (%p777_p1), %v3133_v49, 0 }
 0x80b   : > { %v805_v37 = vrot.slane %v804_v36, 1 }
 0x80d   : > { %v806_v40 = vmax.f32 %v804_v36, %v805_v37  ;;  %v858_v6 = vpop.f32.mrf.mxu2 (%p777_p1) }
 0x80e   :  { %779 = sbr.rel (!%p777_p1) target bundleno = 1919 (0x77f), region = 130  ;;  %v859_v7 = vadd.f32 (%p777_p1), 1.0, %v858_v6 }
 0x80f   : > { %v824_v42 = vsel %vm823_vm6, %v806_v40, 0.0  ;;  %2268 = vmatmul.msk.f32.gmra.mxu0 (%p777_p1), %vm222_vm0, %v2846_v57 }
 0x810   : > { %v827_v43 = vadd.f32 %v826_v39, %v824_v42  ;;  %2502 = vrsqrt.f32 (%p777_p1), %v859_v7  ;;  %vm869_vm14 = vweird.f32 (%p777_p1), %v859_v7 }
 0x812   : > { %829 = vst.msk [vmem:[%s825_s14] sm:$0x1] %vm828_vm9, %v827_v43  ;;  %s3224_s14 = smov (%p777_p1), 0  }
 0x815   :  { %v860_v8 = vpop.f32.mrf.mxu2 }
 0x816   :  { %v2503_v10 = vpop.eup %2502  ;;  %v861_v11 = vadd.f32 1.0, %v860_v8 }
 0x817   :  { %v864_v3 = vmul.f32 %v2503_v10, %v859_v7  ;;  %vm870_vm10 = vweird.f32 %v2503_v10  ;;  %2269 = vmatmul.msk.f32.gmra.mxu0 %vm222_vm0, %v2853_v59 }
 0x818   :  { %2504 = vrsqrt.f32 %v861_v11  ;;  %vm879_vm1 = vweird.f32 %v861_v11  ;;  %vm871_vm2 = vmor %vm869_vm14, %vm870_vm10 }
 0x819   :  { %v865_v12 = vmul.f32 %v2503_v10, %v864_v3 }
 0x81b   :  { %v866_v14 = vmul.f32 0.5, %v865_v12 }
 0x81d   :  { %v867_v22 = vsub.f32 1.5, %v866_v14 }
 0x81e   :  { %v2505_v18 = vpop.eup %2504 }
 0x81f   :  { %v874_v20 = vmul.f32 %v2505_v18, %v861_v11  ;;  %v868_v25 = vmul.f32 %v2503_v10, %v867_v22  ;;  %vm880_vm13 = vweird.f32 %v2505_v18  ;;  %2270 = vmatmul.msk.f32.gmra.mxu0 %vm222_vm0, %v2866_v0 }
 0x820   :  { %vm881_vm5 = vmor %vm879_vm1, %vm880_vm13  ;;  %v897_v45 = vpop.f32.mrf.mxu3 }
 0x821   :  { %v875_v9 = vmul.f32 %v2505_v18, %v874_v20  ;;  %v872_v27 = vsel %vm871_vm2, %v2503_v10, %v868_v25  ;;  %v3138_v37 = vadd.f32 %v897_v45, %v884_v32  ;;  %v902_v45 = vperm.slane %v3133_v49, 1 }
 0x822   :  { %v1048_v25 = vmul.f32 %v872_v27, %v872_v27 }
 0x823   :  { %v876_v30 = vmul.f32 0.5, %v875_v9 }
 0x825   :  { %v877_v24 = vsub.f32 1.5, %v876_v30 }
 0x827   :  { %v878_v62 = vmul.f32 %v2505_v18, %v877_v24 }
 0x828   :  { %v899_v33 = vpop.f32.mrf.mxu3 }
 0x829   :  { %v882_v28 = vsel %vm881_vm5, %v2505_v18, %v878_v62  ;;  %v3140_v39 = vadd.f32 %v899_v33, %v884_v32 }
 0x82a   :  { %v2494_v35 = vpack.i.bf16 %v882_v28, %v872_v27  ;;  %v965_v48 = vpack.c.bf16 %v882_v28, %v872_v27  ;;  %v1049_v24 = vmul.f32 %v882_v28, %v882_v28 }
 0x82c   :  { %2495 = vrot.lane.b32.xlu0 %v2494_v35, %s2669_s0  ;;  %973 = vmatpush.bf16.msra.mxu2 %v965_v48 }
 0x82f   :  { %2273 = vmatmul.msk.bf16.vlgmr.msra.gmra.mxu2 %vm279_vm12, %v2818_v50 }
 0x83f   :  { %2274 = vmatmul.msk.bf16.gmra.mxu2 %vm279_vm12, %v2828_v54 }
 0x884   :  { %v923_v62 = vpop.f32.mrf.mxu0 }
 0x88c   :  { %v926_v35 = vpop.f32.mrf.mxu0 }
 0x894   :  { %v929_v48 = vpop.f32.mrf.mxu0 }
 0x895   :  { %v930_v32 = vadd.f32 %v929_v48, %v902_v45 }
 0x89c   :  { %v932_v51 = vpop.f32.mrf.mxu0 }
 0x89d   :  { %v933_v33 = vadd.f32 %v932_v51, %v902_v45 }
 0x89e   :  { %v2496_v36 = vpop.permute.xlu0 %2495 }
 0x89f   :  { %v2498_v40 = vunpack.i.h.bf16 %v2496_v36  ;;  %v2497_v42 = vunpack.i.l.bf16 %v2496_v36 }
 0x8a1   :  { %v943_v43 = vsel %vm164_vm3, %v3138_v37, %v2497_v42  ;;  %v944_v44 = vsel %vm164_vm3, %v3140_v39, %v2498_v40 }
 0x8a2   :  { %v945_v46 = vpack.c.bf16 %v944_v44, %v943_v43  ;;  %v924_v43 = vadd.f32 %v923_v62, %v902_v45  ;;  %v927_v44 = vadd.f32 %v926_v35, %v902_v45 }
 0x8a4   :  { %953 = vmatpush.bf16.msrb.mxu1 %v945_v46 }
 0x8a7   :  { %2271 = vmatmul.msk.bf16.vlgmr.msrb.gmra.mxu1 %vm279_vm12, %v2882_v15 }
 0x8b2   :  { %v975_v47 = vpop.f32.mrf.mxu2 }
 0x8b7   :  { %2272 = vmatmul.msk.bf16.gmra.mxu1 %vm279_vm12, %v2890_v21 }
 0x8ba   :  { %v977_v58 = vpop.f32.mrf.mxu2 }
 0x8c2   :  { %v980_v5 = vpop.f32.mrf.mxu2 }
 0x8ca   :  { %v982_v14 = vpop.f32.mrf.mxu2 }
 0x924   :  { %v955_v1 = vpop.f32.mrf.mxu1 }
 0x925   :  { %v1009_v27 = vadd.f32 %v955_v1, %v924_v43 }
 0x92c   :  { %v957_v2 = vpop.f32.mrf.mxu1 }
 0x92d   :  { %991 = vrot.lane.b32.xlu2 %v957_v2, %s2677_s1 }
 0x934   :  { %v960_v52 = vpop.f32.mrf.mxu1 }
 0x935   :  { %993 = vrot.lane.b32.xlu0 %v960_v52, %s2677_s1  ;;  %v1011_v36 = vadd.f32 %v960_v52, %v930_v32 }
 0x937   :  { %v1015_v46 = vmax.f32 %v1011_v36, 0.0 }
 0x93c   :  { %v962_v53 = vpop.f32.mrf.mxu1 }
 0x93d   :  { %995 = vrot.lane.b32.xlu1 %v962_v53, %s2677_s1  ;;  %v1012_v40 = vadd.f32 %v962_v53, %v933_v33  ;;  %v2262_v53 = vld [vmem:[%s3624_s8 + $0x30] sm:$0xff] }
 0x945   :  { %989 = vrot.lane.b32.xlu1 %v955_v1, %s2677_s1  ;;  %v2263_v1 = vld [vmem:[%s3624_s8 + $0x38] sm:$0xff] }
 0x987   :  { %v992_v10 = vpop.permute.xlu2 %991 }
 0x988   :  { %v1002_v11 = vmul.f32 %v992_v10, %v3060_v34  ;;  %v1013_v10 = vmax.f32 %v1009_v27, 0.0 }
 0x98a   :  { %v1006_v18 = vmul.f32 %v1002_v11, %v977_v58 }
 0x9a7   :  { %v994_v6 = vpop.permute.xlu0 %993 }
 0x9a8   :  { %v1003_v7 = vmul.f32 %v994_v6, %v3062_v38  ;;  %v1010_v6 = vadd.f32 %v957_v2, %v927_v44  ;;  %v846_v2 = vpack.c.bf16 %v2263_v1, %v2262_v53 }
 0x9aa   :  { %v1007_v8 = vmul.f32 %v1003_v7, %v980_v5  ;;  %v1014_v11 = vmax.f32 %v1010_v6, 0.0 }
 0x9ac   :  { %1029 = vperm.xlu2 %2499, %v1007_v8  }
 0x9af   :  { %v996_v3 = vpop.permute.xlu1 %995 }
 0x9b0   :  { %v1004_v12 = vmul.f32 %v996_v3, %v3064_v41 }
 0x9b2   :  { %v1008_v20 = vmul.f32 %v1004_v12, %v982_v14 }
 0x9b4   :  { %1024 = vperm.xlu2 %2499, %v1006_v18   ;;  %1034 = vperm.xlu0 %2500, %v1008_v20   ;;  %v2260_v18 = vld [vmem:[%s3624_s8 + $0x20] sm:$0xff]  ;;  %v2261_v20 = vld [vmem:[%s3624_s8 + $0x28] sm:$0xff] }
 0x9b7   :  { %v990_v22 = vpop.permute.xlu1 %989 }
 0x9b8   :  { %v1001_v9 = vmul.f32 %v990_v22, %v3058_v31  ;;  %v845_v22 = vpack.c.bf16 %v2261_v20, %v2260_v18 }
 0x9ba   :  { %v1005_v30 = vmul.f32 %v1001_v9, %v975_v47  ;;  %v1016_v47 = vmax.f32 %v1012_v40, 0.0  ;;  %v1043_v9 = vperm.slane %v3133_v49, 2 }
 0x9bc   :  { %1057 = vperm.xlu2 %2499, %v1049_v24   ;;  %1019 = vperm.xlu1 %2501, %v1005_v30   ;;  %v1044_v30 = vadd.f32 %v1043_v9, %v3138_v37 }
 0x9be   :  { %v1046_v35 = vmax.f32 %v1044_v30, 0.0 }
 0x9c4   :  { %1052 = vperm.xlu1 %2501, %v1048_v25   ;;  %v1045_v25 = vadd.f32 %v1043_v9, %v3140_v39 }
 0x9c6   :  { %v1047_v51 = vmax.f32 %v1045_v25, 0.0 }
 0xa06   :  { %v1030_v42 = vpop.permute.xlu2 %1029 }
 0xa07   :  { %v1039_v58 = vmul.f32 %v1030_v42, %v1015_v46 }
 0xa0e   :  { %v1025_v8 = vpop.permute.xlu2 %1024 }
 0xa0f   :  { %v1038_v12 = vmul.f32 %v1025_v8, %v1014_v11 }
 0xa16   :  { %v1058_v48 = vpop.permute.xlu2 %1057 }
 0xa17   :  { %v1061_v32 = vmul.f32 %v1058_v48, %v1047_v51 }
 0xa26   :  { %v1035_v28 = vpop.permute.xlu0 %1034 }
 0xa27   :  { %v1040_v5 = vmul.f32 %v1035_v28, %v1016_v47 }
 0xa29   :  { %v1042_v7 = vpack.c.bf16 %v1040_v5, %v1039_v58 }
 0xa2b   :  { %1068 = vmatpush.bf16.msrb.mxu3 %v1042_v7 }
 0xa2e   :  { %v1020_v3 = vpop.permute.xlu1 %1019 }
 0xa2f   :  { %v1037_v14 = vmul.f32 %v1020_v3, %v1013_v10  ;;  %v3200_v3 = vmul.f32 0.5, %v3055_v60 }
 0xa31   :  { %v1041_v52 = vpack.c.bf16 %v1038_v12, %v1037_v14  ;;  %v1148_v12 = vceil.f32 %v3200_v3  ;;  %v1122_v14 = vperm.slane %v3133_v49, 3 }
 0xa33   :  { %1069 = vmatpush.bf16.msrb.mxu3 %v1041_v52 }
 0xa36   :  { %2275 = vmatmul.msk.bf16.vlgmr.msrb.gmra.mxu3 %vm164_vm3, %v2919_v26  ;;  %v1053_v62 = vpop.permute.xlu1 %1052 }
 0xa37   :  { %1088 = vmatpush.bf16.msra.mxu3 %v846_v2  ;;  %v1060_v45 = vmul.f32 %v1053_v62, %v1046_v35 }
 0xa3b   :  { %1089 = vmatpush.bf16.msra.mxu3 %v845_v22 }
 0xab9   :  { %v1071_v24 = vpop.f32.mrf.mxu3 }
 0xaba   :  { %v3176_v33 = vadd.f32 %v1071_v24, %v1060_v45 }
 0xabc   :  { %v1076_v42 = vmax.f32 %v3176_v33, 0.0 }
 0xac1   :  { %v1073_v36 = vpop.f32.mrf.mxu3 }
 0xac2   :  { %v3178_v40 = vadd.f32 %v1073_v36, %v1061_v32 }
 0xac4   :  { %v1077_v43 = vmax.f32 %v3178_v40, 0.0 }
 0xac6   :  { %v1078_v37 = vpack.c.bf16 %v1077_v43, %v1076_v42 }
 0xac8   :  { %2276 = vmatmul.msk.bf16.vlgmr.msra.gmra.mxu3 %vm164_vm3, %v1078_v37 }
 0xb4b   :  { %v1091_v39 = vpop.f32.mrf.mxu3 }
 0xb4c   :  { %1139 = vrot.lane.b32.xlu0 %v1091_v39, %s2671_s27 }
 0xb53   :  { %v1093_v44 = vpop.f32.mrf.mxu3 }
 0xb54   :  { %v1096_v46 = vpack.c.bf16 %v1093_v44, %v1091_v39  ;;  %1141 = vrot.lane.b32.xlu1 %v1093_v44, %s2671_s27 }
 0xb56   :  { %1104 = vmatpush.bf16.msra.mxu0 %v1096_v46 }
 0xb59   :  { %2277 = vmatmul.msk.bf16.vlgmr.msra.gmra.mxu0 %vm279_vm12, %v2882_v15 }
 0xb69   :  { %2278 = vmatmul.msk.bf16.gmra.mxu0 %vm279_vm12, %v2890_v21 }
 0xbbe   :  { %v1140_v1 = vpop.permute.xlu0 %1139 }
 0xbc6   :  { %v1142_v22 = vpop.permute.xlu1 %1141 }
 0xbd6   :  { %v1106_v47 = vpop.f32.mrf.mxu0 }
 0xbd7   :  { %v1116_v10 = vmul.f32 %v1106_v47, %v3058_v31 }
 0xbde   :  { %v1108_v28 = vpop.f32.mrf.mxu0 }
 0xbdf   :  { %v1117_v7 = vmul.f32 %v1108_v28, %v3060_v34 }
 0xbe1   :  { %v1120_v11 = vpack.c.bf16 %v1117_v7, %v1116_v10 }
 0xbe6   :  { %v1111_v58 = vpop.f32.mrf.mxu0 }
 0xbe7   :  { %v1118_v27 = vmul.f32 %v1111_v58, %v3062_v38 }
 0xbee   :  { %v1113_v5 = vpop.f32.mrf.mxu0 }
 0xbef   :  { %v1119_v6 = vmul.f32 %v1113_v5, %v3064_v41 }
 0xbf1   :  { %v1121_v8 = vpack.c.bf16 %v1119_v6, %v1118_v27 }
 0xbf3   :  { %1129 = vmatpush.bf16.msra.mxu1 %v1121_v8 }
 0xbf7   :  { %1130 = vmatpush.bf16.msra.mxu1 %v1120_v11 }
 0xbfa   :  { %2279 = vmatmul.msk.bf16.vlgmr.msra.gmra.mxu1 %vm164_vm3, %v2919_v26 }
 0xc77   :  { %v1132_v52 = vpop.f32.mrf.mxu1 }
 0xc78   :  { %v1133_v53 = vadd.f32 %v1132_v52, %v1122_v14 }
 0xc7a   :  { %v3204_v2 = vadd.f32 %v1140_v1, %v1133_v53 }
 0xc7c   :  { %v1149_v9 = vsel %vm773_vm4, %v3204_v2, inf  ;;  %v1160_v60 = vsel %vm773_vm4, %v3204_v2, -inf }
 0xc7d   :  { %v1151_v25 = vsel %vm516_vm11, %v1149_v9, inf  ;;  %v1162_v62 = vsel %vm516_vm11, %v1160_v60, -inf }
 0xc7f   :  { %v1134_v18 = vpop.f32.mrf.mxu1 }
 0xc80   :  { %v1135_v20 = vadd.f32 %v1134_v18, %v1122_v14 }
 0xc82   :  { %v3212_v30 = vadd.f32 %v1142_v22, %v1135_v20 }
 0xc84   :  { %v1150_v49 = vsel %vm774_vm7, %v3212_v30, inf  ;;  %v1161_v24 = vsel %vm774_vm7, %v3212_v30, -inf }
 0xc85   :  { %v1152_v35 = vsel %vm516_vm11, %v1150_v49, inf  ;;  %v1163_v48 = vsel %vm516_vm11, %v1161_v24, -inf }
 0xc86   :  { %v1153_v51 = vmin.f32 %v1151_v25, %v1152_v35  ;;  %v1164_v45 = vmax.f32 %v1162_v62, %v1163_v48 }
 0xc88   :  { %v1154_v32 = vrot.slane %v1153_v51, 4  ;;  %v1165_v36 = vrot.slane %v1164_v45, 4 }
 0xc8a   :  { %v1155_v37 = vmin.f32 %v1153_v51, %v1154_v32  ;;  %v1166_v39 = vmax.f32 %v1164_v45, %v1165_v36 }
 0xc8c   :  { %v1156_v44 = vrot.slane %v1155_v37, 2  ;;  %v1167_v46 = vrot.slane %v1166_v39, 2 }
 0xc8e   :  { %v1157_v47 = vmin.f32 %v1155_v37, %v1156_v44  ;;  %v1168_v28 = vmax.f32 %v1166_v39, %v1167_v46 }
 0xc90   :  { %v1158_v58 = vrot.slane %v1157_v47, 1  ;;  %v1169_v5 = vrot.slane %v1168_v28, 1 }
 0xc92   :  { %v1159_v27 = vmin.f32 %v1157_v47, %v1158_v58  ;;  %v1170_v6 = vmax.f32 %v1168_v28, %v1169_v5 }
 0xc94   :  { %v2280_v7 = vadd.f32 -1.0, %v1159_v27   ;;  %v1173_v8 = vadd.f32 1.0, %v1170_v6  }
 0xc96   :  { %v2633_v10 = vmov %v1173_v8   ;;  %v2637_v11 = vmov %v2280_v7  }
 0xc97 LB: > { %v1183_v14 = vadd.f32 %v2635_v10, %v2639_v11  ;;  %v2678_v18 = vmov 1.0   ;;  %s1180_s14 = sadd.s32 1, %s2643_s14   ;;  %s2643_s14 = sphi %s3224_s14, %s1180_s14   ;;  %v2639_v11 = vphi %v2637_v11, %v2638_v11   ;;  %v2635_v10 = vphi %v2633_v10, %v1239_v10  }
 0xc98   : > { %p1177_p2 = scmp.ge.s32.totalorder %s1180_s14, 32  }
 0xc99   : > { %v1184_v52 = vmul.f32 0.5, %v1183_v14  ;;  %2506 = vset.pattern.permute.xlu0 (%p1177_p2), %v2668_v23  ;;  %2507 = vset.pattern.permute.xlu1 (%p1177_p2), %v2668_v23  ;;  %2509 = vtanh.f32 (%p1177_p2), %v3212_v30  ;;  %s3312_s15 = smov (%p1177_p2), 0  }
 0xc9a   :  { %2508 = vset.pattern.permute.xlu2 (%p1177_p2), %v2668_v23  ;;  %2511 = vtanh.f32 (%p1177_p2), %v3204_v2 }
 0xc9b   : > { %2338 = vmatpush.msk.msra.mxu2 %vm235_vm15, %v1184_v52  ;;  %2281 = vmatpush.msk.msra.mxu0 %vm235_vm15, %v1184_v52 }
 0xc9c   : > { %2283 = vmatmul.msk.f32.vlgmr.msra.gmra.mxu2 %vm222_vm0, %v2983_v16  ;;  %2282 = vmatmul.msk.f32.vlgmr.msra.gmra.mxu0 %vm222_vm0, %v2925_v29 }
 0xc9f   :  { %v2510_v9 = vpop.eup (%p1177_p2), %2509 }
 0xca0   :  { %1281 = vperm.xlu0 (%p1177_p2), %2506, %v2510_v9   ;;  %v2512_v3 = vpop.eup (%p1177_p2), %2511 }
 0xca8   :  { %1276 = vperm.xlu0 (%p1177_p2), %2506, %v2512_v3  }
 0xd19   : > { %v1205_v53 = vpop.f32.mrf.mxu0 }
 0xd1a   : > { %vm1211_vm6 = vcmp.ge.f32.partialorder %v3204_v2, %v1205_v53 }
 0xd1b   : > { %vm1213_vm13 = vmand %vm1211_vm6, %vm773_vm4 }
 0xd1f   : > { %v1208_v1 = vpop.f32.mrf.mxu2 }
 0xd20   : > { %vm1212_vm10 = vcmp.ge.f32.partialorder %v3212_v30, %v1208_v1 }
 0xd21   : > { %vm1214_vm14 = vmand %vm1212_vm10, %vm774_vm7 }
 0xd22   : > { %2284 = vmatpush.msk.msra.mxu1 %vm1214_vm14, %v2678_v18 }
 0xd24   : > { %2285 = vmatpush.msk.msra.mxu1 %vm1213_vm13, %v2678_v18 }
 0xd25   : > { %2286 = vmatmul.msk.f32.vlgmr.msra.gmra.mxu1 %vm279_vm12, %v2972_v63 }
 0xda1   :  { %1179 = sbr.rel (!%p1177_p2) target bundleno = 3223 (0xc97), region = 141 }
 0xda2   : > { %v1234_v20 = vpop.f32.mrf.mxu1 }
 0xda3   : > { %vm1237_vm1 = vcmp.ge.f32.partialorder %v1234_v20, %v1148_v12 }
 0xda4   : > { %v1238_v22 = vsel %vm1237_vm1, %v1184_v52, %v2639_v11   ;;  %v1239_v10 = vsel %vm1237_vm1, %v2635_v10, %v1184_v52  }
 0xda5   : > { %v2638_v11 = vmov %v1238_v22   ;;  %2287 = vmatpush.msk.msra.mxu0 (%p1177_p2), %vm235_vm15, %v1238_v22 }
 0xda6   :  { %2288 = vmatmul.msk.f32.vlgmr.msra.gmra.mxu0 %vm222_vm0, %v2925_v29 }
 0xdae   :  { %2289 = vmatmul.msk.f32.gmra.mxu0 %vm222_vm0, %v2983_v16 }
 0xe23   :  { %v1260_v12 = vpop.f32.mrf.mxu0 }
 0xe24   :  { %vm1266_vm4 = vcmp.ge.f32.partialorder %v3204_v2, %v1260_v12 }
 0xe25   :  { %v1268_v60 = vsel %vm1266_vm4, 1.0, %v2666_v4 }
 0xe26   :  { %v3258_v49 = vmul.f32 %v1268_v60, %v3021_v13 }
 0xe28   :  { %vm1400_vm7 = vcmp.gt.f32.partialorder %v3258_v49, 0.5 }
 0xe2b   :  { %v1263_v24 = vpop.f32.mrf.mxu0 }
 0xe2c   :  { %vm1267_vm2 = vcmp.ge.f32.partialorder %v3212_v30, %v1263_v24 }
 0xe2d   :  { %v1269_v25 = vsel %vm1267_vm2, 1.0, %v2666_v4 }
 0xe2e   :  { %v3264_v62 = vmul.f32 %v1269_v25, %v3026_v17  ;;  %v1282_v17 = vpop.permute.xlu0 %1281 }
 0xe2f   :  { %v1285_v2 = vmul.f32 %v1282_v17, %v1077_v43 }
 0xe30   :  { %vm1401_vm5 = vcmp.gt.f32.partialorder %v3264_v62, 0.5  ;;  %1293 = vperm.xlu1 %2507, %v3264_v62   ;;  %1359 = vmatpush.msra.mxu3 %v3264_v62  ;;  %v1298_v13 = vpack.c.bf16 %v3264_v62, %v3258_v49 }
 0xe32   :  { %1306 = vmatpush.bf16.msra.mxu1 %v1298_v13  ;;  %1329 = vmatpush.bf16.msra.mxu2 %v1298_v13 }
 0xe33   :  { %1360 = vmatpush.msra.mxu3 %v3258_v49 }
 0xe34   :  { %2294 = vmatmul.msk.f32.vlgmr.msra.gmra.mxu3 %vm279_vm12, %v2972_v63 }
 0xe35   :  { %2292 = vmatmul.msk.bf16.vlgmr.msra.gmra.mxu2 %vm279_vm12, %v2818_v50  ;;  %2290 = vmatmul.msk.bf16.vlgmr.msra.gmra.mxu1 %vm279_vm12, %v2882_v15 }
 0xe36   :  { %v1277_v48 = vpop.permute.xlu0 %1276 }
 0xe37   :  { %v1284_v51 = vmul.f32 %v1277_v48, %v1076_v42 }
 0xe38   :  { %1288 = vperm.xlu1 %2507, %v3258_v49  }
 0xe45   :  { %2293 = vmatmul.msk.bf16.gmra.mxu2 %vm279_vm12, %v2828_v54  ;;  %2291 = vmatmul.msk.bf16.gmra.mxu1 %vm279_vm12, %v2890_v21 }
 0xea2   :  { %v1294_v30 = vpop.permute.xlu1 %1293 }
 0xea3   :  { %v3285_v35 = vmul.f32 %v1294_v30, %v1285_v2 }
 0xea5   :  { %1382 = vmatpush.msrb.mxu3 %v3285_v35 }
 0xeaa   :  { %v1289_v45 = vpop.permute.xlu1 %1288 }
 0xeab   :  { %v3290_v32 = vmul.f32 %v1289_v45, %v1284_v51 }
 0xead   :  { %1383 = vmatpush.msrb.mxu3 %v3290_v32 }
 0xeae   :  { %2295 = vmatmul.msk.f32.vlgmr.msrb.gmra.mxu3 %vm279_vm12, %v2972_v63 }
 0xeb2   :  { %v1308_v37 = vpop.f32.mrf.mxu1 }
 0xeb3   :  { %v1318_v33 = vmul.f32 %v1308_v37, %v3058_v31 }
 0xeb7   :  { %v3295_v36 = vpop.f32.mrf.mxu3 }
 0xeb8   :  { %v1365_v40 = vmax.f32 %v3295_v36, 1.0  ;;  %v1331_v39 = vpop.f32.mrf.mxu2 }
 0xeb9   :  { %v3299_v42 = vmul.f32 %v1331_v39, %v1318_v33 }
 0xeba   :  { %2513 = vrcp.f32 %v1365_v40  ;;  %v1310_v44 = vpop.f32.mrf.mxu1 }
 0xebb   :  { %v1319_v47 = vmul.f32 %v1310_v44, %v3060_v34  ;;  %v1367_v34 = vld [vmem:[#allocation2] sm:$0x3] }
 0xec0   :  { %v2514_v43 = vpop.eup %2513  ;;  %v1333_v46 = vpop.f32.mrf.mxu2 }
 0xec1   :  { %1390 = vperm.xlu2 %2508, %v2514_v43   ;;  %v3302_v28 = vmul.f32 %v1333_v46, %v1319_v47 }
 0xec2   :  { %v1313_v58 = vpop.f32.mrf.mxu1 }
 0xec3   :  { %v1320_v27 = vmul.f32 %v1313_v58, %v3062_v38 }
 0xec8   :  { %v1336_v5 = vpop.f32.mrf.mxu2 }
 0xec9   :  { %v3305_v6 = vmul.f32 %v1336_v5, %v1320_v27 }
 0xeca   :  { %v1315_v7 = vpop.f32.mrf.mxu1 }
 0xecb   :  { %v1321_v10 = vmul.f32 %v1315_v7, %v3064_v41 }
 0xed0   :  { %v1338_v8 = vpop.f32.mrf.mxu2 }
 0xed1   :  { %v3308_v31 = vmul.f32 %v1338_v8, %v1321_v10 }
 0xf1b   :  { %v1391_v11 = vpop.permute.xlu2 %1390 }
 0xf31   :  { %v1385_v14 = vpop.f32.mrf.mxu3 }
 0xf32   :  { %v1393_v52 = vmul.f32 %v1391_v11, %v1385_v14 }
 0xf34   :  { %1395 = vrot.lane.b32.xlu2 %v1393_v52, %s2669_s0 }
 0xf8e   :  { %v1396_v53 = vpop.permute.xlu2 %1395 }
 0xf8f   :  { %v1398_v1 = vadd.f32 %v1396_v53, %v1367_v34 }
 0xf91   :  { %1399 = vst.msk [vmem:[#allocation2] sm:$0x3] %vm771_vm8, %v1398_v1 }
 0xf92 LB: > { %v2679_v38 = vmov 0   ;;  %v1408_v41 = vstv %s2647_s15  ;;  %v2680_v20 = vmov 0.0   ;;  %s1452_s16 = scalar_lea.vmem [#allocation2], %s2647_s15  ;;  %s1407_s15 = sadd.s32 1, %s2647_s15   ;;  %s2647_s15 = sphi %s3312_s15, %s1407_s15  }
 0xf93   : > { %2515 = vset.pattern.permute.xlu0 %v2679_v38  ;;  %2516 = vset.pattern.permute.xlu1 %v2679_v38  ;;  %vm1409_vm6 = vcmp.eq.s32.totalorder %v2909_v55, %v1408_v41  ;;  %vm1410_vm10 = vcmp.eq.s32.totalorder %v2965_v61, %v1408_v41  ;;  %p1404_p3 = scmp.ge.s32.totalorder %s1407_s15, 2  }
 0xf94   : > { %vm1411_vm13 = vmand %vm1409_vm6, %vm1400_vm7  ;;  %v1475_v52 = vpack.c.bf16 (%p1404_p3), %v3308_v31, %v3305_v6  ;;  %v2298_v34 = vld [vmem:[%s3622_s6 + $0x60] sm:$0xff] (%p1404_p3)  ;;  %v2299_v53 = vld [vmem:[%s3622_s6 + $0x68] sm:$0xff] (%p1404_p3)  ;;  %2522 = vset.pattern.permute.xlu2 (%p1404_p3), %v2668_v23 }
 0xf95   : > { %v1413_v18 = vsel %vm1411_vm13, 1, %v2679_v38  ;;  %v1434_v22 = vsel %vm1411_vm13, 1.0, %v2680_v20  ;;  %vm1412_vm14 = vmand %vm1410_vm10, %vm1401_vm5  ;;  %v2296_v1 = vld [vmem:[%s3622_s6 + $0x50] sm:$0xff] (%p1404_p3)  ;;  %v2297_v41 = vld [vmem:[%s3622_s6 + $0x58] sm:$0xff] (%p1404_p3) }
 0xf96   : > { %v1436_v9 = vsel %vm516_vm11, %v1434_v22, 0.0  ;;  %1416 = vperm.xlu0 %2515, %v1413_v18   ;;  %v1435_v3 = vsel %vm1412_vm14, 1.0, %v2680_v20  ;;  %v1414_v25 = vsel %vm1412_vm14, 1, %v2679_v38  ;;  %1482 = vmatpush.bf16.msrb.mxu2 (%p1404_p3), %v1475_v52  ;;  %v1474_v18 = vpack.c.bf16 (%p1404_p3), %v3302_v28, %v3299_v42 }
 0xf97   : > { %v1437_v12 = vsel %vm516_vm11, %v1435_v3, 0.0  ;;  %v1463_v20 = vpack.c.bf16 (%p1404_p3), %v2297_v41, %v2296_v1  ;;  %v1510_v22 = vpack.c.bf16 (%p1404_p3), %v3285_v35, %v3290_v32 }
 0xf98   : > { %v1438_v60 = vadd.f32 %v1437_v12, %v1436_v9  ;;  %v1453_v8 = vld [vmem:[%s1452_s16] sm:$0x1] }
 0xf9a   : > { %v1439_v24 = vrot.slane %v1438_v60, 4  ;;  %1483 = vmatpush.bf16.msrb.mxu2 (%p1404_p3), %v1474_v18 }
 0xf9c   : > { %v1440_v13 = vadd.f32 %v1439_v24, %v1438_v60 }
 0xf9d   :  { %2306 = vmatmul.msk.bf16.vlgmr.msrb.gmra.mxu2 (%p1404_p3), %vm164_vm3, %v2790_v19 }
 0xf9e   : > { %1419 = vperm.xlu0 %2515, %v1414_v25   ;;  %v1441_v17 = vrot.slane %v1440_v13, 2 }
 0xfa0   : > { %v1442_v2 = vadd.f32 %v1441_v17, %v1440_v13 }
 0xfa2   : > { %v1443_v30 = vrot.slane %v1442_v2, 1 }
 0xfa4   : > { %v1444_v48 = vadd.f32 %v1443_v30, %v1442_v2 }
 0xfa6   : > { %vm1445_vm1 = vcmp.gt.f32.partialorder %v1444_v48, 0.5  ;;  %2523 = vset.pattern.permute.xlu0 (%p1404_p3), %v2668_v23 }
 0xfa7   : > { %v1446_v51 = vsel %vm1445_vm1, 1, %v2679_v38  ;;  %v1464_v38 = vpack.c.bf16 (%p1404_p3), %v2299_v53, %v2298_v34 }
 0xfa8   : > { %1448 = vperm.xlu1 %2516, %v1446_v51  }
 0xfa9   :  { %1521 = vmatpush.bf16.msra.mxu3 (%p1404_p3), %v1464_v38 }
 0xfad   :  { %1522 = vmatpush.bf16.msra.mxu3 (%p1404_p3), %v1463_v20 }
 0xfb0   :  { %2524 = vset.pattern.permute.xlu1 (%p1404_p3), %v2668_v23  ;;  %2307 = vmatmul.msk.bf16.vlgmr.msra.gmra.mxu3 (%p1404_p3), %vm164_vm3, %v1510_v22 }
0x1008   : > { %v1417_v45 = vpop.permute.xlu0 %1416 }
0x1009   : > { %vm1421_vm4 = vcmp.eq.s32.totalorder %v1417_v45, 1 }
0x100a   : > { %v1423_v40 = vsel %vm1421_vm4, %v3290_v32, -inf }
0x100b   : > { %v1425_v39 = vsel %vm164_vm3, %v1423_v40, -inf }
0x1010   : > { %v1420_v43 = vpop.permute.xlu0 %1419 }
0x1011   : > { %vm1422_vm2 = vcmp.eq.s32.totalorder %v1420_v43, 1 }
0x1012   : > { %v1424_v37 = vsel %vm1422_vm2, %v3285_v35, -inf }
0x1013   : > { %v1426_v33 = vsel %vm164_vm3, %v1424_v37, -inf }
0x1014   : > { %v1427_v44 = vmax.f32 %v1425_v39, %v1426_v33  ;;  %v2300_v33 = vld [vmem:[%s3622_s6 + $0x70] sm:$0x3] (%p1404_p3) }
0x1015   :  { %2308 = vmatpush.msk.msrb.mxu0 (%p1404_p3), %vm235_vm15, %v2300_v33 }
0x1016   : > { %v1428_v46 = vrot.slane %v1427_v44, 4  ;;  %2309 = vmatmul.msk.f32.vlgmr.msrb.gmra.mxu0 (%p1404_p3), %vm222_vm0, %v2839_v56 }
0x1018   : > { %v1429_v47 = vmax.f32 %v1427_v44, %v1428_v46 }
0x101a   : > { %v1430_v58 = vrot.slane %v1429_v47, 2  ;;  %v1449_v5 = vpop.permute.xlu1 %1448 }
0x101b   : > { %vm1450_vm6 = vcmp.eq.s32.totalorder %v1449_v5, 1 }
0x101c   : > { %v1431_v27 = vmax.f32 %v1429_v47, %v1430_v58 }
0x101e   : > { %v1432_v7 = vrot.slane %v1431_v27, 1  ;;  %2310 = vmatmul.msk.f32.gmra.mxu0 (%p1404_p3), %vm222_vm0, %v2846_v57 }
0x1020   : > { %v1433_v10 = vmax.f32 %v1431_v27, %v1432_v7  ;;  %v1485_v9 = vpop.f32.mrf.mxu2 (%p1404_p3) }
0x1021   :  { %1406 = sbr.rel (!%p1404_p3) target bundleno = 3986 (0xf92), region = 152  ;;  %v1486_v3 = vadd.f32 (%p1404_p3), 1.0, %v1485_v9 }
0x1022   : > { %v1451_v11 = vsel %vm1450_vm6, %v1433_v10, 0.0 }
0x1023   : > { %v1454_v14 = vadd.f32 %v1453_v8, %v1451_v11  ;;  %2525 = vrsqrt.f32 (%p1404_p3), %v1486_v3  ;;  %vm1496_vm14 = vweird.f32 (%p1404_p3), %v1486_v3 }
0x1025   : > { %1456 = vst.msk [vmem:[%s1452_s16] sm:$0x1] %vm828_vm9, %v1454_v14 }
0x1026   :  { %2311 = vmatmul.msk.f32.gmra.mxu0 %vm222_vm0, %v2853_v59 }
0x1028   :  { %v1487_v12 = vpop.f32.mrf.mxu2 }
0x1029   :  { %v2526_v60 = vpop.eup %2525  ;;  %v1488_v24 = vadd.f32 1.0, %v1487_v12 }
0x102a   :  { %v1491_v25 = vmul.f32 %v2526_v60, %v1486_v3  ;;  %vm1497_vm10 = vweird.f32 %v2526_v60 }
0x102b   :  { %2527 = vrsqrt.f32 %v1488_v24  ;;  %vm1506_vm1 = vweird.f32 %v1488_v24  ;;  %vm1498_vm4 = vmor %vm1496_vm14, %vm1497_vm10 }
0x102c   :  { %v1492_v13 = vmul.f32 %v2526_v60, %v1491_v25 }
0x102e   :  { %v1493_v17 = vmul.f32 0.5, %v1492_v13  ;;  %2312 = vmatmul.msk.f32.gmra.mxu0 %vm222_vm0, %v2866_v0 }
0x1030   :  { %v1494_v48 = vsub.f32 1.5, %v1493_v17 }
0x1031   :  { %v2528_v2 = vpop.eup %2527 }
0x1032   :  { %v1501_v30 = vmul.f32 %v2528_v2, %v1488_v24  ;;  %v1495_v19 = vmul.f32 %v2526_v60, %v1494_v48  ;;  %vm1507_vm13 = vweird.f32 %v2528_v2 }
0x1033   :  { %vm1508_vm2 = vmor %vm1506_vm1, %vm1507_vm13  ;;  %v1524_v44 = vpop.f32.mrf.mxu3 }
0x1034   :  { %v1502_v35 = vmul.f32 %v2528_v2, %v1501_v30  ;;  %v1499_v40 = vsel %vm1498_vm4, %v2526_v60, %v1495_v19 }
0x1035   :  { %v1675_v17 = vmul.f32 %v1499_v40, %v1499_v40 }
0x1036   :  { %v1503_v32 = vmul.f32 0.5, %v1502_v35 }
0x1038   :  { %v1504_v51 = vsub.f32 1.5, %v1503_v32 }
0x103a   :  { %v1505_v45 = vmul.f32 %v2528_v2, %v1504_v51 }
0x103b   :  { %v1526_v46 = vpop.f32.mrf.mxu3 }
0x103c   :  { %v1509_v43 = vsel %vm1508_vm2, %v2528_v2, %v1505_v45 }
0x103d   :  { %v2517_v37 = vpack.i.bf16 %v1509_v43, %v1499_v40  ;;  %v1592_v39 = vpack.c.bf16 %v1509_v43, %v1499_v40  ;;  %v1676_v13 = vmul.f32 %v1509_v43, %v1509_v43 }
0x103f   :  { %2518 = vrot.lane.b32.xlu0 %v2517_v37, %s2669_s0  ;;  %1600 = vmatpush.bf16.msra.mxu2 %v1592_v39 }
0x1042   :  { %2315 = vmatmul.msk.bf16.vlgmr.msra.gmra.mxu2 %vm279_vm12, %v2818_v50  ;;  %v3377_v50 = vld [vmem:[%s3623_s7 + $0x8] sm:$0xf] }
0x1043   :  { %v1529_v32 = vperm.slane %v3377_v50, 1 }
0x1052   :  { %2316 = vmatmul.msk.bf16.gmra.mxu2 %vm279_vm12, %v2828_v54  ;;  %v1511_v54 = vperm.slane %v3377_v50, 0 }
0x1054   :  { %v3382_v56 = vadd.f32 %v1524_v44, %v1511_v54  ;;  %v3384_v58 = vadd.f32 %v1526_v46, %v1511_v54 }
0x1093   :  { %v1550_v2 = vpop.f32.mrf.mxu0 }
0x1094   :  { %v1551_v33 = vadd.f32 %v1550_v2, %v1529_v32 }
0x109b   :  { %v1553_v30 = vpop.f32.mrf.mxu0 }
0x109c   :  { %v1554_v44 = vadd.f32 %v1553_v30, %v1529_v32 }
0x10a3   :  { %v1556_v48 = vpop.f32.mrf.mxu0 }
0x10a4   :  { %v1557_v51 = vadd.f32 %v1556_v48, %v1529_v32 }
0x10ab   :  { %v1559_v35 = vpop.f32.mrf.mxu0 }
0x10ac   :  { %v1560_v19 = vadd.f32 %v1559_v35, %v1529_v32 }
0x10b1   :  { %v2519_v47 = vpop.permute.xlu0 %2518 }
0x10b2   :  { %v2521_v57 = vunpack.i.h.bf16 %v2519_v47  ;;  %v2520_v5 = vunpack.i.l.bf16 %v2519_v47 }
0x10b4   :  { %v1570_v59 = vsel %vm164_vm3, %v3382_v56, %v2520_v5  ;;  %v1571_v27 = vsel %vm164_vm3, %v3384_v58, %v2521_v57 }
0x10b5   :  { %v1572_v7 = vpack.c.bf16 %v1571_v27, %v1570_v59 }
0x10b7   :  { %1580 = vmatpush.bf16.msrb.mxu1 %v1572_v7 }
0x10ba   :  { %2313 = vmatmul.msk.bf16.vlgmr.msrb.gmra.mxu1 %vm279_vm12, %v2882_v15 }
0x10c5   :  { %v1602_v14 = vpop.f32.mrf.mxu2 }
0x10ca   :  { %2314 = vmatmul.msk.bf16.gmra.mxu1 %vm279_vm12, %v2890_v21 }
0x10cd   :  { %v1604_v52 = vpop.f32.mrf.mxu2 }
0x10d5   :  { %v1607_v34 = vpop.f32.mrf.mxu2 }
0x10dd   :  { %v1609_v9 = vpop.f32.mrf.mxu2 }
0x1137   :  { %v1582_v0 = vpop.f32.mrf.mxu1 }
0x1138   :  { %v1636_v40 = vadd.f32 %v1582_v0, %v1551_v33 }
0x113a   :  { %v1640_v7 = vmax.f32 %v1636_v40, 0.0 }
0x113f   :  { %v1584_v8 = vpop.f32.mrf.mxu1 }
0x1140   :  { %1618 = vrot.lane.b32.xlu2 %v1584_v8, %s2677_s1  ;;  %v1637_v5 = vadd.f32 %v1584_v8, %v1554_v44 }
0x1147   :  { %v1587_v10 = vpop.f32.mrf.mxu1 }
0x1148   :  { %1620 = vrot.lane.b32.xlu0 %v1587_v10, %s2677_s1  ;;  %v1638_v45 = vadd.f32 %v1587_v10, %v1557_v51 }
0x114a   :  { %v1642_v54 = vmax.f32 %v1638_v45, 0.0 }
0x114f   :  { %v1589_v11 = vpop.f32.mrf.mxu1 }
0x1150   :  { %1622 = vrot.lane.b32.xlu1 %v1589_v11, %s2677_s1  ;;  %v1639_v37 = vadd.f32 %v1589_v11, %v1560_v19  ;;  %v2304_v11 = vld [vmem:[%s3624_s8 + $0x50] sm:$0xff] }
0x1152   :  { %v1643_v46 = vmax.f32 %v1639_v37, 0.0 }
0x1158   :  { %1616 = vrot.lane.b32.xlu1 %v1582_v0, %s2677_s1  ;;  %v2305_v0 = vld [vmem:[%s3624_s8 + $0x58] sm:$0xff] }
0x1159   :  { %v1473_v8 = vpack.c.bf16 %v2305_v0, %v2304_v11 }
0x119a   :  { %v1619_v41 = vpop.permute.xlu2 %1618 }
0x119b   :  { %v1629_v18 = vmul.f32 %v1619_v41, %v3302_v28 }
0x119d   :  { %v1633_v3 = vmul.f32 %v1629_v18, %v1604_v52  ;;  %v1670_v18 = vperm.slane %v3377_v50, 2 }
0x11ba   :  { %v1621_v53 = vpop.permute.xlu0 %1620 }
0x11bb   :  { %v1630_v1 = vmul.f32 %v1621_v53, %v3305_v6 }
0x11bd   :  { %v1634_v38 = vmul.f32 %v1630_v1, %v1607_v34  ;;  %v2302_v1 = vld [vmem:[%s3624_s8 + $0x40] sm:$0xff] }
0x11bf   :  { %1656 = vperm.xlu2 %2522, %v1634_v38   ;;  %v2303_v38 = vld [vmem:[%s3624_s8 + $0x48] sm:$0xff]  ;;  %s3468_s8 = smov 0  }
0x11c0   :  { %v1472_v41 = vpack.c.bf16 %v2303_v38, %v2302_v1 }
0x11c2   :  { %v1623_v20 = vpop.permute.xlu1 %1622 }
0x11c3   :  { %v1631_v22 = vmul.f32 %v1623_v20, %v3308_v31  ;;  %v1671_v20 = vadd.f32 %v1670_v18, %v3382_v56 }
0x11c5   :  { %v1635_v12 = vmul.f32 %v1631_v22, %v1609_v9  ;;  %v1672_v9 = vadd.f32 %v1670_v18, %v3384_v58 }
0x11c7   :  { %1651 = vperm.xlu2 %2522, %v1633_v3   ;;  %1661 = vperm.xlu0 %2523, %v1635_v12   ;;  %v1673_v12 = vmax.f32 %v1671_v20, 0.0 }
0x11ca   :  { %v1617_v60 = vpop.permute.xlu1 %1616 }
0x11cb   :  { %v1628_v24 = vmul.f32 %v1617_v60, %v3299_v42 }
0x11cd   :  { %v1632_v25 = vmul.f32 %v1628_v24, %v1602_v14  ;;  %v1641_v14 = vmax.f32 %v1637_v5, 0.0  ;;  %v1674_v24 = vmax.f32 %v1672_v9, 0.0 }
0x11cf   :  { %1684 = vperm.xlu2 %2522, %v1676_v13   ;;  %1646 = vperm.xlu1 %2524, %v1632_v25  }
0x11d7   :  { %1679 = vperm.xlu1 %2524, %v1675_v17  }
0x1219   :  { %v1657_v39 = vpop.permute.xlu2 %1656 }
0x121a   :  { %v1666_v47 = vmul.f32 %v1657_v39, %v1642_v54 }
0x1221   :  { %v1652_v27 = vpop.permute.xlu2 %1651 }
0x1222   :  { %v1665_v34 = vmul.f32 %v1652_v27, %v1641_v14 }
0x1229   :  { %v1685_v60 = vpop.permute.xlu2 %1684 }
0x122a   :  { %v1688_v13 = vmul.f32 %v1685_v60, %v1674_v24 }
0x1239   :  { %v1662_v43 = vpop.permute.xlu0 %1661 }
0x123a   :  { %v1667_v57 = vmul.f32 %v1662_v43, %v1643_v46 }
0x123c   :  { %v1669_v59 = vpack.c.bf16 %v1667_v57, %v1666_v47 }
0x123e   :  { %1695 = vmatpush.bf16.msrb.mxu3 %v1669_v59 }
0x1241   :  { %v1647_v52 = vpop.permute.xlu1 %1646 }
0x1242   :  { %v1664_v53 = vmul.f32 %v1647_v52, %v1640_v7 }
0x1244   :  { %v1668_v10 = vpack.c.bf16 %v1665_v34, %v1664_v53 }
0x1246   :  { %1696 = vmatpush.bf16.msrb.mxu3 %v1668_v10 }
0x1249   :  { %2317 = vmatmul.msk.bf16.vlgmr.msrb.gmra.mxu3 %vm164_vm3, %v2919_v26  ;;  %v1680_v3 = vpop.permute.xlu1 %1679 }
0x124a   :  { %1715 = vmatpush.bf16.msra.mxu3 %v1473_v8  ;;  %v1687_v25 = vmul.f32 %v1680_v3, %v1673_v12 }
0x124e   :  { %1716 = vmatpush.bf16.msra.mxu3 %v1472_v41 }
0x12cc   :  { %v1698_v22 = vpop.f32.mrf.mxu3 }
0x12cd   :  { %v3420_v17 = vadd.f32 %v1698_v22, %v1687_v25 }
0x12cf   :  { %v1703_v48 = vmax.f32 %v3420_v17, 0.0 }
0x12d4   :  { %v1700_v2 = vpop.f32.mrf.mxu3 }
0x12d5   :  { %v3422_v30 = vadd.f32 %v1700_v2, %v1688_v13 }
0x12d7   :  { %v1704_v35 = vmax.f32 %v3422_v30, 0.0 }
0x12d9   :  { %v1705_v56 = vpack.c.bf16 %v1704_v35, %v1703_v48 }
0x12db   :  { %2318 = vmatmul.msk.bf16.vlgmr.msra.gmra.mxu3 %vm164_vm3, %v1705_v56 }
0x135e   :  { %v1718_v58 = vpop.f32.mrf.mxu3 }
0x135f   :  { %1766 = vrot.lane.b32.xlu0 %v1718_v58, %s2671_s27 }
0x1366   :  { %v1720_v32 = vpop.f32.mrf.mxu3 }
0x1367   :  { %v1723_v51 = vpack.c.bf16 %v1720_v32, %v1718_v58  ;;  %1768 = vrot.lane.b32.xlu1 %v1720_v32, %s2671_s27 }
0x1369   :  { %1731 = vmatpush.bf16.msra.mxu0 %v1723_v51 }
0x136c   :  { %2319 = vmatmul.msk.bf16.vlgmr.msra.gmra.mxu0 %vm279_vm12, %v2882_v15  ;;  %v3444_v15 = vmul.f32 0.5, %v3295_v36 }
0x137c   :  { %2320 = vmatmul.msk.bf16.gmra.mxu0 %vm279_vm12, %v2890_v21  ;;  %v1775_v21 = vceil.f32 %v3444_v15 }
0x13d1   :  { %v1767_v40 = vpop.permute.xlu0 %1766 }
0x13d9   :  { %v1769_v59 = vpop.permute.xlu1 %1768 }
0x13e9   :  { %v1733_v19 = vpop.f32.mrf.mxu0 }
0x13ea   :  { %v1743_v43 = vmul.f32 %v1733_v19, %v3299_v42 }
0x13f1   :  { %v1735_v45 = vpop.f32.mrf.mxu0 }
0x13f2   :  { %v1744_v54 = vmul.f32 %v1735_v45, %v3302_v28 }
0x13f4   :  { %v1747_v47 = vpack.c.bf16 %v1744_v54, %v1743_v43 }
0x13f9   :  { %v1738_v37 = vpop.f32.mrf.mxu0 }
0x13fa   :  { %v1745_v33 = vmul.f32 %v1738_v37, %v3305_v6  ;;  %v1749_v6 = vperm.slane %v3377_v50, 3 }
0x1401   :  { %v1740_v39 = vpop.f32.mrf.mxu0 }
0x1402   :  { %v1746_v44 = vmul.f32 %v1740_v39, %v3308_v31 }
0x1404   :  { %v1748_v46 = vpack.c.bf16 %v1746_v44, %v1745_v33 }
0x1406   :  { %1756 = vmatpush.bf16.msra.mxu1 %v1748_v46 }
0x140a   :  { %1757 = vmatpush.bf16.msra.mxu1 %v1747_v47 }
0x140d   :  { %2321 = vmatmul.msk.bf16.vlgmr.msra.gmra.mxu1 %vm164_vm3, %v2919_v26 }
0x148a   :  { %v1759_v57 = vpop.f32.mrf.mxu1 }
0x148b   :  { %v1760_v31 = vadd.f32 %v1759_v57, %v1749_v6 }
0x148d   :  { %v3448_v28 = vadd.f32 %v1767_v40, %v1760_v31 }
0x148f   :  { %v1776_v27 = vsel %vm1400_vm7, %v3448_v28, inf  ;;  %v1787_v26 = vsel %vm1400_vm7, %v3448_v28, -inf }
0x1490   :  { %v1778_v14 = vsel %vm516_vm11, %v1776_v27, inf  ;;  %v1789_v52 = vsel %vm516_vm11, %v1787_v26, -inf }
0x1492   :  { %v1761_v5 = vpop.f32.mrf.mxu1 }
0x1493   :  { %v1762_v42 = vadd.f32 %v1761_v5, %v1749_v6 }
0x1495   :  { %v3456_v36 = vadd.f32 %v1769_v59, %v1762_v42 }
0x1497   :  { %v1777_v50 = vsel %vm1401_vm5, %v3456_v36, inf  ;;  %v1788_v7 = vsel %vm1401_vm5, %v3456_v36, -inf }
0x1498   :  { %v1779_v34 = vsel %vm516_vm11, %v1777_v50, inf  ;;  %v1790_v53 = vsel %vm516_vm11, %v1788_v7, -inf }
0x1499   :  { %v1780_v10 = vmin.f32 %v1778_v14, %v1779_v34  ;;  %v1791_v11 = vmax.f32 %v1789_v52, %v1790_v53 }
0x149b   :  { %v1781_v0 = vrot.slane %v1780_v10, 4  ;;  %v1792_v8 = vrot.slane %v1791_v11, 4 }
0x149d   :  { %v1782_v1 = vmin.f32 %v1780_v10, %v1781_v0  ;;  %v1793_v38 = vmax.f32 %v1791_v11, %v1792_v8 }
0x149f   :  { %v1783_v41 = vrot.slane %v1782_v1, 2  ;;  %v1794_v18 = vrot.slane %v1793_v38, 2 }
0x14a1   :  { %v1784_v20 = vmin.f32 %v1782_v1, %v1783_v41  ;;  %v1795_v22 = vmax.f32 %v1793_v38, %v1794_v18 }
0x14a3   :  { %v1785_v9 = vrot.slane %v1784_v20, 1  ;;  %v1796_v3 = vrot.slane %v1795_v22, 1 }
0x14a5   :  { %v1786_v12 = vmin.f32 %v1784_v20, %v1785_v9  ;;  %v1797_v60 = vmax.f32 %v1795_v22, %v1796_v3 }
0x14a7   :  { %v2322_v24 = vadd.f32 -1.0, %v1786_v12   ;;  %v1800_v25 = vadd.f32 1.0, %v1797_v60  }
0x14a9   :  { %v2649_v13 = vmov %v1800_v25   ;;  %v2653_v2 = vmov %v2322_v24  }
0x14aa LB: > { %v1810_v56 = vadd.f32 %v2651_v13, %v2655_v2  ;;  %v2681_v19 = vmov 1.0   ;;  %s1807_s8 = sadd.s32 1, %s2659_s8   ;;  %s2659_s8 = sphi %s3468_s8, %s1807_s8   ;;  %v2655_v2 = vphi %v2653_v2, %v2654_v2   ;;  %v2651_v13 = vphi %v2649_v13, %v1866_v13  }
0x14ab   : > { %p1804_p4 = scmp.ge.s32.totalorder %s1807_s8, 32  }
0x14ac   : > { %v1811_v58 = vmul.f32 0.5, %v1810_v56  ;;  %2529 = vset.pattern.permute.xlu0 (%p1804_p4), %v2668_v23  ;;  %2530 = vset.pattern.permute.xlu1 (%p1804_p4), %v2668_v23  ;;  %2532 = vtanh.f32 (%p1804_p4), %v3456_v36  ;;  %v1947_v17 = vld [vmem:[#allocation2] sm:$0x3] (%p1804_p4)  ;;  %s3531_s27 = smov (%p1804_p4), 0  }
0x14ad   :  { %2531 = vset.pattern.permute.xlu2 (%p1804_p4), %v2668_v23  ;;  %2534 = vtanh.f32 (%p1804_p4), %v3448_v28 }
0x14ae   : > { %2339 = vmatpush.msk.msra.mxu2 %vm235_vm15, %v1811_v58  ;;  %2323 = vmatpush.msk.msra.mxu0 %vm235_vm15, %v1811_v58 }
0x14af   : > { %2325 = vmatmul.msk.f32.vlgmr.msra.gmra.mxu2 %vm222_vm0, %v2983_v16  ;;  %2324 = vmatmul.msk.f32.vlgmr.msra.gmra.mxu0 %vm222_vm0, %v2925_v29 }
0x14b2   :  { %v2533_v39 = vpop.eup (%p1804_p4), %2532 }
0x14b3   :  { %1908 = vperm.xlu0 (%p1804_p4), %2529, %v2533_v39   ;;  %v2535_v33 = vpop.eup (%p1804_p4), %2534 }
0x14bb   :  { %1903 = vperm.xlu0 (%p1804_p4), %2529, %v2535_v33  }
0x152c   : > { %v1832_v32 = vpop.f32.mrf.mxu0 }
0x152d   : > { %vm1838_vm6 = vcmp.ge.f32.partialorder %v3448_v28, %v1832_v32 }
0x152e   : > { %vm1840_vm13 = vmand %vm1838_vm6, %vm1400_vm7 }
0x1532   : > { %v1835_v51 = vpop.f32.mrf.mxu2 }
0x1533   : > { %vm1839_vm10 = vcmp.ge.f32.partialorder %v3456_v36, %v1835_v51 }
0x1534   : > { %vm1841_vm14 = vmand %vm1839_vm10, %vm1401_vm5 }
0x1535   : > { %2326 = vmatpush.msk.msra.mxu1 %vm1841_vm14, %v2681_v19 }
0x1537   : > { %2327 = vmatpush.msk.msra.mxu1 %vm1840_vm13, %v2681_v19 }
0x1538   : > { %2328 = vmatmul.msk.f32.vlgmr.msra.gmra.mxu1 %vm279_vm12, %v2972_v63 }
0x15b4   :  { %1806 = sbr.rel (!%p1804_p4) target bundleno = 5290 (0x14aa), region = 163 }
0x15b5   : > { %v1861_v45 = vpop.f32.mrf.mxu1 }
0x15b6   : > { %vm1864_vm1 = vcmp.ge.f32.partialorder %v1861_v45, %v1775_v21 }
0x15b7   : > { %v1865_v37 = vsel %vm1864_vm1, %v1811_v58, %v2655_v2   ;;  %v1866_v13 = vsel %vm1864_vm1, %v2651_v13, %v1811_v58  }
0x15b8   : > { %v2654_v2 = vmov %v1865_v37   ;;  %2329 = vmatpush.msk.msra.mxu0 (%p1804_p4), %vm235_vm15, %v1865_v37 }
0x15b9   :  { %2330 = vmatmul.msk.f32.vlgmr.msra.gmra.mxu0 %vm222_vm0, %v2925_v29 }
0x15c1   :  { %2331 = vmatmul.msk.f32.gmra.mxu0 %vm222_vm0, %v2983_v16 }
0x1636   :  { %v1887_v44 = vpop.f32.mrf.mxu0 }
0x1637   :  { %vm1893_vm15 = vcmp.ge.f32.partialorder %v3448_v28, %v1887_v44 }
0x1638   :  { %v1895_v29 = vsel %vm1893_vm15, 1.0, %v2666_v4 }
0x1639   :  { %v3502_v54 = vmul.f32 %v1895_v29, %v3258_v49  ;;  %v1909_v49 = vpop.permute.xlu0 %1908 }
0x163b   :  { %vm1980_vm7 = vcmp.gt.f32.partialorder %v3502_v54, 0.5 }
0x163e   :  { %v1890_v23 = vpop.f32.mrf.mxu0 }
0x163f   :  { %vm1894_vm0 = vcmp.ge.f32.partialorder %v3456_v36, %v1890_v23 }
0x1640   :  { %v1896_v16 = vsel %vm1894_vm0, 1.0, %v2666_v4  ;;  %v1912_v4 = vmul.f32 %v1909_v49, %v1704_v35 }
0x1641   :  { %v3508_v46 = vmul.f32 %v1896_v16, %v3264_v62  ;;  %v1904_v47 = vpop.permute.xlu0 %1903 }
0x1642   :  { %v1911_v15 = vmul.f32 %v1904_v47, %v1703_v48 }
0x1643   :  { %vm1981_vm5 = vcmp.gt.f32.partialorder %v3508_v46, 0.5  ;;  %1920 = vperm.xlu1 %2530, %v3508_v46   ;;  %1939 = vmatpush.msra.mxu1 %v3508_v46 }
0x1645   :  { %1940 = vmatpush.msra.mxu1 %v3502_v54 }
0x1646   :  { %2332 = vmatmul.msk.f32.vlgmr.msra.gmra.mxu1 %vm279_vm12, %v2972_v63 }
0x164b   :  { %1915 = vperm.xlu1 %2530, %v3502_v54  }
0x16b5   :  { %v1921_v43 = vpop.permute.xlu1 %1920 }
0x16b6   :  { %v3519_v62 = vmul.f32 %v1921_v43, %v1912_v4 }
0x16b8   :  { %1962 = vmatpush.msra.mxu2 %v3519_v62 }
0x16bd   :  { %v1916_v21 = vpop.permute.xlu1 %1915 }
0x16be   :  { %v3524_v6 = vmul.f32 %v1916_v21, %v1911_v15 }
0x16c0   :  { %1963 = vmatpush.msra.mxu2 %v3524_v6 }
0x16c1   :  { %2333 = vmatmul.msk.f32.vlgmr.msra.gmra.mxu2 %vm279_vm12, %v2972_v63 }
0x16c3   :  { %v1942_v57 = vpop.f32.mrf.mxu1 }
0x16c4   :  { %v1945_v30 = vmax.f32 %v1942_v57, 1.0 }
0x16c6   :  { %2536 = vrcp.f32 %v1945_v30 }
0x16cc   :  { %v2537_v35 = vpop.eup %2536 }
0x16cd   :  { %1970 = vperm.xlu2 %2531, %v2537_v35  }
0x1727   :  { %v1971_v31 = vpop.permute.xlu2 %1970 }
0x1744   :  { %v1965_v40 = vpop.f32.mrf.mxu2 }
0x1745   :  { %v1973_v28 = vmul.f32 %v1971_v31, %v1965_v40 }
0x1747   :  { %1975 = vrot.lane.b32.xlu2 %v1973_v28, %s2669_s0 }
0x17a1   :  { %v1976_v48 = vpop.permute.xlu2 %1975 }
0x17a2   :  { %v1978_v5 = vadd.f32 %v1976_v48, %v1947_v17 }
0x17a4   :  { %1979 = vst.msk [vmem:[#allocation2] sm:$0x3] %vm771_vm8, %v1978_v5 }
0x17a5 LB: > { %v2682_v63 = vmov 0   ;;  %v1988_v42 = vstv %s2663_s27  ;;  %v2683_v27 = vmov 0.0   ;;  %s2032_s0 = scalar_lea.vmem [#allocation2], %s2663_s27  ;;  %s1987_s27 = sadd.s32 1, %s2663_s27   ;;  %s2663_s27 = sphi %s3531_s27, %s1987_s27  }
0x17a6   : > { %2538 = vset.pattern.permute.xlu0 %v2682_v63  ;;  %2539 = vset.pattern.permute.xlu1 %v2682_v63  ;;  %vm1989_vm12 = vcmp.eq.s32.totalorder %v2909_v55, %v1988_v42  ;;  %vm1990_vm4 = vcmp.eq.s32.totalorder %v2965_v61, %v1988_v42  ;;  %p1984_p5 = scmp.ge.s32.totalorder %s1987_s27, 2  }
0x17a7   : > { %vm1991_vm2 = vmand %vm1989_vm12, %vm1980_vm7  ;;  %v2045_v19 = vld [vmem:[%s3625_s9 + $0x38] sm:$0xff] (%p1984_p5)  ;;  %v2044_v45 = vld [vmem:[%s3625_s9 + $0x30] sm:$0xff] (%p1984_p5)  ;;  %s2684_s21 = smov (%p1984_p5), [#allocation3]  }
0x17a8   : > { %v1993_v59 = vsel %vm1991_vm2, 1, %v2682_v63  ;;  %v2014_v26 = vsel %vm1991_vm2, 1.0, %v2683_v27  ;;  %vm1992_vm8 = vmand %vm1990_vm4, %vm1981_vm5  ;;  %2066 = vmatpush.msra.mxu3 (%p1984_p5), %v2045_v19  ;;  %v2043_v37 = vld [vmem:[%s3625_s9 + $0x28] sm:$0xff] (%p1984_p5)  ;;  %v2049_v39 = vld [vmem:[%s3625_s9 + $0x58] sm:$0xff] (%p1984_p5)  ;;  %s2138_s22 = sshll.u32 (%p1984_p5), %s2684_s21, 4  ;;  %s2139_s22 = int_to_ptr.vmem [resolvable:$true] %s2138_s22 }
0x17a9   : > { %v2016_v36 = vsel %vm516_vm11, %v2014_v26, 0.0  ;;  %1996 = vperm.xlu0 %2538, %v1993_v59   ;;  %v2015_v50 = vsel %vm1992_vm8, 1.0, %v2683_v27  ;;  %v1994_v34 = vsel %vm1992_vm8, 1, %v2682_v63  ;;  %v2042_v55 = vld [vmem:[%s3625_s9 + $0x20] sm:$0xff] (%p1984_p5)  ;;  %2095 = vmatpush.msrb.mxu1 (%p1984_p5), %v2049_v39  ;;  %v2041_v61 = vld [vmem:[%s3625_s9 + $0x18] sm:$0xff] (%p1984_p5)  ;;  %v2040_v33 = vld [vmem:[%s3625_s9 + $0x10] sm:$0xff] (%p1984_p5) }
0x17aa   : > { %v2017_v7 = vsel %vm516_vm11, %v2015_v50, 0.0  ;;  %2067 = vmatpush.msra.mxu3 (%p1984_p5), %v2044_v45  ;;  %v2039_v44 = vld [vmem:[%s3625_s9 + $0x8] sm:$0xff] (%p1984_p5)  ;;  %v2038_v29 = vld [vmem:[%s3625_s9] sm:$0xff] (%p1984_p5)  ;;  %vm2054_vm11 = vcmask (%p1984_p5), 523264   ;;  %v2048_v23 = vld [vmem:[%s3625_s9 + $0x50] sm:$0xff] (%p1984_p5) }
0x17ab   : > { %v2018_v14 = vadd.f32 %v2017_v7, %v2016_v36  ;;  %v2033_v56 = vld [vmem:[%s2032_s0] sm:$0x1]  ;;  %2096 = vmatpush.msrb.mxu1 (%p1984_p5), %v2048_v23  ;;  %v2047_v16 = vld [vmem:[%s3625_s9 + $0x48] sm:$0xff] (%p1984_p5)  ;;  %v2107_v49 = vld [vmem:[%s3626_s10 + $0x18] sm:$0xff] (%p1984_p5) }
0x17ac   :  { %2068 = vmatpush.msra.mxu3 (%p1984_p5), %v2043_v37  ;;  %v2046_v46 = vld [vmem:[%s3625_s9 + $0x40] sm:$0xff] (%p1984_p5)  ;;  %2124 = vmatpush.msrb.mxu2 (%p1984_p5), %v2107_v49  ;;  %v2106_v15 = vld [vmem:[%s3626_s10 + $0x10] sm:$0xff] (%p1984_p5)  ;;  %v2105_v21 = vld [vmem:[%s3626_s10 + $0x8] sm:$0xff] (%p1984_p5) }
0x17ad   : > { %v2019_v52 = vrot.slane %v2018_v14, 4  ;;  %2097 = vmatpush.msrb.mxu1 (%p1984_p5), %v2047_v16  ;;  %v2540_v4 = vld [vmem:[%s3627_s11] ss:$0 sm:$0xff] (%p1984_p5)  ;;  %v2541_v57 = vld [vmem:[%s3627_s11 + $0x1] ss:$0 sm:$0xff] (%p1984_p5) }
0x17ae   :  { %2069 = vmatpush.msra.mxu3 (%p1984_p5), %v2042_v55  ;;  %2125 = vmatpush.msrb.mxu2 (%p1984_p5), %v2106_v15  ;;  %v2542_v40 = vld [vmem:[%s3627_s11 + $0x2] ss:$0 sm:$0xff] (%p1984_p5) }
0x17af   : > { %v2020_v53 = vadd.f32 %v2019_v52, %v2018_v14  ;;  %2098 = vmatpush.msrb.mxu1 (%p1984_p5), %v2046_v46 }
0x17b0   :  { %2070 = vmatpush.msra.mxu3 (%p1984_p5), %v2041_v61  ;;  %2126 = vmatpush.msrb.mxu2 (%p1984_p5), %v2105_v21 }
0x17b1   : > { %1999 = vperm.xlu0 %2538, %v1994_v34   ;;  %v2021_v10 = vrot.slane %v2020_v53, 2 }
0x17b2   :  { %2071 = vmatpush.msra.mxu3 (%p1984_p5), %v2040_v33 }
0x17b3   : > { %v2022_v11 = vadd.f32 %v2021_v10, %v2020_v53 }
0x17b4   :  { %2072 = vmatpush.msra.mxu3 (%p1984_p5), %v2039_v44 }
0x17b5   : > { %v2023_v0 = vrot.slane %v2022_v11, 1 }
0x17b6   :  { %2073 = vmatpush.msra.mxu3 (%p1984_p5), %v2038_v29 }
0x17b7   : > { %v2024_v8 = vadd.f32 %v2023_v0, %v2022_v11 }
0x17b9   : > { %vm2025_vm6 = vcmp.gt.f32.partialorder %v2024_v8, 0.5 }
0x17ba   : > { %v2026_v1 = vsel %vm2025_vm6, 1, %v2682_v63 }
0x17bb   : > { %2028 = vperm.xlu1 %2539, %v2026_v1  }
0x181b   : > { %v1997_v38 = vpop.permute.xlu0 %1996 }
0x181c   : > { %vm2001_vm10 = vcmp.eq.s32.totalorder %v1997_v38, 1 }
0x181d   : > { %v2003_v41 = vsel %vm2001_vm10, %v3524_v6, -inf  ;;  %v2104_v6 = vld [vmem:[%s3626_s10] sm:$0xff] (%p1984_p5)  ;;  %s2140_s10 = sshll.u32 (%p1984_p5), %s3628_s12, 4  ;;  %s2141_s10 = int_to_ptr.hbm [resolvable:$true] %s2140_s10 }
0x181e   : > { %v2005_v22 = vsel %vm164_vm3, %v2003_v41, -inf  ;;  %2127 = vmatpush.msrb.mxu2 (%p1984_p5), %v2104_v6 }
0x1823   : > { %v2000_v18 = vpop.permute.xlu0 %1999 }
0x1824   : > { %vm2002_vm13 = vcmp.eq.s32.totalorder %v2000_v18, 1 }
0x1825   : > { %v2004_v20 = vsel %vm2002_vm13, %v3519_v62, -inf }
0x1826   : > { %v2006_v9 = vsel %vm164_vm3, %v2004_v20, -inf }
0x1827   : > { %v2007_v3 = vmax.f32 %v2005_v22, %v2006_v9 }
0x1829   : > { %v2008_v12 = vrot.slane %v2007_v3, 4 }
0x182b   : > { %v2009_v60 = vmax.f32 %v2007_v3, %v2008_v12 }
0x182d   : > { %v2010_v24 = vrot.slane %v2009_v60, 2  ;;  %v2029_v25 = vpop.permute.xlu1 %2028 }
0x182e   : > { %vm2030_vm14 = vcmp.eq.s32.totalorder %v2029_v25, 1 }
0x182f   : > { %v2011_v13 = vmax.f32 %v2009_v60, %v2010_v24 }
0x1831   : > { %v2012_v2 = vrot.slane %v2011_v13, 1 }
0x1833   : > { %v2013_v58 = vmax.f32 %v2011_v13, %v2012_v2 }
0x1834   :  { %1986 = sbr.rel (!%p1984_p5) target bundleno = 6053 (0x17a5), region = 174 }
0x1835   : > { %v2031_v32 = vsel %vm2030_vm14, %v2013_v58, 0.0 }
0x1836   : > { %v2034_v51 = vadd.f32 %v2033_v56, %v2031_v32 }
0x1838   : > { %2036 = vst.msk [vmem:[%s2032_s0] sm:$0x1] %vm828_vm9, %v2034_v51 }
0x183f   :  { %v2037_v54 = vld [vmem:[#allocation2] sm:$0x3] }
0x1840   :  { %2334 = vmatmul.msk.f32.vlgmr.msra.gmra.mxu3 %vm2054_vm11, %v2037_v54 }
0x18c3   :  { %v2075_v43 = vpop.f32.mrf.mxu3 }
0x18c4   :  { %v2076_v62 = vadd.f32 %v2540_v4, %v2075_v43 }
0x18c6   :  { %v2078_v47 = vmax.f32 %v2076_v62, 0.0 }
0x18c8   :  { %2335 = vmatmul.msk.f32.vlgmr.msrb.gmra.mxu1 %vm164_vm3, %v2078_v47 }
0x1945   :  { %v2100_v30 = vpop.f32.mrf.mxu1 }
0x1946   :  { %v2101_v35 = vadd.f32 %v2541_v57, %v2100_v30 }
0x1948   :  { %v2103_v31 = vmax.f32 %v2101_v35, 0.0 }
0x194a   :  { %2336 = vmatmul.msk.f32.vlgmr.msrb.gmra.mxu2 %vm164_vm3, %v2103_v31 }
0x19cd   :  { %v2129_v28 = vpop.f32.mrf.mxu2 }
0x19ce   :  { %v2130_v17 = vadd.f32 %v2542_v40, %v2129_v28 }
0x19d0   :  { %2132 = vst [vmem:[#allocation3] sm:$0x3] %v2130_v17 }
0x19d1   :  { %2143 = dma.vmem_to_hbm [thread:$0]  %s2139_s22, 32, %s2141_s10, [#allocation4]  }
0x19d2   :  { %2615 = dma.done.wait [#allocation4], 32  }
0x19d3   :  { %2616 = vsyncadd [#allocation4], 4294967264 }
0x19d4   :  { %2148 = vsyncpa [#allocation4], 1 }

</bundles_post_ra>
